<compile_context>
chip_gen: v7x
topology: tpu7x:2x2x1
jax: 0.10.0
libtpu: 0.0.40
codegen_flags: <defaults>
</compile_context>

<pallas_src>
import functools
import math

import jax
import jax.numpy as jnp
from jax.experimental import pallas as pl
from jax.experimental.pallas import tpu as pltpu

LATENT_DIM = 50
IN_DIM = 28 * 28          # 784
HID_DIM = 500

# lane-padded sizes (multiples of 128)
IN_PAD = 896              # 784 -> 7 * 128
HID_PAD = 512             # 500 -> 4 * 128
LAT_PAD = 128             # 50  -> 128
OUT_PAD = 896             # 784 -> 7 * 128

# 256 rows per grid step: fills the 256-tall MXU on v6e/v7x, keeps the per-step
# working set far below v5e's 16 MiB scoped-VMEM default, and yields >= 2 grid
# steps whenever B > 256 so the "parallel" axis uses both v7x TensorCores.
MAX_TILE_B = 256


def _round_up(x, m):
    return (x + m - 1) // m * m


# ---- Lanczos approximation for lgamma (Mosaic has no native lgamma) --------
_LANCZOS_G = 7.0
_LANCZOS_COEF = (
    0.99999999999980993,
    676.5203681218851,
    -1259.1392167224028,
    771.32342877765313,
    -176.61502916214059,
    12.507343278686905,
    -0.13857109526572012,
    9.9843695780195716e-6,
    1.5056327351493116e-7,
)
_HALF_LOG_2PI = 0.5 * math.log(2.0 * math.pi)


def _poly_mul(a, b):
    out = [0.0] * (len(a) + len(b) - 1)
    for i, ai in enumerate(a):
        for j, bj in enumerate(b):
            out[i + j] += ai * bj
    return out


def _lanczos_rational():
    """Collapse s(w) = c0 + sum_i c_i/(w+i) into P(w)/Q(w), Q(w) = prod(w+i).

    Returns (P, Q) coefficient tuples, highest degree first, computed once in
    float64 at import time.  In-kernel this is 2 Horner chains + 1 divide
    instead of 8 exact reciprocals per element.
    """
    n = len(_LANCZOS_COEF) - 1          # 8
    q = [1.0]
    for i in range(1, n + 1):
        q = _poly_mul(q, [float(i), 1.0])          # low -> high degree
    p = [_LANCZOS_COEF[0] * c for c in q]
    for i in range(1, n + 1):
        qi = [1.0]
        for j in range(1, n + 1):
            if j != i:
                qi = _poly_mul(qi, [float(j), 1.0])
        for k, c in enumerate(qi):
            p[k] += _LANCZOS_COEF[i] * c
    return tuple(reversed(p)), tuple(reversed(q))


_LANCZOS_P, _LANCZOS_Q = _lanczos_rational()


def _horner(coeffs_high_to_low, w):
    acc = jnp.full_like(w, coeffs_high_to_low[0])
    for c in coeffs_high_to_low[1:]:
        acc = acc * w + c
    return acc


def _lgamma_lanczos(z):
    """log(Gamma(z)) for z >= 0.5 via the rationalized Lanczos series."""
    w = z - 1.0
    s = _horner(_LANCZOS_P, w) * pl.reciprocal(_horner(_LANCZOS_Q, w))
    t = w + _LANCZOS_G + 0.5
    return _HALF_LOG_2PI + (w + 0.5) * jnp.log(t) - t + jnp.log(s)


def _log1p(x):
    """Stable log(1 + x) from log / where; denominator guarded against 0/0."""
    u = 1.0 + x
    d = u - 1.0
    d_safe = jnp.where(d == 0.0, 1.0, d)
    return jnp.where(d == 0.0, x, jnp.log(u) * (x / d_safe))


def _softplus(x):
    """Matches torch.nn.functional.softplus (threshold = 20), stable for x << 0."""
    sp = _log1p(jnp.exp(jnp.minimum(x, 20.0)))
    return jnp.where(x > 20.0, x, sp)


# --------------------------- shared in-kernel math ---------------------------
def _encode_alpha(x, w1, b1, w2, b2, w3, b3):
    """dense1/relu -> dense2/relu -> dense3/softplus; bf16 MXU, f32 accumulate."""
    h1 = jnp.dot(x, w1, preferred_element_type=jnp.float32) + b1
    h1 = jnp.maximum(h1, 0.0).astype(jnp.bfloat16)
    h2 = jnp.dot(h1, w2, preferred_element_type=jnp.float32) + b2
    h2 = jnp.maximum(h2, 0.0).astype(jnp.bfloat16)
    a3 = jnp.dot(h2, w3, preferred_element_type=jnp.float32) + b3
    # tiny clamp so alpha can never be exactly 0 (lgamma/1/alpha stay finite)
    return jnp.maximum(_softplus(a3), 1e-30)


def _sample_v(alpha, u):
    """v = (u * alpha * Gamma(alpha))**(1/alpha) == (u * Gamma(alpha+1))**(1/alpha)."""
    log_base = jnp.log(u) + _lgamma_lanczos(alpha + 1.0)
    return jnp.exp(log_base * pl.reciprocal(alpha))       # u == 0 -> v == 0


def _decode(z, w4, b4, w5, b5):
    h = jnp.dot(z.astype(jnp.bfloat16), w4, preferred_element_type=jnp.float32) + b4
    h = jnp.maximum(h, 0.0).astype(jnp.bfloat16)
    return jnp.dot(h, w5, preferred_element_type=jnp.float32) + b5


# --------------------------- fused kernel (grid == 1) ------------------------
def _fused_kernel(x_ref, u_ref, w1_ref, b1_ref, w2_ref, b2_ref, w3_ref, b3_ref,
                  w4_ref, b4_ref, w5_ref, b5_ref,
                  xhat_ref, z_ref, alpha_ref, *, batch, latent):
    alpha = _encode_alpha(x_ref[...], w1_ref[...], b1_ref[...], w2_ref[...],
                          b2_ref[...], w3_ref[...], b3_ref[...])
    alpha_ref[...] = alpha

    v = _sample_v(alpha, u_ref[...])
    rows = jax.lax.broadcasted_iota(jnp.int32, v.shape, 0)
    cols = jax.lax.broadcasted_iota(jnp.int32, v.shape, 1)
    v = jnp.where((rows < batch) & (cols < latent), v, 0.0)

    # global normalization (reference sums over ALL elements); padded entries
    # are exactly zero so only real elements contribute.
    col_sum = jnp.sum(v, axis=0, keepdims=True)            # (1, LAT_PAD)
    total = jnp.sum(col_sum, axis=1, keepdims=True)        # (1, 1)
    # NOTE: total == 0 (all u == 0) would give inf, mirroring the reference.
    z = v * pl.reciprocal(total)
    z_ref[...] = z

    xhat_ref[...] = _decode(z, w4_ref[...], b4_ref[...], w5_ref[...], b5_ref[...])


# --------------------------- encoder kernel (grid > 1) -----------------------
def _encoder_kernel(x_ref, u_ref, w1_ref, b1_ref, w2_ref, b2_ref, w3_ref, b3_ref,
                    alpha_ref, v_ref, psum_ref, *, batch, tile_b, latent):
    alpha = _encode_alpha(x_ref[...], w1_ref[...], b1_ref[...], w2_ref[...],
                          b2_ref[...], w3_ref[...], b3_ref[...])
    alpha_ref[...] = alpha

    v = _sample_v(alpha, u_ref[...])
    rows = (jax.lax.broadcasted_iota(jnp.int32, v.shape, 0)
            + pl.program_id(0) * tile_b)
    cols = jax.lax.broadcasted_iota(jnp.int32, v.shape, 1)
    v = jnp.where((rows < batch) & (cols < latent), v, 0.0)
    v_ref[...] = v

    # per-tile partial sum (lane-dense (8,128) block) so the wrapper never has
    # to re-read the full v array for the global normalization.
    part = jnp.sum(v, axis=0, keepdims=True)                # (1, LAT_PAD)
    psum_ref[...] = jnp.broadcast_to(part, (8, LAT_PAD))


# --------------------------- decoder kernel (grid > 1) -----------------------
def _decoder_kernel(inv_ref, v_ref, w4_ref, b4_ref, w5_ref, b5_ref,
                    z_ref, xhat_ref):
    # z = v / sum(v) as a broadcast multiply by the precomputed 1/sum (SMEM).
    z = v_ref[...] * inv_ref[0, 0]
    z_ref[...] = z
    xhat_ref[...] = _decode(z, w4_ref[...], b4_ref[...], w5_ref[...], b5_ref[...])


# --------------------------- parameters --------------------------------------
def init_params(key):
    """Deterministic synthetic parameters, zero-padded; weights bf16, biases f32."""
    ks = jax.random.split(key, 10)

    def dense(kw, kb, fan_in, fan_out, pad_in, pad_out):
        w = jax.random.normal(kw, (fan_in, fan_out), jnp.float32) * 0.05
        b = jax.random.normal(kb, (1, fan_out), jnp.float32) * 0.01
        w = jnp.zeros((pad_in, pad_out), jnp.float32).at[:fan_in, :fan_out].set(w)
        b = jnp.zeros((1, pad_out), jnp.float32).at[:, :fan_out].set(b)
        return w.astype(jnp.bfloat16), b

    w1, b1 = dense(ks[0], ks[1], IN_DIM, HID_DIM, IN_PAD, HID_PAD)       # enc dense1
    w2, b2 = dense(ks[2], ks[3], HID_DIM, HID_DIM, HID_PAD, HID_PAD)     # enc dense2
    w3, b3 = dense(ks[4], ks[5], HID_DIM, LATENT_DIM, HID_PAD, LAT_PAD)  # enc dense3
    w4, b4 = dense(ks[6], ks[7], LATENT_DIM, HID_DIM, LAT_PAD, HID_PAD)  # dec dense1
    w5, b5 = dense(ks[8], ks[9], HID_DIM, IN_DIM, HID_PAD, OUT_PAD)      # dec dense2
    return (w1, b1, w2, b2, w3, b3, w4, b4, w5, b5)


# --------------------------- forward wrapper ---------------------------------
@functools.partial(jax.jit, static_argnames=("max_tile_b",))
def dirvae_forward(x, u, params, max_tile_b=MAX_TILE_B):
    """x: (B, 1, 28, 28) NCHW.  u: (B, LATENT_DIM) uniform noise in [0, 1).

    Returns (x_hat, z, alpha_hat) matching the PyTorch DirVAE/Encoder forward.
    """
    B = x.shape[0]
    tile_b = min(_round_up(max_tile_b, 8), _round_up(B, 8))
    b_pad = _round_up(B, tile_b)
    n_tiles = b_pad // tile_b

    w1, b1, w2, b2, w3, b3, w4, b4, w5, b5 = params

    # pad in bf16 directly (half the prologue copy traffic vs f32-then-cast)
    xf = x.reshape(B, IN_DIM).astype(jnp.bfloat16)
    xp = jnp.zeros((b_pad, IN_PAD), jnp.bfloat16).at[:B, :IN_DIM].set(xf)
    up = jnp.full((b_pad, LAT_PAD), 0.5, jnp.float32).at[:B, :LATENT_DIM].set(
        u.astype(jnp.float32))

    row_spec = lambda last: pl.BlockSpec((tile_b, last), lambda i: (i, 0))
    const_spec = lambda shape: pl.BlockSpec(shape, lambda i: (0, 0))
    cp = pltpu.CompilerParams(dimension_semantics=("parallel",))

    enc_w_specs = [
        const_spec((IN_PAD, HID_PAD)),       # w1 (VMEM-resident across steps)
        const_spec((1, HID_PAD)),            # b1
        const_spec((HID_PAD, HID_PAD)),      # w2
        const_spec((1, HID_PAD)),            # b2
        const_spec((HID_PAD, LAT_PAD)),      # w3
        const_spec((1, LAT_PAD)),            # b3
    ]
    dec_w_specs = [
        const_spec((LAT_PAD, HID_PAD)),      # w4
        const_spec((1, HID_PAD)),            # b4
        const_spec((HID_PAD, OUT_PAD)),      # w5
        const_spec((1, OUT_PAD)),            # b5
    ]

    if n_tiles == 1:
        # single tile: fuse encoder + global sum + decoder into one launch
        xhat_p, z_p, alpha_p = pl.pallas_call(
            functools.partial(_fused_kernel, batch=B, latent=LATENT_DIM),
            out_shape=(jax.ShapeDtypeStruct((b_pad, OUT_PAD), jnp.float32),
                       jax.ShapeDtypeStruct((b_pad, LAT_PAD), jnp.float32),
                       jax.ShapeDtypeStruct((b_pad, LAT_PAD), jnp.float32)),
            grid=(1,),
            in_specs=[row_spec(IN_PAD), row_spec(LAT_PAD)]
                     + enc_w_specs + dec_w_specs,
            out_specs=(row_spec(OUT_PAD), row_spec(LAT_PAD), row_spec(LAT_PAD)),
            compiler_params=cp,
        )(xp, up, w1, b1, w2, b2, w3, b3, w4, b4, w5, b5)
    else:
        # ---- pass 1: encoder (alpha, unnormalized v, per-tile partial sums) -
        alpha_p, v_p, psum_p = pl.pallas_call(
            functools.partial(_encoder_kernel, batch=B, tile_b=tile_b,
                              latent=LATENT_DIM),
            out_shape=(jax.ShapeDtypeStruct((b_pad, LAT_PAD), jnp.float32),
                       jax.ShapeDtypeStruct((b_pad, LAT_PAD), jnp.float32),
                       jax.ShapeDtypeStruct((n_tiles * 8, LAT_PAD), jnp.float32)),
            grid=(n_tiles,),
            in_specs=[row_spec(IN_PAD), row_spec(LAT_PAD)] + enc_w_specs,
            out_specs=(row_spec(LAT_PAD), row_spec(LAT_PAD),
                       pl.BlockSpec((8, LAT_PAD), lambda i: (i, 0))),
            compiler_params=cp,
        )(xp, up, w1, b1, w2, b2, w3, b3)

        # global normalization from the tiny per-tile partial sums
        total = jnp.sum(psum_p.reshape(n_tiles, 8, LAT_PAD)[:, 0, :])
        inv_total = (1.0 / total).reshape(1, 1).astype(jnp.float32)

        # ---- pass 2: normalize + decoder ------------------------------------
        z_p, xhat_p = pl.pallas_call(
            _decoder_kernel,
            out_shape=(jax.ShapeDtypeStruct((b_pad, LAT_PAD), jnp.float32),
                       jax.ShapeDtypeStruct((b_pad, OUT_PAD), jnp.float32)),
            grid=(n_tiles,),
            in_specs=[pl.BlockSpec((1, 1), lambda i: (0, 0),
                                   memory_space=pltpu.MemorySpace.SMEM)]
                     + [row_spec(LAT_PAD)] + dec_w_specs,
            out_specs=(row_spec(LAT_PAD), row_spec(OUT_PAD)),
            compiler_params=cp,
        )(inv_total, v_p, w4, b4, w5, b5)

    x_hat = xhat_p[:B, :IN_DIM]
    z = z_p[:B, :LATENT_DIM]
    alpha_hat = alpha_p[:B, :LATENT_DIM]
    return x_hat, z, alpha_hat


if __name__ == "__main__":
    key = jax.random.PRNGKey(0)
    k_param, k_x, k_u, k_x2, k_u2 = jax.random.split(key, 5)

    params = init_params(k_param)

    # ---- small batch: fused single-launch path ------------------------------
    B = 2
    x = jax.random.uniform(k_x, (B, 1, 28, 28), jnp.float32)    # MNIST-like NCHW
    u = jax.random.uniform(k_u, (B, LATENT_DIM), jnp.float32)   # noise for sample()
    x_hat, z, alpha_hat = dirvae_forward(x, u, params)
    jax.block_until_ready((x_hat, z, alpha_hat))

    assert x_hat.shape == (B, IN_DIM)
    assert z.shape == (B, LATENT_DIM) and alpha_hat.shape == (B, LATENT_DIM)
    assert bool(jnp.all(jnp.isfinite(x_hat)))
    assert bool(jnp.all(jnp.isfinite(z)))
    assert bool(jnp.all(alpha_hat > 0.0))
    assert abs(float(jnp.sum(z)) - 1.0) < 1e-3   # global normalization

    # ---- multi-tile (two-pass) path: small shapes, forced tiny tile ---------
    B2 = 20
    x2 = jax.random.uniform(k_x2, (B2, 1, 28, 28), jnp.float32)
    u2 = jax.random.uniform(k_u2, (B2, LATENT_DIM), jnp.float32)
    x_hat2, z2, alpha2 = dirvae_forward(x2, u2, params, max_tile_b=8)
    jax.block_until_ready((x_hat2, z2, alpha2))

    assert bool(jnp.all(jnp.isfinite(x_hat2)))
    assert bool(jnp.all(jnp.isfinite(z2)))
    assert bool(jnp.all(alpha2 > 0.0))
    assert abs(float(jnp.sum(z2)) - 1.0) < 1e-3

    print("KERNEL_OK")
</pallas_src>

<mosaic_0001>
module attributes {stable_mosaic.version = 11 : i64} {
  func.func @_fused_kernel(%arg0: i32, %arg1: memref<8x896xbf16, #tpu.memory_space<vmem>>, %arg2: memref<8x128xf32, #tpu.memory_space<vmem>>, %arg3: memref<896x512xbf16, #tpu.memory_space<vmem>>, %arg4: memref<1x512xf32, #tpu.memory_space<vmem>>, %arg5: memref<512x512xbf16, #tpu.memory_space<vmem>>, %arg6: memref<1x512xf32, #tpu.memory_space<vmem>>, %arg7: memref<512x128xbf16, #tpu.memory_space<vmem>>, %arg8: memref<1x128xf32, #tpu.memory_space<vmem>>, %arg9: memref<128x512xbf16, #tpu.memory_space<vmem>>, %arg10: memref<1x512xf32, #tpu.memory_space<vmem>>, %arg11: memref<512x896xbf16, #tpu.memory_space<vmem>>, %arg12: memref<1x896xf32, #tpu.memory_space<vmem>>, %arg13: memref<8x896xf32, #tpu.memory_space<vmem>>, %arg14: memref<8x128xf32, #tpu.memory_space<vmem>>, %arg15: memref<8x128xf32, #tpu.memory_space<vmem>>) attributes {dimension_semantics = [#tpu.dimension_semantics<parallel>], iteration_bounds = array<i64: 1>, scalar_prefetch = 0 : i64, scratch_operands = 0 : i64, tpu.core_type = #tpu.core_type<tc>, window_params = [{transform_indices = @transform_0, window_bounds = array<i64: 8, 896>}, {transform_indices = @transform_1, window_bounds = array<i64: 8, 128>}, {pipeline_mode = #tpu.pipeline_mode<synchronous>, transform_indices = @transform_2, window_bounds = array<i64: 896, 512>}, {pipeline_mode = #tpu.pipeline_mode<synchronous>, transform_indices = @transform_3, window_bounds = array<i64: 1, 512>}, {pipeline_mode = #tpu.pipeline_mode<synchronous>, transform_indices = @transform_4, window_bounds = array<i64: 512, 512>}, {pipeline_mode = #tpu.pipeline_mode<synchronous>, transform_indices = @transform_5, window_bounds = array<i64: 1, 512>}, {pipeline_mode = #tpu.pipeline_mode<synchronous>, transform_indices = @transform_6, window_bounds = array<i64: 512, 128>}, {pipeline_mode = #tpu.pipeline_mode<synchronous>, transform_indices = @transform_7, window_bounds = array<i64: 1, 128>}, {pipeline_mode = #tpu.pipeline_mode<synchronous>, transform_indices = @transform_8, window_bounds = array<i64: 128, 512>}, {pipeline_mode = #tpu.pipeline_mode<synchronous>, transform_indices = @transform_9, window_bounds = array<i64: 1, 512>}, {pipeline_mode = #tpu.pipeline_mode<synchronous>, transform_indices = @transform_10, window_bounds = array<i64: 512, 896>}, {pipeline_mode = #tpu.pipeline_mode<synchronous>, transform_indices = @transform_11, window_bounds = array<i64: 1, 896>}, {transform_indices = @transform_12, window_bounds = array<i64: 8, 896>}, {transform_indices = @transform_13, window_bounds = array<i64: 8, 128>}, {transform_indices = @transform_14, window_bounds = array<i64: 8, 128>}]} {
    %c0 = arith.constant 0 : index
    %c0_0 = arith.constant 0 : index
    %0 = vector.load %arg1[%c0, %c0_0] : memref<8x896xbf16, #tpu.memory_space<vmem>>, vector<8x896xbf16>
    %c0_1 = arith.constant 0 : index
    %c0_2 = arith.constant 0 : index
    %1 = vector.load %arg3[%c0_1, %c0_2] : memref<896x512xbf16, #tpu.memory_space<vmem>>, vector<896x512xbf16>
    %c0_3 = arith.constant 0 : index
    %c0_4 = arith.constant 0 : index
    %2 = vector.load %arg4[%c0_3, %c0_4] : memref<1x512xf32, #tpu.memory_space<vmem>>, vector<1x512xf32>
    %c0_5 = arith.constant 0 : index
    %c0_6 = arith.constant 0 : index
    %3 = vector.load %arg5[%c0_5, %c0_6] : memref<512x512xbf16, #tpu.memory_space<vmem>>, vector<512x512xbf16>
    %c0_7 = arith.constant 0 : index
    %c0_8 = arith.constant 0 : index
    %4 = vector.load %arg6[%c0_7, %c0_8] : memref<1x512xf32, #tpu.memory_space<vmem>>, vector<1x512xf32>
    %c0_9 = arith.constant 0 : index
    %c0_10 = arith.constant 0 : index
    %5 = vector.load %arg7[%c0_9, %c0_10] : memref<512x128xbf16, #tpu.memory_space<vmem>>, vector<512x128xbf16>
    %c0_11 = arith.constant 0 : index
    %c0_12 = arith.constant 0 : index
    %6 = vector.load %arg8[%c0_11, %c0_12] : memref<1x128xf32, #tpu.memory_space<vmem>>, vector<1x128xf32>
    %cst = arith.constant dense<0.000000e+00> : vector<8x512xf32>
    %7 = tpu.matmul %0, %1, %cst {dimension_numbers = #tpu.dot_dimension_numbers<[1], [0], [0], [1], [0, 0, 1, 1], [], []>} : vector<8x896xbf16>, vector<896x512xbf16>, vector<8x512xf32> -> vector<8x512xf32>
    %8 = vector.broadcast %2 : vector<1x512xf32> to vector<8x512xf32>
    %9 = arith.addf %7, %8 : vector<8x512xf32>
    %cst_13 = arith.constant 0.000000e+00 : f32
    %10 = vector.broadcast %cst_13 : f32 to vector<8x512xf32>
    %11 = arith.maximumf %9, %10 : vector<8x512xf32>
    %12 = arith.truncf %11 : vector<8x512xf32> to vector<8x512xbf16>
    %cst_14 = arith.constant dense<0.000000e+00> : vector<8x512xf32>
    %13 = tpu.matmul %12, %3, %cst_14 {dimension_numbers = #tpu.dot_dimension_numbers<[1], [0], [0], [1], [0, 0, 1, 1], [], []>} : vector<8x512xbf16>, vector<512x512xbf16>, vector<8x512xf32> -> vector<8x512xf32>
    %14 = vector.broadcast %4 : vector<1x512xf32> to vector<8x512xf32>
    %15 = arith.addf %13, %14 : vector<8x512xf32>
    %cst_15 = arith.constant 0.000000e+00 : f32
    %16 = vector.broadcast %cst_15 : f32 to vector<8x512xf32>
    %17 = arith.maximumf %15, %16 : vector<8x512xf32>
    %18 = arith.truncf %17 : vector<8x512xf32> to vector<8x512xbf16>
    %cst_16 = arith.constant dense<0.000000e+00> : vector<8x128xf32>
    %19 = tpu.matmul %18, %5, %cst_16 {dimension_numbers = #tpu.dot_dimension_numbers<[1], [0], [0], [1], [0, 0, 1, 1], [], []>} : vector<8x512xbf16>, vector<512x128xbf16>, vector<8x128xf32> -> vector<8x128xf32>
    %20 = vector.broadcast %6 : vector<1x128xf32> to vector<8x128xf32>
    %21 = arith.addf %19, %20 : vector<8x128xf32>
    %cst_17 = arith.constant 2.000000e+01 : f32
    %22 = vector.broadcast %cst_17 : f32 to vector<8x128xf32>
    %23 = arith.minimumf %21, %22 : vector<8x128xf32>
    %24 = math.exp %23 : vector<8x128xf32>
    %cst_18 = arith.constant 1.000000e+00 : f32
    %25 = vector.broadcast %cst_18 : f32 to vector<8x128xf32>
    %26 = arith.addf %25, %24 : vector<8x128xf32>
    %cst_19 = arith.constant 1.000000e+00 : f32
    %27 = vector.broadcast %cst_19 : f32 to vector<8x128xf32>
    %28 = arith.subf %26, %27 : vector<8x128xf32>
    %cst_20 = arith.constant 0.000000e+00 : f32
    %29 = vector.broadcast %cst_20 : f32 to vector<8x128xf32>
    %30 = arith.cmpf oeq, %28, %29 : vector<8x128xf32>
    %cst_21 = arith.constant 1.000000e+00 : f32
    %31 = vector.broadcast %cst_21 : f32 to vector<8x128xf32>
    %32 = arith.select %30, %31, %28 : vector<8x128xi1>, vector<8x128xf32>
    %cst_22 = arith.constant 0.000000e+00 : f32
    %33 = vector.broadcast %cst_22 : f32 to vector<8x128xf32>
    %34 = arith.cmpf oeq, %28, %33 : vector<8x128xf32>
    %35 = math.log %26 : vector<8x128xf32>
    %36 = arith.divf %24, %32 : vector<8x128xf32>
    %37 = arith.mulf %35, %36 : vector<8x128xf32>
    %38 = arith.select %34, %24, %37 : vector<8x128xi1>, vector<8x128xf32>
    %cst_23 = arith.constant 2.000000e+01 : f32
    %39 = vector.broadcast %cst_23 : f32 to vector<8x128xf32>
    %40 = arith.cmpf ogt, %21, %39 : vector<8x128xf32>
    %41 = arith.select %40, %21, %38 : vector<8x128xi1>, vector<8x128xf32>
    %cst_24 = arith.constant 1.000000e-30 : f32
    %42 = vector.broadcast %cst_24 : f32 to vector<8x128xf32>
    %43 = arith.maximumf %41, %42 : vector<8x128xf32>
    %c0_25 = arith.constant 0 : index
    %c0_26 = arith.constant 0 : index
    %44 = vector.load %arg15[%c0_25, %c0_26] : memref<8x128xf32, #tpu.memory_space<vmem>>, vector<8x128xf32>
    tpu.vector_store %arg15[%c0_25, %c0_26], %43 {strides = array<i32>} : memref<8x128xf32, #tpu.memory_space<vmem>>, vector<8x128xf32>,
    %c0_27 = arith.constant 0 : index
    %c0_28 = arith.constant 0 : index
    %45 = vector.load %arg2[%c0_27, %c0_28] : memref<8x128xf32, #tpu.memory_space<vmem>>, vector<8x128xf32>
    %46 = math.log %45 : vector<8x128xf32>
    %cst_29 = arith.constant 1.000000e+00 : f32
    %47 = vector.broadcast %cst_29 : f32 to vector<8x128xf32>
    %48 = arith.addf %43, %47 : vector<8x128xf32>
    %cst_30 = arith.constant 1.000000e+00 : f32
    %49 = vector.broadcast %cst_30 : f32 to vector<8x128xf32>
    %50 = arith.subf %48, %49 : vector<8x128xf32>
    %cst_31 = arith.constant 1.000000e+00 : f32
    %51 = vector.broadcast %cst_31 : f32 to vector<8x128xf32>
    %52 = arith.mulf %51, %50 : vector<8x128xf32>
    %cst_32 = arith.constant 60.4583321 : f32
    %53 = vector.broadcast %cst_32 : f32 to vector<8x128xf32>
    %54 = arith.addf %52, %53 : vector<8x128xf32>
    %55 = arith.mulf %54, %50 : vector<8x128xf32>
    %cst_33 = arith.constant 1599.04248 : f32
    %56 = vector.broadcast %cst_33 : f32 to vector<8x128xf32>
    %57 = arith.addf %55, %56 : vector<8x128xf32>
    %58 = arith.mulf %57, %50 : vector<8x128xf32>
    %cst_34 = arith.constant 24165.5098 : f32
    %59 = vector.broadcast %cst_34 : f32 to vector<8x128xf32>
    %60 = arith.addf %58, %59 : vector<8x128xf32>
    %61 = arith.mulf %60, %50 : vector<8x128xf32>
    %cst_35 = arith.constant 228235.219 : f32
    %62 = vector.broadcast %cst_35 : f32 to vector<8x128xf32>
    %63 = arith.addf %61, %62 : vector<8x128xf32>
    %64 = arith.mulf %63, %50 : vector<8x128xf32>
    %cst_36 = arith.constant 1379496.25 : f32
    %65 = vector.broadcast %cst_36 : f32 to vector<8x128xf32>
    %66 = arith.addf %64, %65 : vector<8x128xf32>
    %67 = arith.mulf %66, %50 : vector<8x128xf32>
    %cst_37 = arith.constant 0x4A9F05EA : f32
    %68 = vector.broadcast %cst_37 : f32 to vector<8x128xf32>
    %69 = arith.addf %67, %68 : vector<8x128xf32>
    %70 = arith.mulf %69, %50 : vector<8x128xf32>
    %cst_38 = arith.constant 0x4B2B9D51 : f32
    %71 = vector.broadcast %cst_38 : f32 to vector<8x128xf32>
    %72 = arith.addf %70, %71 : vector<8x128xf32>
    %73 = arith.mulf %72, %50 : vector<8x128xf32>
    %cst_39 = arith.constant 0x4B220ADA : f32
    %74 = vector.broadcast %cst_39 : f32 to vector<8x128xf32>
    %75 = arith.addf %73, %74 : vector<8x128xf32>
    %cst_40 = arith.constant 1.000000e+00 : f32
    %76 = vector.broadcast %cst_40 : f32 to vector<8x128xf32>
    %77 = arith.mulf %76, %50 : vector<8x128xf32>
    %cst_41 = arith.constant 3.600000e+01 : f32
    %78 = vector.broadcast %cst_41 : f32 to vector<8x128xf32>
    %79 = arith.addf %77, %78 : vector<8x128xf32>
    %80 = arith.mulf %79, %50 : vector<8x128xf32>
    %cst_42 = arith.constant 5.460000e+02 : f32
    %81 = vector.broadcast %cst_42 : f32 to vector<8x128xf32>
    %82 = arith.addf %80, %81 : vector<8x128xf32>
    %83 = arith.mulf %82, %50 : vector<8x128xf32>
    %cst_43 = arith.constant 4.536000e+03 : f32
    %84 = vector.broadcast %cst_43 : f32 to vector<8x128xf32>
    %85 = arith.addf %83, %84 : vector<8x128xf32>
    %86 = arith.mulf %85, %50 : vector<8x128xf32>
    %cst_44 = arith.constant 2.244900e+04 : f32
    %87 = vector.broadcast %cst_44 : f32 to vector<8x128xf32>
    %88 = arith.addf %86, %87 : vector<8x128xf32>
    %89 = arith.mulf %88, %50 : vector<8x128xf32>
    %cst_45 = arith.constant 6.728400e+04 : f32
    %90 = vector.broadcast %cst_45 : f32 to vector<8x128xf32>
    %91 = arith.addf %89, %90 : vector<8x128xf32>
    %92 = arith.mulf %91, %50 : vector<8x128xf32>
    %cst_46 = arith.constant 1.181240e+05 : f32
    %93 = vector.broadcast %cst_46 : f32 to vector<8x128xf32>
    %94 = arith.addf %92, %93 : vector<8x128xf32>
    %95 = arith.mulf %94, %50 : vector<8x128xf32>
    %cst_47 = arith.constant 1.095840e+05 : f32
    %96 = vector.broadcast %cst_47 : f32 to vector<8x128xf32>
    %97 = arith.addf %95, %96 : vector<8x128xf32>
    %98 = arith.mulf %97, %50 : vector<8x128xf32>
    %cst_48 = arith.constant 4.032000e+04 : f32
    %99 = vector.broadcast %cst_48 : f32 to vector<8x128xf32>
    %100 = arith.addf %98, %99 : vector<8x128xf32>
    %101 = tpu.reciprocal %100 : vector<8x128xf32> -> vector<8x128xf32>
    %102 = arith.mulf %75, %101 : vector<8x128xf32>
    %cst_49 = arith.constant 7.000000e+00 : f32
    %103 = vector.broadcast %cst_49 : f32 to vector<8x128xf32>
    %104 = arith.addf %50, %103 : vector<8x128xf32>
    %cst_50 = arith.constant 5.000000e-01 : f32
    %105 = vector.broadcast %cst_50 : f32 to vector<8x128xf32>
    %106 = arith.addf %104, %105 : vector<8x128xf32>
    %cst_51 = arith.constant 5.000000e-01 : f32
    %107 = vector.broadcast %cst_51 : f32 to vector<8x128xf32>
    %108 = arith.addf %50, %107 : vector<8x128xf32>
    %109 = math.log %106 : vector<8x128xf32>
    %110 = arith.mulf %108, %109 : vector<8x128xf32>
    %cst_52 = arith.constant 0.918938517 : f32
    %111 = vector.broadcast %cst_52 : f32 to vector<8x128xf32>
    %112 = arith.addf %111, %110 : vector<8x128xf32>
    %113 = arith.subf %112, %106 : vector<8x128xf32>
    %114 = math.log %102 : vector<8x128xf32>
    %115 = arith.addf %113, %114 : vector<8x128xf32>
    %116 = arith.addf %46, %115 : vector<8x128xf32>
    %117 = tpu.reciprocal %43 : vector<8x128xf32> -> vector<8x128xf32>
    %118 = arith.mulf %116, %117 : vector<8x128xf32>
    %119 = math.exp %118 : vector<8x128xf32>
    %120 = tpu.iota {dimensions = array<i32: 0>} : vector<8x128xi32>
    %121 = tpu.iota {dimensions = array<i32: 1>} : vector<8x128xi32>
    %c2_i32 = arith.constant 2 : i32
    %122 = vector.broadcast %c2_i32 : i32 to vector<8x128xi32>
    %123 = arith.cmpi slt, %120, %122 : vector<8x128xi32>
    %c50_i32 = arith.constant 50 : i32
    %124 = vector.broadcast %c50_i32 : i32 to vector<8x128xi32>
    %125 = arith.cmpi slt, %121, %124 : vector<8x128xi32>
    %126 = arith.andi %123, %125 : vector<8x128xi1>
    %cst_53 = arith.constant 0.000000e+00 : f32
    %127 = vector.broadcast %cst_53 : f32 to vector<8x128xf32>
    %128 = arith.select %126, %119, %127 : vector<8x128xi1>, vector<8x128xf32>
    %cst_54 = arith.constant dense<0.000000e+00> : vector<128xf32>
    %129 = vector.multi_reduction <add>, %128, %cst_54 [0] : vector<8x128xf32> to vector<128xf32>
    %130 = vector.shape_cast %129 : vector<128xf32> to vector<1x128xf32>
    %cst_55 = arith.constant dense<0.000000e+00> : vector<1xf32>
    %131 = vector.multi_reduction <add>, %130, %cst_55 [1] : vector<1x128xf32> to vector<1xf32>
    %132 = vector.shape_cast %131 : vector<1xf32> to vector<1x1xf32>
    %133 = tpu.reciprocal %132 : vector<1x1xf32> -> vector<1x1xf32>
    %134 = vector.broadcast %133 : vector<1x1xf32> to vector<8x128xf32>
    %135 = arith.mulf %128, %134 : vector<8x128xf32>
    %c0_56 = arith.constant 0 : index
    %c0_57 = arith.constant 0 : index
    %136 = vector.load %arg14[%c0_56, %c0_57] : memref<8x128xf32, #tpu.memory_space<vmem>>, vector<8x128xf32>
    tpu.vector_store %arg14[%c0_56, %c0_57], %135 {strides = array<i32>} : memref<8x128xf32, #tpu.memory_space<vmem>>, vector<8x128xf32>,
    %c0_58 = arith.constant 0 : index
    %c0_59 = arith.constant 0 : index
    %137 = vector.load %arg9[%c0_58, %c0_59] : memref<128x512xbf16, #tpu.memory_space<vmem>>, vector<128x512xbf16>
    %c0_60 = arith.constant 0 : index
    %c0_61 = arith.constant 0 : index
    %138 = vector.load %arg10[%c0_60, %c0_61] : memref<1x512xf32, #tpu.memory_space<vmem>>, vector<1x512xf32>
    %c0_62 = arith.constant 0 : index
    %c0_63 = arith.constant 0 : index
    %139 = vector.load %arg11[%c0_62, %c0_63] : memref<512x896xbf16, #tpu.memory_space<vmem>>, vector<512x896xbf16>
    %c0_64 = arith.constant 0 : index
    %c0_65 = arith.constant 0 : index
    %140 = vector.load %arg12[%c0_64, %c0_65] : memref<1x896xf32, #tpu.memory_space<vmem>>, vector<1x896xf32>
    %141 = arith.truncf %135 : vector<8x128xf32> to vector<8x128xbf16>
    %cst_66 = arith.constant dense<0.000000e+00> : vector<8x512xf32>
    %142 = tpu.matmul %141, %137, %cst_66 {dimension_numbers = #tpu.dot_dimension_numbers<[1], [0], [0], [1], [0, 0, 1, 1], [], []>} : vector<8x128xbf16>, vector<128x512xbf16>, vector<8x512xf32> -> vector<8x512xf32>
    %143 = vector.broadcast %138 : vector<1x512xf32> to vector<8x512xf32>
    %144 = arith.addf %142, %143 : vector<8x512xf32>
    %cst_67 = arith.constant 0.000000e+00 : f32
    %145 = vector.broadcast %cst_67 : f32 to vector<8x512xf32>
    %146 = arith.maximumf %144, %145 : vector<8x512xf32>
    %147 = arith.truncf %146 : vector<8x512xf32> to vector<8x512xbf16>
    %cst_68 = arith.constant dense<0.000000e+00> : vector<8x896xf32>
    %148 = tpu.matmul %147, %139, %cst_68 {dimension_numbers = #tpu.dot_dimension_numbers<[1], [0], [0], [1], [0, 0, 1, 1], [], []>} : vector<8x512xbf16>, vector<512x896xbf16>, vector<8x896xf32> -> vector<8x896xf32>
    %149 = vector.broadcast %140 : vector<1x896xf32> to vector<8x896xf32>
    %150 = arith.addf %148, %149 : vector<8x896xf32>
    %c0_69 = arith.constant 0 : index
    %c0_70 = arith.constant 0 : index
    %151 = vector.load %arg13[%c0_69, %c0_70] : memref<8x896xf32, #tpu.memory_space<vmem>>, vector<8x896xf32>
    tpu.vector_store %arg13[%c0_69, %c0_70], %150 {strides = array<i32>} : memref<8x896xf32, #tpu.memory_space<vmem>>, vector<8x896xf32>,
    return
  }
  func.func @transform_0(%arg0: i32) -> (i32, i32) {
    %c0_i32 = arith.constant 0 : i32
    %c0_i32_0 = arith.constant 0 : i32
    return %arg0, %c0_i32 : i32, i32
  }
  func.func @transform_1(%arg0: i32) -> (i32, i32) {
    %c0_i32 = arith.constant 0 : i32
    %c0_i32_0 = arith.constant 0 : i32
    return %arg0, %c0_i32 : i32, i32
  }
  func.func @transform_2(%arg0: i32) -> (i32, i32) {
    %c0_i32 = arith.constant 0 : i32
    %c0_i32_0 = arith.constant 0 : i32
    %c0_i32_1 = arith.constant 0 : i32
    return %c0_i32, %c0_i32_0 : i32, i32
  }
  func.func @transform_3(%arg0: i32) -> (i32, i32) {
    %c0_i32 = arith.constant 0 : i32
    %c0_i32_0 = arith.constant 0 : i32
    %c0_i32_1 = arith.constant 0 : i32
    return %c0_i32, %c0_i32_0 : i32, i32
  }
  func.func @transform_4(%arg0: i32) -> (i32, i32) {
    %c0_i32 = arith.constant 0 : i32
    %c0_i32_0 = arith.constant 0 : i32
    %c0_i32_1 = arith.constant 0 : i32
    return %c0_i32, %c0_i32_0 : i32, i32
  }
  func.func @transform_5(%arg0: i32) -> (i32, i32) {
    %c0_i32 = arith.constant 0 : i32
    %c0_i32_0 = arith.constant 0 : i32
    %c0_i32_1 = arith.constant 0 : i32
    return %c0_i32, %c0_i32_0 : i32, i32
  }
  func.func @transform_6(%arg0: i32) -> (i32, i32) {
    %c0_i32 = arith.constant 0 : i32
    %c0_i32_0 = arith.constant 0 : i32
    %c0_i32_1 = arith.constant 0 : i32
    return %c0_i32, %c0_i32_0 : i32, i32
  }
  func.func @transform_7(%arg0: i32) -> (i32, i32) {
    %c0_i32 = arith.constant 0 : i32
    %c0_i32_0 = arith.constant 0 : i32
    %c0_i32_1 = arith.constant 0 : i32
    return %c0_i32, %c0_i32_0 : i32, i32
  }
  func.func @transform_8(%arg0: i32) -> (i32, i32) {
    %c0_i32 = arith.constant 0 : i32
    %c0_i32_0 = arith.constant 0 : i32
    %c0_i32_1 = arith.constant 0 : i32
    return %c0_i32, %c0_i32_0 : i32, i32
  }
  func.func @transform_9(%arg0: i32) -> (i32, i32) {
    %c0_i32 = arith.constant 0 : i32
    %c0_i32_0 = arith.constant 0 : i32
    %c0_i32_1 = arith.constant 0 : i32
    return %c0_i32, %c0_i32_0 : i32, i32
  }
  func.func @transform_10(%arg0: i32) -> (i32, i32) {
    %c0_i32 = arith.constant 0 : i32
    %c0_i32_0 = arith.constant 0 : i32
    %c0_i32_1 = arith.constant 0 : i32
    return %c0_i32, %c0_i32_0 : i32, i32
  }
  func.func @transform_11(%arg0: i32) -> (i32, i32) {
    %c0_i32 = arith.constant 0 : i32
    %c0_i32_0 = arith.constant 0 : i32
    %c0_i32_1 = arith.constant 0 : i32
    return %c0_i32, %c0_i32_0 : i32, i32
  }
  func.func @transform_12(%arg0: i32) -> (i32, i32) {
    %c0_i32 = arith.constant 0 : i32
    %c0_i32_0 = arith.constant 0 : i32
    return %arg0, %c0_i32 : i32, i32
  }
  func.func @transform_13(%arg0: i32) -> (i32, i32) {
    %c0_i32 = arith.constant 0 : i32
    %c0_i32_0 = arith.constant 0 : i32
    return %arg0, %c0_i32 : i32, i32
  }
  func.func @transform_14(%arg0: i32) -> (i32, i32) {
    %c0_i32 = arith.constant 0 : i32
    %c0_i32_0 = arith.constant 0 : i32
    return %arg0, %c0_i32 : i32, i32
  }
}

</mosaic_0001>

<bundles_post_ra>
// kernel: dirvae_forward.1
= control target key start
LH: loop header
LB: loop body
LE: loop exit
PB: predicated region body
PF: predicated region fallthrough
CT: control target
= control target key end

     0   :  { %20 = vsyncpa [#allocation3], 0  ;;  %s7557_s0 = inlined_call_operand.vmem [shape: bf16[8,896], index: 0, kind: input, shape index: {}]   ;;  %s7558_s1 = inlined_call_operand.vmem [shape: f32[8,128], index: 1, kind: input, shape index: {}]   ;;  %s7559_s2 = inlined_call_operand.hbm [shape: bf16[896,512], index: 2, kind: input, shape index: {}]   ;;  %s7560_s3 = inlined_call_operand.vmem [shape: f32[1,512], index: 3, kind: input, shape index: {}]   ;;  %s7561_s4 = inlined_call_operand.hbm [shape: bf16[512,512], index: 4, kind: input, shape index: {}]   ;;  %s7562_s5 = inlined_call_operand.vmem [shape: f32[1,512], index: 5, kind: input, shape index: {}]   ;;  %s7563_s6 = inlined_call_operand.hbm [shape: bf16[512,128], index: 6, kind: input, shape index: {}]   ;;  %s7564_s7 = inlined_call_operand.vmem [shape: f32[1,128], index: 7, kind: input, shape index: {}]   ;;  %s7565_s8 = inlined_call_operand.hbm [shape: bf16[128,512], index: 8, kind: input, shape index: {}]   ;;  %s7566_s9 = inlined_call_operand.vmem [shape: f32[1,512], index: 9, kind: input, shape index: {}]   ;;  %s7567_s10 = inlined_call_operand.hbm [shape: bf16[512,896], index: 10, kind: input, shape index: {}]   ;;  %s7568_s11 = inlined_call_operand.vmem [shape: f32[1,896], index: 11, kind: input, shape index: {}]   ;;  %s7569_s12 = inlined_call_operand.vmem [shape: f32[8,896], index: 12, kind: output, shape index: {0}]   ;;  %s7570_s13 = inlined_call_operand.vmem [shape: f32[8,128], index: 13, kind: output, shape index: {1}]   ;;  %s7571_s14 = inlined_call_operand.vmem [shape: f32[8,128], index: 14, kind: output, shape index: {2}]  }
   0x1   :  { %21 = vsyncpa [#allocation5], 0 }
   0x2   :  { %22 = vsyncpa [#allocation8], 0  ;;  %s7214_s29 = smov [#allocation4]   ;;  %s7215_s15 = smov [#allocation7]  }
   0x3   :  { %s46_s30 = sshll.u32 %s7214_s29, 4  ;;  %s74_s16 = sshll.u32 %s7215_s15, 4  ;;  %s47_s30 = int_to_ptr.vmem [resolvable:$true] %s46_s30  ;;  %s7301_s16 = int_to_ptr.vmem [resolvable:$true] %s74_s16 }
   0x4   :  { %s7098_s19 = scalar_lea.hbm %s7561_s4, 16384 }
   0x5   :  { %p7099_p0 = scmp.ne.s32.totalorder %s7561_s4, %s7098_s19  ;;  %p7102_p1 = scmp.lt.u32.totalorder %s7098_s19, %s7561_s4 }
   0x7   :  { %p7104_p2 = pnand %p7102_p1, %p7099_p0 }
   0x9   :  { %7107 = shalt.err (!%p7104_p2)
}
   0xa   :  { %s7108_s24 = scalar_lea.vmem %s47_s30, 16384  ;;  %p7113_p4 = scmp.lt.s32.totalorder %s47_s30, %s47_s30 }
   0xb   :  { %p7109_p3 = scmp.ne.s32.totalorder %s47_s30, %s7108_s24  ;;  %p7114_p5 = scmp.lt.s32.totalorder %s7108_s24, %s7108_s24 }
   0xd   :  { %p7115_p6 = por %p7114_p5, %p7113_p4 }
   0xf   :  { %p7116_p7 = pnand %p7115_p6, %p7109_p3 }
  0x11   :  { %7119 = shalt.err (!%p7116_p7)
}
  0x12   :  { %s7216_s25 = smov 256   ;;  %s7217_s26 = smov 16  }
  0x13   :  { %52 = dma.hbm_to_vmem [thread:$0]  %s7561_s4, 16384, %s47_s30, [#allocation5], %s7216_s25, %s7216_s25, %s7217_s26  }
  0x14   :  { %s7120_s17 = scalar_lea.hbm %s7565_s8, 4096 }
  0x15   :  { %p7121_p8 = scmp.ne.s32.totalorder %s7565_s8, %s7120_s17  ;;  %p7124_p9 = scmp.lt.u32.totalorder %s7120_s17, %s7565_s8 }
  0x17   :  { %p7126_p10 = pnand %p7124_p9, %p7121_p8 }
  0x19   :  { %7129 = shalt.err (!%p7126_p10)
}
  0x1a   :  { %s7130_s22 = scalar_lea.vmem %s7301_s16, 4096  ;;  %p7135_p12 = scmp.lt.s32.totalorder %s7301_s16, %s7301_s16 }
  0x1b   :  { %p7131_p11 = scmp.ne.s32.totalorder %s7301_s16, %s7130_s22  ;;  %p7136_p13 = scmp.lt.s32.totalorder %s7130_s22, %s7130_s22 }
  0x1d   :  { %p7137_p0 = por %p7136_p13, %p7135_p12 }
  0x1f   :  { %p7138_p1 = pnand %p7137_p0, %p7131_p11 }
  0x21   :  { %7141 = shalt.err (!%p7138_p1)
}
  0x22   :  { %80 = dma.hbm_to_vmem [thread:$0]  %s7565_s8, 4096, %s7301_s16, [#allocation8], %s7216_s25, %s7216_s25, %s7217_s26  }
  0x23   :  { %s7218_s23 = smov [#allocation2]   ;;  %s7219_s27 = smov [#allocation6]  }
  0x24   :  { %s32_s24 = sshll.u32 %s7218_s23, 4  ;;  %s60_s28 = sshll.u32 %s7219_s27, 4  ;;  %s33_s24 = int_to_ptr.vmem [resolvable:$true] %s32_s24  ;;  %s7338_s28 = int_to_ptr.vmem [resolvable:$true] %s60_s28 }
  0x25   :  { %s7142_s17 = scalar_lea.hbm %s7559_s2, 28672 }
  0x26   :  { %p7143_p2 = scmp.ne.s32.totalorder %s7559_s2, %s7142_s17  ;;  %p7146_p3 = scmp.lt.u32.totalorder %s7142_s17, %s7559_s2 }
  0x28   :  { %p7148_p4 = pnand %p7146_p3, %p7143_p2 }
  0x2a   :  { %7151 = shalt.err (!%p7148_p4)
}
  0x2b   :  { %s7152_s8 = scalar_lea.vmem %s33_s24, 28672  ;;  %p7157_p6 = scmp.lt.s32.totalorder %s33_s24, %s33_s24 }
  0x2c   :  { %p7153_p5 = scmp.ne.s32.totalorder %s33_s24, %s7152_s8  ;;  %p7158_p7 = scmp.lt.s32.totalorder %s7152_s8, %s7152_s8 }
  0x2e   :  { %p7159_p8 = por %p7158_p7, %p7157_p6 }
  0x30   :  { %p7160_p9 = pnand %p7159_p8, %p7153_p5 }
  0x32   :  { %7163 = shalt.err (!%p7160_p9)
}
  0x33   :  { %38 = dma.hbm_to_vmem [thread:$0]  %s7559_s2, 28672, %s33_s24, [#allocation3], %s7216_s25, %s7216_s25, %s7217_s26  }
  0x34   :  { %s7164_s23 = scalar_lea.hbm %s7563_s6, 4096 }
  0x35   :  { %p7165_p10 = scmp.ne.s32.totalorder %s7563_s6, %s7164_s23  ;;  %p7168_p11 = scmp.lt.u32.totalorder %s7164_s23, %s7563_s6 }
  0x37   :  { %p7170_p12 = pnand %p7168_p11, %p7165_p10 }
  0x39   :  { %7173 = shalt.err (!%p7170_p12)
}
  0x3a   :  { %s7174_s18 = scalar_lea.vmem %s7338_s28, 4096  ;;  %p7179_p0 = scmp.lt.s32.totalorder %s7338_s28, %s7338_s28 }
  0x3b   :  { %p7175_p13 = scmp.ne.s32.totalorder %s7338_s28, %s7174_s18  ;;  %p7180_p1 = scmp.lt.s32.totalorder %s7174_s18, %s7174_s18 }
  0x3d   :  { %p7181_p2 = por %p7180_p1, %p7179_p0 }
  0x3f   :  { %p7182_p3 = pnand %p7181_p2, %p7175_p13 }
  0x41   :  { %7185 = shalt.err (!%p7182_p3)
}
  0x42   :  { %s7220_s2 = smov 64   ;;  %s7221_s25 = smov 4  }
  0x43   :  { %66 = dma.hbm_to_vmem [thread:$0]  %s7563_s6, 4096, %s7338_s28, [#allocation5], %s7220_s2, %s7220_s2, %s7221_s25  }
  0x44   :  { %s7222_s19 = smov [#allocation9]   ;;  %s7186_s16 = scalar_lea.hbm %s7567_s10, 28672 }
  0x45   :  { %s88_s20 = sshll.u32 %s7222_s19, 4  ;;  %p7187_p4 = scmp.ne.s32.totalorder %s7567_s10, %s7186_s16  ;;  %s89_s20 = int_to_ptr.vmem [resolvable:$true] %s88_s20 }
  0x46   :  { %p7190_p5 = scmp.lt.u32.totalorder %s7186_s16, %s7567_s10 }
  0x48   :  { %p7192_p6 = pnand %p7190_p5, %p7187_p4 }
  0x4a   :  { %7195 = shalt.err (!%p7192_p6)
}
  0x4b   :  { %s7196_s27 = scalar_lea.vmem %s89_s20, 28672  ;;  %p7201_p8 = scmp.lt.s32.totalorder %s89_s20, %s89_s20 }
  0x4c   :  { %p7197_p7 = scmp.ne.s32.totalorder %s89_s20, %s7196_s27  ;;  %p7202_p9 = scmp.lt.s32.totalorder %s7196_s27, %s7196_s27 }
  0x4e   :  { %p7203_p10 = por %p7202_p9, %p7201_p8 }
  0x50   :  { %p7204_p11 = pnand %p7203_p10, %p7197_p7 }
  0x52   :  { %7207 = shalt.err (!%p7204_p11)
}
  0x53   :  { %s7223_s6 = smov 448   ;;  %s7224_s28 = smov 28  }
  0x54   :  { %94 = dma.hbm_to_vmem [thread:$0]  %s7567_s10, 28672, %s89_s20, [#allocation8], %s7223_s6, %s7223_s6, %s7224_s28  }
  0x55   :  { %7208 = dma.done.wait [#allocation3], 28672  }
  0x56   :  { %7209 = vsyncadd [#allocation3], 4294938624 }
  0x57   :  { %7210 = dma.done.wait [#allocation5], 20480  }
  0x58   :  { %7211 = vsyncadd [#allocation5], 4294946816 }
  0x59   :  { %7212 = dma.done.wait [#allocation8], 32768  }
  0x5a   :  { %7213 = vsyncadd [#allocation8], 4294934528  ;;  %v7225_v0 = vmov 0   ;;  %v6142_v1 = vld [vmem:[#allocation2 + $0x4] ss:$16 sps:$4 sm:$0xff]  }
  0x5b   :  { %1857 = vmatprep.mubr.bf16.mxu1 %v7225_v0  ;;  %v6144_v2 = vld [vmem:[#allocation2 + $0x604] ss:$16 sps:$4 sm:$0xff]   ;;  %1702 = vmatprep.subr.bf16.mxu0 %v6142_v1  ;;  %v6146_v3 = vld [vmem:[#allocation2] ss:$16 sps:$4 sm:$0xff]   ;;  %v6195_v34 = vld [vmem:[#allocation2 + $0xc] ss:$16 sps:$4 sm:$0xff]  }
  0x5c   :  { %v6147_v4 = vld [vmem:[#allocation2 + $0x600] ss:$16 sps:$4 sm:$0xff]   ;;  %1825 = vmatprep.subr.bf16.mxu1 %v6144_v2  ;;  %v6148_v5 = vld [vmem:[#allocation2 + $0x24] ss:$16 sps:$4 sm:$0xff]   ;;  %1703 = vmatpush1.bf16.msra.mxu0 %v6146_v3  ;;  %v6192_v35 = vld [vmem:[%s7557_s0 + $0x18] ss:$0 sps:$4 sm:$0xff]  }
  0x5d   :  { %1826 = vmatpush1.bf16.msra.mxu1 %v6147_v4  ;;  %v6150_v6 = vld [vmem:[#allocation2 + $0x624] ss:$16 sps:$4 sm:$0xff]   ;;  %v6152_v7 = vld [vmem:[#allocation2 + $0x20] ss:$16 sps:$4 sm:$0xff]   ;;  %1704 = vmatprep.subr.bf16.mxu0 %v6148_v5  ;;  %v6193_v36 = vld [vmem:[#allocation2 + $0x8] ss:$16 sps:$4 sm:$0xff]  }
  0x5e   :  { %v6153_v8 = vld [vmem:[#allocation2 + $0x620] ss:$16 sps:$4 sm:$0xff]   ;;  %1827 = vmatprep.subr.bf16.mxu1 %v6150_v6  ;;  %v6154_v9 = vld [vmem:[#allocation2 + $0x44] ss:$16 sps:$4 sm:$0xff]   ;;  %v6201_v39 = vld [vmem:[#allocation2 + $0x2c] ss:$16 sps:$4 sm:$0xff]  }
  0x5f   :  { %v6156_v10 = vld [vmem:[#allocation2 + $0x644] ss:$16 sps:$4 sm:$0xff]   ;;  %v6158_v11 = vld [vmem:[#allocation2 + $0x40] ss:$16 sps:$4 sm:$0xff]   ;;  %v6199_v40 = vld [vmem:[#allocation2 + $0x28] ss:$16 sps:$4 sm:$0xff]  }
  0x60   :  { %v6159_v12 = vld [vmem:[#allocation2 + $0x640] ss:$16 sps:$4 sm:$0xff]   ;;  %1705 = vmatpush1.bf16.msra.mxu0 %v6152_v7  ;;  %v6160_v13 = vld [vmem:[#allocation2 + $0x64] ss:$16 sps:$4 sm:$0xff]   ;;  %v6207_v43 = vld [vmem:[#allocation2 + $0x4c] ss:$16 sps:$4 sm:$0xff]  }
  0x61   :  { %1828 = vmatpush1.bf16.msra.mxu1 %v6153_v8  ;;  %1706 = vmatprep.subr.bf16.mxu0 %v6154_v9  ;;  %v6162_v14 = vld [vmem:[#allocation2 + $0x664] ss:$16 sps:$4 sm:$0xff]   ;;  %v6164_v15 = vld [vmem:[#allocation2 + $0x60] ss:$16 sps:$4 sm:$0xff]   ;;  %v6205_v44 = vld [vmem:[#allocation2 + $0x48] ss:$16 sps:$4 sm:$0xff]  }
  0x62   :  { %1829 = vmatprep.subr.bf16.mxu1 %v6156_v10  ;;  %v6165_v16 = vld [vmem:[#allocation2 + $0x660] ss:$16 sps:$4 sm:$0xff]   ;;  %v6166_v17 = vld [vmem:[#allocation2 + $0x84] ss:$16 sps:$4 sm:$0xff]   ;;  %v6213_v47 = vld [vmem:[#allocation2 + $0x6c] ss:$16 sps:$4 sm:$0xff]  }
  0x63   :  { %v6168_v18 = vld [vmem:[#allocation2 + $0x684] ss:$16 sps:$4 sm:$0xff]   ;;  %v6170_v19 = vld [vmem:[#allocation2 + $0x80] ss:$16 sps:$4 sm:$0xff]   ;;  %v6211_v48 = vld [vmem:[#allocation2 + $0x68] ss:$16 sps:$4 sm:$0xff]  }
  0x64   :  { %1707 = vmatpush1.bf16.msra.mxu0 %v6158_v11  ;;  %v6171_v20 = vld [vmem:[#allocation2 + $0x680] ss:$16 sps:$4 sm:$0xff]   ;;  %v6172_v21 = vld [vmem:[#allocation2 + $0xa4] ss:$16 sps:$4 sm:$0xff]   ;;  %v6219_v53 = vld [vmem:[#allocation2 + $0x8c] ss:$16 sps:$4 sm:$0xff]  }
  0x65   :  { %1830 = vmatpush1.bf16.msra.mxu1 %v6159_v12  ;;  %1708 = vmatprep.subr.bf16.mxu0 %v6160_v13  ;;  %v6174_v22 = vld [vmem:[#allocation2 + $0x6a4] ss:$16 sps:$4 sm:$0xff]   ;;  %v6176_v23 = vld [vmem:[#allocation2 + $0xa0] ss:$16 sps:$4 sm:$0xff]   ;;  %v6217_v54 = vld [vmem:[#allocation2 + $0x88] ss:$16 sps:$4 sm:$0xff]  }
  0x66   :  { %1831 = vmatprep.subr.bf16.mxu1 %v6162_v14  ;;  %v6177_v24 = vld [vmem:[#allocation2 + $0x6a0] ss:$16 sps:$4 sm:$0xff]   ;;  %v6178_v25 = vld [vmem:[#allocation2 + $0xc4] ss:$16 sps:$4 sm:$0xff]   ;;  %v6225_v57 = vld [vmem:[#allocation2 + $0xac] ss:$16 sps:$4 sm:$0xff]  }
  0x67   :  { %v6180_v26 = vld [vmem:[#allocation2 + $0x6c4] ss:$16 sps:$4 sm:$0xff]   ;;  %v6182_v27 = vld [vmem:[#allocation2 + $0xc0] ss:$16 sps:$4 sm:$0xff]   ;;  %v6223_v58 = vld [vmem:[#allocation2 + $0xa8] ss:$16 sps:$4 sm:$0xff]  }
  0x68   :  { %1709 = vmatpush1.bf16.msra.mxu0 %v6164_v15  ;;  %v6183_v28 = vld [vmem:[#allocation2 + $0x6c0] ss:$16 sps:$4 sm:$0xff]   ;;  %v6184_v29 = vld [vmem:[#allocation2 + $0xe4] ss:$16 sps:$4 sm:$0xff]   ;;  %v6231_v61 = vld [vmem:[#allocation2 + $0xcc] ss:$16 sps:$4 sm:$0xff]  }
  0x69   :  { %1832 = vmatpush1.bf16.msra.mxu1 %v6165_v16  ;;  %1710 = vmatprep.subr.bf16.mxu0 %v6166_v17  ;;  %v6186_v30 = vld [vmem:[#allocation2 + $0x6e4] ss:$16 sps:$4 sm:$0xff]   ;;  %v6188_v31 = vld [vmem:[#allocation2 + $0xe0] ss:$16 sps:$4 sm:$0xff]   ;;  %v6229_v62 = vld [vmem:[#allocation2 + $0xc8] ss:$16 sps:$4 sm:$0xff]  }
  0x6a   :  { %1833 = vmatprep.subr.bf16.mxu1 %v6168_v18  ;;  %v6189_v32 = vld [vmem:[#allocation2 + $0x6e0] ss:$16 sps:$4 sm:$0xff]   ;;  %v6190_v33 = vld [vmem:[#allocation2 + $0x104] ss:$16 sps:$4 sm:$0xff]   ;;  %v6237_v2 = vld [vmem:[#allocation2 + $0xec] ss:$16 sps:$4 sm:$0xff]  }
  0x6b   :  { %v6196_v37 = vld [vmem:[#allocation2 + $0x100] ss:$16 sps:$4 sm:$0xff]   ;;  %v6197_v38 = vld [vmem:[#allocation2 + $0x124] ss:$16 sps:$4 sm:$0xff]   ;;  %v6235_v3 = vld [vmem:[#allocation2 + $0xe8] ss:$16 sps:$4 sm:$0xff]  }
  0x6c   :  { %1711 = vmatpush1.bf16.msra.mxu0 %v6170_v19  ;;  %v6202_v41 = vld [vmem:[#allocation2 + $0x120] ss:$16 sps:$4 sm:$0xff]   ;;  %v6203_v42 = vld [vmem:[#allocation2 + $0x144] ss:$16 sps:$4 sm:$0xff]   ;;  %v6246_v6 = vld [vmem:[#allocation2 + $0x10c] ss:$16 sps:$4 sm:$0xff]  }
  0x6d   :  { %1834 = vmatpush1.bf16.msra.mxu1 %v6171_v20  ;;  %1712 = vmatprep.subr.bf16.mxu0 %v6172_v21  ;;  %v6208_v45 = vld [vmem:[#allocation2 + $0x140] ss:$16 sps:$4 sm:$0xff]   ;;  %v6209_v46 = vld [vmem:[#allocation2 + $0x164] ss:$16 sps:$4 sm:$0xff]   ;;  %v6244_v9 = vld [vmem:[#allocation2 + $0x108] ss:$16 sps:$4 sm:$0xff]  }
  0x6e   :  { %1835 = vmatprep.subr.bf16.mxu1 %v6174_v22  ;;  %v113_v49 = vld [vmem:[%s7557_s0] sm:$0xff]  ;;  %v6252_v11 = vld [vmem:[#allocation2 + $0x12c] ss:$16 sps:$4 sm:$0xff]   ;;  %v6250_v13 = vld [vmem:[#allocation2 + $0x128] ss:$16 sps:$4 sm:$0xff]  }
  0x6f   :  { %v6214_v50 = vld [vmem:[#allocation2 + $0x160] ss:$16 sps:$4 sm:$0xff]   ;;  %v6215_v51 = vld [vmem:[#allocation2 + $0x184] ss:$16 sps:$4 sm:$0xff]   ;;  %v5337_v52 = vcombine.high %v113_v49, %v113_v49  ;;  %v7391_v7 = vcombine.low %v113_v49, %v113_v49  ;;  %v6258_v15 = vld [vmem:[#allocation2 + $0x14c] ss:$16 sps:$4 sm:$0xff]  }
  0x70   :  { %1713 = vmatpush1.bf16.msra.mxu0 %v6176_v23  ;;  %v6220_v55 = vld [vmem:[#allocation2 + $0x180] ss:$16 sps:$4 sm:$0xff]   ;;  %v6221_v56 = vld [vmem:[#allocation2 + $0x1a4] ss:$16 sps:$4 sm:$0xff]   ;;  %v6256_v17 = vld [vmem:[#allocation2 + $0x148] ss:$16 sps:$4 sm:$0xff]  }
  0x71   :  { %1836 = vmatpush1.bf16.msra.mxu1 %v6177_v24  ;;  %1714 = vmatprep.subr.bf16.mxu0 %v6178_v25  ;;  %v6226_v59 = vld [vmem:[#allocation2 + $0x1a0] ss:$16 sps:$4 sm:$0xff]   ;;  %v6227_v60 = vld [vmem:[#allocation2 + $0x1c4] ss:$16 sps:$4 sm:$0xff]   ;;  %v6264_v19 = vld [vmem:[#allocation2 + $0x16c] ss:$16 sps:$4 sm:$0xff]  }
  0x72   :  { %1837 = vmatprep.subr.bf16.mxu1 %v6180_v26  ;;  %1734 = vmatprep.mubr.bf16.mxu0 %v5337_v52  ;;  %v6232_v63 = vld [vmem:[#allocation2 + $0x1c0] ss:$16 sps:$4 sm:$0xff]   ;;  %v6233_v1 = vld [vmem:[#allocation2 + $0x1e4] ss:$16 sps:$4 sm:$0xff]   ;;  %v6262_v21 = vld [vmem:[#allocation2 + $0x168] ss:$16 sps:$4 sm:$0xff]  }
  0x73   :  { %v6238_v4 = vld [vmem:[#allocation2 + $0x1e0] ss:$16 sps:$4 sm:$0xff]   ;;  %v6243_v5 = vld [vmem:[#allocation2 + $0x204] ss:$16 sps:$4 sm:$0xff]   ;;  %v6270_v23 = vld [vmem:[#allocation2 + $0x18c] ss:$16 sps:$4 sm:$0xff]  }
  0x74   :  { %1715 = vmatpush1.bf16.msra.mxu0 %v6182_v27  ;;  %v6241_v8 = vld [vmem:[#allocation2 + $0x200] ss:$16 sps:$4 sm:$0xff]   ;;  %v6249_v10 = vld [vmem:[#allocation2 + $0x224] ss:$16 sps:$4 sm:$0xff]   ;;  %v6268_v25 = vld [vmem:[#allocation2 + $0x188] ss:$16 sps:$4 sm:$0xff]  }
  0x75   :  { %1838 = vmatpush1.bf16.msra.mxu1 %v6183_v28  ;;  %1716 = vmatprep.subr.bf16.mxu0 %v6184_v29  ;;  %v6247_v12 = vld [vmem:[#allocation2 + $0x220] ss:$16 sps:$4 sm:$0xff]   ;;  %v6255_v14 = vld [vmem:[#allocation2 + $0x244] ss:$16 sps:$4 sm:$0xff]   ;;  %v6276_v27 = vld [vmem:[#allocation2 + $0x1ac] ss:$16 sps:$4 sm:$0xff]  }
  0x76   :  { %1839 = vmatprep.subr.bf16.mxu1 %v6186_v30  ;;  %v6253_v16 = vld [vmem:[#allocation2 + $0x240] ss:$16 sps:$4 sm:$0xff]   ;;  %v6261_v18 = vld [vmem:[#allocation2 + $0x264] ss:$16 sps:$4 sm:$0xff]   ;;  %v6274_v29 = vld [vmem:[#allocation2 + $0x1a8] ss:$16 sps:$4 sm:$0xff]  }
  0x77   :  { %v6259_v20 = vld [vmem:[#allocation2 + $0x260] ss:$16 sps:$4 sm:$0xff]   ;;  %v6267_v22 = vld [vmem:[#allocation2 + $0x284] ss:$16 sps:$4 sm:$0xff]   ;;  %v6306_v49 = vld [vmem:[#allocation2 + $0x24c] ss:$16 sps:$4 sm:$0xff]  }
  0x78   :  { %1717 = vmatpush1.bf16.msra.mxu0 %v6188_v31  ;;  %v6265_v24 = vld [vmem:[#allocation2 + $0x280] ss:$16 sps:$4 sm:$0xff]   ;;  %v6273_v26 = vld [vmem:[#allocation2 + $0x2a4] ss:$16 sps:$4 sm:$0xff]   ;;  %v6282_v31 = vld [vmem:[#allocation2 + $0x1cc] ss:$16 sps:$4 sm:$0xff]  }
  0x79   :  { %1840 = vmatpush1.bf16.msra.mxu1 %v6189_v32  ;;  %1718 = vmatprep.subr.bf16.mxu0 %v6190_v33  ;;  %v6271_v28 = vld [vmem:[#allocation2 + $0x2a0] ss:$16 sps:$4 sm:$0xff]   ;;  %v6279_v30 = vld [vmem:[#allocation2 + $0x2c4] ss:$16 sps:$4 sm:$0xff]   ;;  %v7397_v32 = vld [vmem:[%s7557_s0 + $0x8] sm:$0xff] }
  0x7a   :  { %1866 = vmatprep.subr.bf16.mxu1 %v6195_v34  ;;  %v6277_v33 = vld [vmem:[#allocation2 + $0x2c0] ss:$16 sps:$4 sm:$0xff]   ;;  %v6280_v34 = vld [vmem:[#allocation2 + $0x1c8] ss:$16 sps:$4 sm:$0xff]  }
  0x7c   :  { %1858 = vmatmul.mubr.bf16.vlgmr.msra.gmra.mrb[0].mxu1 %v6192_v35  ;;  %1719 = vmatpush1.bf16.msra.mxu0 %v6196_v37  ;;  %v5339_v35 = vcombine.high %v7397_v32, %v7397_v32  ;;  %v6288_v37 = vld [vmem:[#allocation2 + $0x1ec] ss:$16 sps:$4 sm:$0xff]  }
  0x7d   :  { %1867 = vmatpush1.bf16.msra.mxu1 %v6193_v36  ;;  %1720 = vmatprep.subr.bf16.mxu0 %v6197_v38  ;;  %v6285_v36 = vld [vmem:[#allocation2 + $0x2e4] ss:$16 sps:$4 sm:$0xff]   ;;  %v6283_v38 = vld [vmem:[#allocation2 + $0x2e0] ss:$16 sps:$4 sm:$0xff]  }
  0x7e   :  { %1868 = vmatprep.subr.bf16.mxu1 %v6201_v39  ;;  %1898 = vmatprep.mubr.bf16.mxu1 %v5337_v52  ;;  %v6286_v39 = vld [vmem:[#allocation2 + $0x1e8] ss:$16 sps:$4 sm:$0xff]   ;;  %v6309_v52 = vld [vmem:[#allocation2 + $0x364] ss:$16 sps:$4 sm:$0xff]  }
  0x80   :  { %1721 = vmatpush1.bf16.msra.mxu0 %v6202_v41  ;;  %v6294_v41 = vld [vmem:[#allocation2 + $0x20c] ss:$16 sps:$4 sm:$0xff]  }
  0x81   :  { %1869 = vmatpush1.bf16.msra.mxu1 %v6199_v40  ;;  %1722 = vmatprep.subr.bf16.mxu0 %v6203_v42  ;;  %v6291_v40 = vld [vmem:[#allocation2 + $0x304] ss:$16 sps:$4 sm:$0xff]   ;;  %v6289_v42 = vld [vmem:[#allocation2 + $0x300] ss:$16 sps:$4 sm:$0xff]  }
  0x82   :  { %1870 = vmatprep.subr.bf16.mxu1 %v6207_v43  ;;  %v6292_v43 = vld [vmem:[#allocation2 + $0x208] ss:$16 sps:$4 sm:$0xff]  }
  0x84   :  { %1723 = vmatpush1.bf16.msra.mxu0 %v6208_v45  ;;  %v6300_v45 = vld [vmem:[#allocation2 + $0x22c] ss:$16 sps:$4 sm:$0xff]  }
  0x85   :  { %1871 = vmatpush1.bf16.msra.mxu1 %v6205_v44  ;;  %1724 = vmatprep.subr.bf16.mxu0 %v6209_v46  ;;  %v6297_v44 = vld [vmem:[#allocation2 + $0x324] ss:$16 sps:$4 sm:$0xff]   ;;  %v6295_v46 = vld [vmem:[#allocation2 + $0x320] ss:$16 sps:$4 sm:$0xff]  }
  0x86   :  { %1872 = vmatprep.subr.bf16.mxu1 %v6213_v47  ;;  %v6298_v47 = vld [vmem:[#allocation2 + $0x228] ss:$16 sps:$4 sm:$0xff]  }
  0x88   :  { %1725 = vmatpush1.bf16.msra.mxu0 %v6214_v50  ;;  %v6301_v50 = vld [vmem:[#allocation2 + $0x340] ss:$16 sps:$4 sm:$0xff]  }
  0x89   :  { %1873 = vmatpush1.bf16.msra.mxu1 %v6211_v48  ;;  %1726 = vmatprep.subr.bf16.mxu0 %v6215_v51  ;;  %v6303_v48 = vld [vmem:[#allocation2 + $0x344] ss:$16 sps:$4 sm:$0xff]   ;;  %v6304_v51 = vld [vmem:[#allocation2 + $0x248] ss:$16 sps:$4 sm:$0xff]  }
  0x8a   :  { %1874 = vmatprep.subr.bf16.mxu1 %v6219_v53  ;;  %v6312_v53 = vld [vmem:[#allocation2 + $0x26c] ss:$16 sps:$4 sm:$0xff]  }
  0x8c   :  { %1727 = vmatpush1.bf16.msra.mxu0 %v6220_v55  ;;  %v6310_v55 = vld [vmem:[#allocation2 + $0x268] ss:$16 sps:$4 sm:$0xff]  }
  0x8d   :  { %1875 = vmatpush1.bf16.msra.mxu1 %v6217_v54  ;;  %1728 = vmatprep.subr.bf16.mxu0 %v6221_v56  ;;  %v6307_v54 = vld [vmem:[#allocation2 + $0x360] ss:$16 sps:$4 sm:$0xff]   ;;  %v6315_v56 = vld [vmem:[#allocation2 + $0x384] ss:$16 sps:$4 sm:$0xff]  }
  0x8e   :  { %1876 = vmatprep.subr.bf16.mxu1 %v6225_v57  ;;  %v6318_v57 = vld [vmem:[#allocation2 + $0x28c] ss:$16 sps:$4 sm:$0xff]  }
  0x90   :  { %1729 = vmatpush1.bf16.msra.mxu0 %v6226_v59  ;;  %v6316_v59 = vld [vmem:[#allocation2 + $0x288] ss:$16 sps:$4 sm:$0xff]  }
  0x91   :  { %1877 = vmatpush1.bf16.msra.mxu1 %v6223_v58  ;;  %1730 = vmatprep.subr.bf16.mxu0 %v6227_v60  ;;  %v6313_v58 = vld [vmem:[#allocation2 + $0x380] ss:$16 sps:$4 sm:$0xff]   ;;  %v6321_v60 = vld [vmem:[#allocation2 + $0x3a4] ss:$16 sps:$4 sm:$0xff]  }
  0x92   :  { %1878 = vmatprep.subr.bf16.mxu1 %v6231_v61  ;;  %v6324_v61 = vld [vmem:[#allocation2 + $0x2ac] ss:$16 sps:$4 sm:$0xff]  }
  0x94   :  { %1731 = vmatpush1.bf16.msra.mxu0 %v6232_v63  ;;  %v6322_v63 = vld [vmem:[#allocation2 + $0x2a8] ss:$16 sps:$4 sm:$0xff]  }
  0x95   :  { %1879 = vmatpush1.bf16.msra.mxu1 %v6229_v62  ;;  %1732 = vmatprep.subr.bf16.mxu0 %v6233_v1  ;;  %v6319_v62 = vld [vmem:[#allocation2 + $0x3a0] ss:$16 sps:$4 sm:$0xff]   ;;  %v6327_v1 = vld [vmem:[#allocation2 + $0x3c4] ss:$16 sps:$4 sm:$0xff]  }
  0x96   :  { %1880 = vmatprep.subr.bf16.mxu1 %v6237_v2  ;;  %v6330_v2 = vld [vmem:[#allocation2 + $0x2cc] ss:$16 sps:$4 sm:$0xff]  }
  0x98   :  { %1733 = vmatpush1.bf16.msra.mxu0 %v6238_v4  ;;  %v6328_v4 = vld [vmem:[#allocation2 + $0x2c8] ss:$16 sps:$4 sm:$0xff]  }
  0x99   :  { %1881 = vmatpush1.bf16.msra.mxu1 %v6235_v3  ;;  %1743 = vmatprep.subr.bf16.mxu0 %v6243_v5  ;;  %v6325_v3 = vld [vmem:[#allocation2 + $0x3c0] ss:$16 sps:$4 sm:$0xff]   ;;  %v6333_v5 = vld [vmem:[#allocation2 + $0x3e4] ss:$16 sps:$4 sm:$0xff]  }
  0x9a   :  { %1882 = vmatprep.subr.bf16.mxu1 %v6246_v6  ;;  %v6336_v6 = vld [vmem:[#allocation2 + $0x2ec] ss:$16 sps:$4 sm:$0xff]  }
  0x9b   :  { %1735 = vmatmul.mubr.bf16.vlgmr.msra.gmra.mrb[0].mxu0 %v7391_v7 }
  0x9c   :  { %1744 = vmatpush1.bf16.msra.mxu0 %v6241_v8  ;;  %1775 = vmatprep.mubr.bf16.mxu0 %v5339_v35  ;;  %v6334_v8 = vld [vmem:[#allocation2 + $0x2e8] ss:$16 sps:$4 sm:$0xff]  }
  0x9d   :  { %1883 = vmatpush1.bf16.msra.mxu1 %v6244_v9  ;;  %1745 = vmatprep.subr.bf16.mxu0 %v6249_v10  ;;  %v6341_v9 = vld [vmem:[#allocation2 + $0x404] ss:$16 sps:$4 sm:$0xff]   ;;  %v6344_v10 = vld [vmem:[#allocation2 + $0x30c] ss:$16 sps:$4 sm:$0xff]  }
  0x9e   :  { %1884 = vmatprep.subr.bf16.mxu1 %v6252_v11  ;;  %v7404_v11 = vcombine.low %v7397_v32, %v7397_v32  ;;  %v6371_v32 = vld [vmem:[#allocation2 + $0x4a4] ss:$16 sps:$4 sm:$0xff]  }
  0xa0   :  { %1746 = vmatpush1.bf16.msra.mxu0 %v6247_v12  ;;  %v6339_v12 = vld [vmem:[#allocation2 + $0x400] ss:$16 sps:$4 sm:$0xff]  }
  0xa1   :  { %1885 = vmatpush1.bf16.msra.mxu1 %v6250_v13  ;;  %1747 = vmatprep.subr.bf16.mxu0 %v6255_v14  ;;  %v6342_v13 = vld [vmem:[#allocation2 + $0x308] ss:$16 sps:$4 sm:$0xff]   ;;  %v6347_v14 = vld [vmem:[#allocation2 + $0x424] ss:$16 sps:$4 sm:$0xff]  }
  0xa2   :  { %1886 = vmatprep.subr.bf16.mxu1 %v6258_v15  ;;  %v6350_v15 = vld [vmem:[#allocation2 + $0x32c] ss:$16 sps:$4 sm:$0xff]  }
  0xa4   :  { %1748 = vmatpush1.bf16.msra.mxu0 %v6253_v16  ;;  %v7409_v16 = vld [vmem:[%s7557_s0 + $0x10] sm:$0xff] }
  0xa5   :  { %1887 = vmatpush1.bf16.msra.mxu1 %v6256_v17  ;;  %1749 = vmatprep.subr.bf16.mxu0 %v6261_v18  ;;  %v7413_v17 = vcombine.high %v7409_v16, %v7409_v16  ;;  %v6345_v18 = vld [vmem:[#allocation2 + $0x420] ss:$16 sps:$4 sm:$0xff]  }
  0xa6   :  { %1888 = vmatprep.subr.bf16.mxu1 %v6264_v19  ;;  %v6348_v19 = vld [vmem:[#allocation2 + $0x328] ss:$16 sps:$4 sm:$0xff]  }
  0xa8   :  { %1750 = vmatpush1.bf16.msra.mxu0 %v6259_v20  ;;  %v6353_v20 = vld [vmem:[#allocation2 + $0x444] ss:$16 sps:$4 sm:$0xff]  }
  0xa9   :  { %1889 = vmatpush1.bf16.msra.mxu1 %v6262_v21  ;;  %1751 = vmatprep.subr.bf16.mxu0 %v6267_v22  ;;  %v6356_v21 = vld [vmem:[#allocation2 + $0x34c] ss:$16 sps:$4 sm:$0xff]   ;;  %v6351_v22 = vld [vmem:[#allocation2 + $0x440] ss:$16 sps:$4 sm:$0xff]  }
  0xaa   :  { %1890 = vmatprep.subr.bf16.mxu1 %v6270_v23  ;;  %v6354_v23 = vld [vmem:[#allocation2 + $0x348] ss:$16 sps:$4 sm:$0xff]  }
  0xac   :  { %1752 = vmatpush1.bf16.msra.mxu0 %v6265_v24  ;;  %v6359_v24 = vld [vmem:[#allocation2 + $0x464] ss:$16 sps:$4 sm:$0xff]  }
  0xad   :  { %1891 = vmatpush1.bf16.msra.mxu1 %v6268_v25  ;;  %1753 = vmatprep.subr.bf16.mxu0 %v6273_v26  ;;  %v6362_v25 = vld [vmem:[#allocation2 + $0x36c] ss:$16 sps:$4 sm:$0xff]   ;;  %v6357_v26 = vld [vmem:[#allocation2 + $0x460] ss:$16 sps:$4 sm:$0xff]  }
  0xae   :  { %1892 = vmatprep.subr.bf16.mxu1 %v6276_v27  ;;  %v6360_v27 = vld [vmem:[#allocation2 + $0x368] ss:$16 sps:$4 sm:$0xff]  }
  0xb0   :  { %1754 = vmatpush1.bf16.msra.mxu0 %v6271_v28  ;;  %v6365_v28 = vld [vmem:[#allocation2 + $0x484] ss:$16 sps:$4 sm:$0xff]  }
  0xb1   :  { %1893 = vmatpush1.bf16.msra.mxu1 %v6274_v29  ;;  %1755 = vmatprep.subr.bf16.mxu0 %v6279_v30  ;;  %v6368_v29 = vld [vmem:[#allocation2 + $0x38c] ss:$16 sps:$4 sm:$0xff]   ;;  %v6363_v30 = vld [vmem:[#allocation2 + $0x480] ss:$16 sps:$4 sm:$0xff]  }
  0xb2   :  { %1894 = vmatprep.subr.bf16.mxu1 %v6282_v31  ;;  %v6366_v31 = vld [vmem:[#allocation2 + $0x388] ss:$16 sps:$4 sm:$0xff]  }
  0xb4   :  { %1756 = vmatpush1.bf16.msra.mxu0 %v6277_v33  ;;  %v6374_v33 = vld [vmem:[#allocation2 + $0x3ac] ss:$16 sps:$4 sm:$0xff]  }
  0xb5   :  { %1895 = vmatpush1.bf16.msra.mxu1 %v6280_v34  ;;  %1757 = vmatprep.subr.bf16.mxu0 %v6285_v36  ;;  %v6369_v34 = vld [vmem:[#allocation2 + $0x4a0] ss:$16 sps:$4 sm:$0xff]   ;;  %v6377_v36 = vld [vmem:[#allocation2 + $0x4c4] ss:$16 sps:$4 sm:$0xff]  }
  0xb6   :  { %1896 = vmatprep.subr.bf16.mxu1 %v6288_v37  ;;  %v6380_v37 = vld [vmem:[#allocation2 + $0x3cc] ss:$16 sps:$4 sm:$0xff]  }
  0xb8   :  { %1758 = vmatpush1.bf16.msra.mxu0 %v6283_v38  ;;  %v6375_v38 = vld [vmem:[#allocation2 + $0x4c0] ss:$16 sps:$4 sm:$0xff]  }
  0xb9   :  { %1897 = vmatpush1.bf16.msra.mxu1 %v6286_v39  ;;  %1759 = vmatprep.subr.bf16.mxu0 %v6291_v40  ;;  %v6378_v39 = vld [vmem:[#allocation2 + $0x3c8] ss:$16 sps:$4 sm:$0xff]   ;;  %v6383_v40 = vld [vmem:[#allocation2 + $0x4e4] ss:$16 sps:$4 sm:$0xff]  }
  0xba   :  { %1907 = vmatprep.subr.bf16.mxu1 %v6294_v41  ;;  %v6386_v41 = vld [vmem:[#allocation2 + $0x3ec] ss:$16 sps:$4 sm:$0xff]  }
  0xbc   :  { %1899 = vmatmul.mubr.bf16.vlgmr.msra.gmra.mrb[4].mxu1 %v7391_v7  ;;  %1760 = vmatpush1.bf16.msra.mxu0 %v6289_v42  ;;  %v6331_v7 = vld [vmem:[#allocation2 + $0x3e0] ss:$16 sps:$4 sm:$0xff]  }
  0xbd   :  { %1908 = vmatpush1.bf16.msra.mxu1 %v6292_v43  ;;  %1761 = vmatprep.subr.bf16.mxu0 %v6297_v44  ;;  %v6381_v42 = vld [vmem:[#allocation2 + $0x4e0] ss:$16 sps:$4 sm:$0xff]   ;;  %v6384_v43 = vld [vmem:[#allocation2 + $0x3e8] ss:$16 sps:$4 sm:$0xff]   ;;  %v6389_v44 = vld [vmem:[#allocation2 + $0x504] ss:$16 sps:$4 sm:$0xff]  }
  0xbe   :  { %1909 = vmatprep.subr.bf16.mxu1 %v6300_v45  ;;  %1939 = vmatprep.mubr.bf16.mxu1 %v5339_v35  ;;  %v6372_v35 = vld [vmem:[#allocation2 + $0x3a8] ss:$16 sps:$4 sm:$0xff]   ;;  %v6392_v45 = vld [vmem:[#allocation2 + $0x40c] ss:$16 sps:$4 sm:$0xff]  }
  0xc0   :  { %1762 = vmatpush1.bf16.msra.mxu0 %v6295_v46  ;;  %v6387_v46 = vld [vmem:[#allocation2 + $0x500] ss:$16 sps:$4 sm:$0xff]  }
  0xc1   :  { %1910 = vmatpush1.bf16.msra.mxu1 %v6298_v47  ;;  %1763 = vmatprep.subr.bf16.mxu0 %v6303_v48  ;;  %v6390_v47 = vld [vmem:[#allocation2 + $0x408] ss:$16 sps:$4 sm:$0xff]   ;;  %v6395_v48 = vld [vmem:[#allocation2 + $0x524] ss:$16 sps:$4 sm:$0xff]  }
  0xc2   :  { %1911 = vmatprep.subr.bf16.mxu1 %v6306_v49  ;;  %v6398_v49 = vld [vmem:[#allocation2 + $0x42c] ss:$16 sps:$4 sm:$0xff]  }
  0xc4   :  { %1764 = vmatpush1.bf16.msra.mxu0 %v6301_v50  ;;  %v6393_v50 = vld [vmem:[#allocation2 + $0x520] ss:$16 sps:$4 sm:$0xff]  }
  0xc5   :  { %1912 = vmatpush1.bf16.msra.mxu1 %v6304_v51  ;;  %1765 = vmatprep.subr.bf16.mxu0 %v6309_v52  ;;  %v6396_v51 = vld [vmem:[#allocation2 + $0x428] ss:$16 sps:$4 sm:$0xff]   ;;  %v6401_v52 = vld [vmem:[#allocation2 + $0x544] ss:$16 sps:$4 sm:$0xff]  }
  0xc6   :  { %1913 = vmatprep.subr.bf16.mxu1 %v6312_v53  ;;  %v6404_v53 = vld [vmem:[#allocation2 + $0x44c] ss:$16 sps:$4 sm:$0xff]  }
  0xc8   :  { %1766 = vmatpush1.bf16.msra.mxu0 %v6307_v54  ;;  %v6399_v54 = vld [vmem:[#allocation2 + $0x540] ss:$16 sps:$4 sm:$0xff]  }
  0xc9   :  { %1914 = vmatpush1.bf16.msra.mxu1 %v6310_v55  ;;  %1767 = vmatprep.subr.bf16.mxu0 %v6315_v56  ;;  %v6402_v55 = vld [vmem:[#allocation2 + $0x448] ss:$16 sps:$4 sm:$0xff]   ;;  %v6407_v56 = vld [vmem:[#allocation2 + $0x564] ss:$16 sps:$4 sm:$0xff]  }
  0xca   :  { %1915 = vmatprep.subr.bf16.mxu1 %v6318_v57  ;;  %v6410_v57 = vld [vmem:[#allocation2 + $0x46c] ss:$16 sps:$4 sm:$0xff]  }
  0xcc   :  { %1768 = vmatpush1.bf16.msra.mxu0 %v6313_v58  ;;  %v6405_v58 = vld [vmem:[#allocation2 + $0x560] ss:$16 sps:$4 sm:$0xff]  }
  0xcd   :  { %1916 = vmatpush1.bf16.msra.mxu1 %v6316_v59  ;;  %1769 = vmatprep.subr.bf16.mxu0 %v6321_v60  ;;  %v6408_v59 = vld [vmem:[#allocation2 + $0x468] ss:$16 sps:$4 sm:$0xff]   ;;  %v6413_v60 = vld [vmem:[#allocation2 + $0x584] ss:$16 sps:$4 sm:$0xff]  }
  0xce   :  { %1917 = vmatprep.subr.bf16.mxu1 %v6324_v61  ;;  %v6416_v61 = vld [vmem:[#allocation2 + $0x48c] ss:$16 sps:$4 sm:$0xff]  }
  0xd0   :  { %1770 = vmatpush1.bf16.msra.mxu0 %v6319_v62  ;;  %v6411_v62 = vld [vmem:[#allocation2 + $0x580] ss:$16 sps:$4 sm:$0xff]  }
  0xd1   :  { %1918 = vmatpush1.bf16.msra.mxu1 %v6322_v63  ;;  %1771 = vmatprep.subr.bf16.mxu0 %v6327_v1  ;;  %v6414_v63 = vld [vmem:[#allocation2 + $0x488] ss:$16 sps:$4 sm:$0xff]   ;;  %v6419_v1 = vld [vmem:[#allocation2 + $0x5a4] ss:$16 sps:$4 sm:$0xff]  }
  0xd2   :  { %1919 = vmatprep.subr.bf16.mxu1 %v6330_v2  ;;  %v6422_v2 = vld [vmem:[#allocation2 + $0x4ac] ss:$16 sps:$4 sm:$0xff]  }
  0xd4   :  { %1772 = vmatpush1.bf16.msra.mxu0 %v6325_v3  ;;  %v6417_v3 = vld [vmem:[#allocation2 + $0x5a0] ss:$16 sps:$4 sm:$0xff]  }
  0xd5   :  { %1920 = vmatpush1.bf16.msra.mxu1 %v6328_v4  ;;  %1773 = vmatprep.subr.bf16.mxu0 %v6333_v5  ;;  %v6420_v4 = vld [vmem:[#allocation2 + $0x4a8] ss:$16 sps:$4 sm:$0xff]   ;;  %v6425_v5 = vld [vmem:[#allocation2 + $0x5c4] ss:$16 sps:$4 sm:$0xff]  }
  0xd6   :  { %1921 = vmatprep.subr.bf16.mxu1 %v6336_v6  ;;  %v6428_v6 = vld [vmem:[#allocation2 + $0x4cc] ss:$16 sps:$4 sm:$0xff]  }
  0xd8   :  { %1774 = vmatpush1.bf16.msra.mxu0 %v6331_v7  ;;  %v6423_v7 = vld [vmem:[#allocation2 + $0x5c0] ss:$16 sps:$4 sm:$0xff]  }
  0xd9   :  { %1922 = vmatpush1.bf16.msra.mxu1 %v6334_v8  ;;  %1784 = vmatprep.subr.bf16.mxu0 %v6341_v9  ;;  %v6426_v8 = vld [vmem:[#allocation2 + $0x4c8] ss:$16 sps:$4 sm:$0xff]   ;;  %v6431_v9 = vld [vmem:[#allocation2 + $0x5e4] ss:$16 sps:$4 sm:$0xff]  }
  0xda   :  { %1923 = vmatprep.subr.bf16.mxu1 %v6344_v10  ;;  %v6434_v10 = vld [vmem:[#allocation2 + $0x4ec] ss:$16 sps:$4 sm:$0xff]  }
  0xdb   :  { %1776 = vmatmul.mubr.bf16.vlgmr.msra.gmra.mrb[0].mxu0 %v7404_v11 }
  0xdc   :  { %1785 = vmatpush1.bf16.msra.mxu0 %v6339_v12  ;;  %1816 = vmatprep.mubr.bf16.mxu0 %v7413_v17  ;;  %v6432_v12 = vld [vmem:[#allocation2 + $0x4e8] ss:$16 sps:$4 sm:$0xff]  }
  0xdd   :  { %1924 = vmatpush1.bf16.msra.mxu1 %v6342_v13  ;;  %1786 = vmatprep.subr.bf16.mxu0 %v6347_v14  ;;  %v6439_v13 = vld [vmem:[#allocation2 + $0x50c] ss:$16 sps:$4 sm:$0xff]   ;;  %v6487_v14 = vld [vmem:[#allocation4 + $0x4] ss:$16 sps:$4 sm:$0xff]  }
  0xde   :  { %1925 = vmatprep.subr.bf16.mxu1 %v6350_v15  ;;  %v6437_v15 = vld [vmem:[#allocation2 + $0x508] ss:$16 sps:$4 sm:$0xff]  }
  0xe0   :  { %1787 = vmatpush1.bf16.msra.mxu0 %v6345_v18  ;;  %v7421_v18 = vcombine.low %v7409_v16, %v7409_v16  ;;  %v6448_v16 = vld [vmem:[#allocation2 + $0x56c] ss:$16 sps:$4 sm:$0xff]  }
  0xe1   :  { %1926 = vmatpush1.bf16.msra.mxu1 %v6348_v19  ;;  %1788 = vmatprep.subr.bf16.mxu0 %v6353_v20  ;;  %v6442_v19 = vld [vmem:[#allocation2 + $0x52c] ss:$16 sps:$4 sm:$0xff]   ;;  %v6493_v20 = vld [vmem:[#allocation4 + $0x24] ss:$16 sps:$4 sm:$0xff]  }
  0xe2   :  { %1927 = vmatprep.subr.bf16.mxu1 %v6356_v21  ;;  %v6440_v21 = vld [vmem:[#allocation2 + $0x528] ss:$16 sps:$4 sm:$0xff]  }
  0xe4   :  { %1789 = vmatpush1.bf16.msra.mxu0 %v6351_v22  ;;  %v6491_v22 = vld [vmem:[#allocation4 + $0x20] ss:$16 sps:$4 sm:$0xff]  }
  0xe5   :  { %1928 = vmatpush1.bf16.msra.mxu1 %v6354_v23  ;;  %1790 = vmatprep.subr.bf16.mxu0 %v6359_v24  ;;  %v6445_v23 = vld [vmem:[#allocation2 + $0x54c] ss:$16 sps:$4 sm:$0xff]   ;;  %v6499_v24 = vld [vmem:[#allocation4 + $0x44] ss:$16 sps:$4 sm:$0xff]  }
  0xe6   :  { %1929 = vmatprep.subr.bf16.mxu1 %v6362_v25  ;;  %v6443_v25 = vld [vmem:[#allocation2 + $0x548] ss:$16 sps:$4 sm:$0xff]  }
  0xe8   :  { %1791 = vmatpush1.bf16.msra.mxu0 %v6357_v26  ;;  %v6497_v26 = vld [vmem:[#allocation4 + $0x40] ss:$16 sps:$4 sm:$0xff]  }
  0xe9   :  { %1930 = vmatpush1.bf16.msra.mxu1 %v6360_v27  ;;  %1792 = vmatprep.subr.bf16.mxu0 %v6365_v28  ;;  %v6505_v27 = vld [vmem:[#allocation4 + $0x64] ss:$16 sps:$4 sm:$0xff]   ;;  %v6446_v28 = vld [vmem:[#allocation2 + $0x568] ss:$16 sps:$4 sm:$0xff]  }
  0xea   :  { %1931 = vmatprep.subr.bf16.mxu1 %v6368_v29  ;;  %v6503_v29 = vld [vmem:[#allocation4 + $0x60] ss:$16 sps:$4 sm:$0xff]  }
  0xec   :  { %1793 = vmatpush1.bf16.msra.mxu0 %v6363_v30  ;;  %v6451_v30 = vld [vmem:[#allocation2 + $0x58c] ss:$16 sps:$4 sm:$0xff]  }
  0xed   :  { %1932 = vmatpush1.bf16.msra.mxu1 %v6366_v31  ;;  %1794 = vmatprep.subr.bf16.mxu0 %v6371_v32  ;;  %v6511_v31 = vld [vmem:[#allocation4 + $0x84] ss:$16 sps:$4 sm:$0xff]   ;;  %v6449_v32 = vld [vmem:[#allocation2 + $0x588] ss:$16 sps:$4 sm:$0xff]  }
  0xee   :  { %1933 = vmatprep.subr.bf16.mxu1 %v6374_v33  ;;  %v6509_v33 = vld [vmem:[#allocation4 + $0x80] ss:$16 sps:$4 sm:$0xff]  }
  0xf0   :  { %1795 = vmatpush1.bf16.msra.mxu0 %v6369_v34  ;;  %v6454_v34 = vld [vmem:[#allocation2 + $0x5ac] ss:$16 sps:$4 sm:$0xff]  }
  0xf1   :  { %1934 = vmatpush1.bf16.msra.mxu1 %v6372_v35  ;;  %1796 = vmatprep.subr.bf16.mxu0 %v6377_v36  ;;  %v6517_v35 = vld [vmem:[#allocation4 + $0xa4] ss:$16 sps:$4 sm:$0xff]   ;;  %v6452_v36 = vld [vmem:[#allocation2 + $0x5a8] ss:$16 sps:$4 sm:$0xff]  }
  0xf2   :  { %1935 = vmatprep.subr.bf16.mxu1 %v6380_v37  ;;  %v6515_v37 = vld [vmem:[#allocation4 + $0xa0] ss:$16 sps:$4 sm:$0xff]  }
  0xf4   :  { %1797 = vmatpush1.bf16.msra.mxu0 %v6375_v38  ;;  %v6457_v38 = vld [vmem:[#allocation2 + $0x5cc] ss:$16 sps:$4 sm:$0xff]  }
  0xf5   :  { %1936 = vmatpush1.bf16.msra.mxu1 %v6378_v39  ;;  %1798 = vmatprep.subr.bf16.mxu0 %v6383_v40  ;;  %v6523_v39 = vld [vmem:[#allocation4 + $0xc4] ss:$16 sps:$4 sm:$0xff]   ;;  %v6455_v40 = vld [vmem:[#allocation2 + $0x5c8] ss:$16 sps:$4 sm:$0xff]  }
  0xf6   :  { %1937 = vmatprep.subr.bf16.mxu1 %v6386_v41  ;;  %v6521_v41 = vld [vmem:[#allocation4 + $0xc0] ss:$16 sps:$4 sm:$0xff]  }
  0xf8   :  { %1799 = vmatpush1.bf16.msra.mxu0 %v6381_v42  ;;  %v6460_v42 = vld [vmem:[#allocation2 + $0x5ec] ss:$16 sps:$4 sm:$0xff]  }
  0xf9   :  { %1938 = vmatpush1.bf16.msra.mxu1 %v6384_v43  ;;  %1800 = vmatprep.subr.bf16.mxu0 %v6389_v44  ;;  %v6529_v43 = vld [vmem:[#allocation4 + $0xe4] ss:$16 sps:$4 sm:$0xff]   ;;  %v6458_v44 = vld [vmem:[#allocation2 + $0x5e8] ss:$16 sps:$4 sm:$0xff]  }
  0xfa   :  { %1948 = vmatprep.subr.bf16.mxu1 %v6392_v45  ;;  %v6527_v45 = vld [vmem:[#allocation4 + $0xe0] ss:$16 sps:$4 sm:$0xff]  }
  0xfc   :  { %1940 = vmatmul.mubr.bf16.vlgmr.msra.gmra.mrb[4].mxu1 %v7404_v11  ;;  %1801 = vmatpush1.bf16.msra.mxu0 %v6387_v46  ;;  %v6429_v11 = vld [vmem:[#allocation2 + $0x5e0] ss:$16 sps:$4 sm:$0xff]   ;;  %v6463_v46 = vld [vmem:[#allocation2 + $0x60c] ss:$16 sps:$4 sm:$0xff]  }
  0xfd   :  { %1949 = vmatpush1.bf16.msra.mxu1 %v6390_v47  ;;  %1802 = vmatprep.subr.bf16.mxu0 %v6395_v48  ;;  %v6535_v47 = vld [vmem:[#allocation4 + $0x104] ss:$16 sps:$4 sm:$0xff]   ;;  %v6461_v48 = vld [vmem:[#allocation2 + $0x608] ss:$16 sps:$4 sm:$0xff]  }
  0xfe   :  { %1950 = vmatprep.subr.bf16.mxu1 %v6398_v49  ;;  %1980 = vmatprep.mubr.bf16.mxu1 %v7413_v17  ;;  %v6485_v17 = vld [vmem:[#allocation4] ss:$16 sps:$4 sm:$0xff]   ;;  %v6466_v49 = vld [vmem:[#allocation2 + $0x62c] ss:$16 sps:$4 sm:$0xff]  }
 0x100   :  { %1803 = vmatpush1.bf16.msra.mxu0 %v6393_v50  ;;  %v6533_v50 = vld [vmem:[#allocation4 + $0x100] ss:$16 sps:$4 sm:$0xff]  }
 0x101   :  { %1951 = vmatpush1.bf16.msra.mxu1 %v6396_v51  ;;  %1804 = vmatprep.subr.bf16.mxu0 %v6401_v52  ;;  %v6541_v51 = vld [vmem:[#allocation4 + $0x124] ss:$16 sps:$4 sm:$0xff]   ;;  %v6464_v52 = vld [vmem:[#allocation2 + $0x628] ss:$16 sps:$4 sm:$0xff]  }
 0x102   :  { %1952 = vmatprep.subr.bf16.mxu1 %v6404_v53  ;;  %v6469_v53 = vld [vmem:[#allocation2 + $0x64c] ss:$16 sps:$4 sm:$0xff]  }
 0x104   :  { %1805 = vmatpush1.bf16.msra.mxu0 %v6399_v54  ;;  %v6539_v54 = vld [vmem:[#allocation4 + $0x120] ss:$16 sps:$4 sm:$0xff]  }
 0x105   :  { %1953 = vmatpush1.bf16.msra.mxu1 %v6402_v55  ;;  %1806 = vmatprep.subr.bf16.mxu0 %v6407_v56  ;;  %v6547_v55 = vld [vmem:[#allocation4 + $0x144] ss:$16 sps:$4 sm:$0xff]   ;;  %v6467_v56 = vld [vmem:[#allocation2 + $0x648] ss:$16 sps:$4 sm:$0xff]  }
 0x106   :  { %1954 = vmatprep.subr.bf16.mxu1 %v6410_v57  ;;  %v6472_v57 = vld [vmem:[#allocation2 + $0x66c] ss:$16 sps:$4 sm:$0xff]  }
 0x108   :  { %1807 = vmatpush1.bf16.msra.mxu0 %v6405_v58  ;;  %v6545_v58 = vld [vmem:[#allocation4 + $0x140] ss:$16 sps:$4 sm:$0xff]  }
 0x109   :  { %1955 = vmatpush1.bf16.msra.mxu1 %v6408_v59  ;;  %1808 = vmatprep.subr.bf16.mxu0 %v6413_v60  ;;  %v6553_v59 = vld [vmem:[#allocation4 + $0x164] ss:$16 sps:$4 sm:$0xff]   ;;  %v6470_v60 = vld [vmem:[#allocation2 + $0x668] ss:$16 sps:$4 sm:$0xff]  }
 0x10a   :  { %1956 = vmatprep.subr.bf16.mxu1 %v6416_v61  ;;  %v6475_v61 = vld [vmem:[#allocation2 + $0x68c] ss:$16 sps:$4 sm:$0xff]  }
 0x10c   :  { %1809 = vmatpush1.bf16.msra.mxu0 %v6411_v62  ;;  %v6551_v62 = vld [vmem:[#allocation4 + $0x160] ss:$16 sps:$4 sm:$0xff]  }
 0x10d   :  { %1957 = vmatpush1.bf16.msra.mxu1 %v6414_v63  ;;  %1810 = vmatprep.subr.bf16.mxu0 %v6419_v1  ;;  %v6559_v63 = vld [vmem:[#allocation4 + $0x184] ss:$16 sps:$4 sm:$0xff]   ;;  %v6473_v1 = vld [vmem:[#allocation2 + $0x688] ss:$16 sps:$4 sm:$0xff]  }
 0x10e   :  { %1958 = vmatprep.subr.bf16.mxu1 %v6422_v2  ;;  %v6478_v2 = vld [vmem:[#allocation2 + $0x6ac] ss:$16 sps:$4 sm:$0xff]  }
 0x110   :  { %1811 = vmatpush1.bf16.msra.mxu0 %v6417_v3  ;;  %v6557_v3 = vld [vmem:[#allocation4 + $0x180] ss:$16 sps:$4 sm:$0xff]  }
 0x111   :  { %1959 = vmatpush1.bf16.msra.mxu1 %v6420_v4  ;;  %1812 = vmatprep.subr.bf16.mxu0 %v6425_v5  ;;  %v6565_v4 = vld [vmem:[#allocation4 + $0x1a4] ss:$16 sps:$4 sm:$0xff]   ;;  %v6476_v5 = vld [vmem:[#allocation2 + $0x6a8] ss:$16 sps:$4 sm:$0xff]  }
 0x112   :  { %1960 = vmatprep.subr.bf16.mxu1 %v6428_v6  ;;  %v6481_v6 = vld [vmem:[#allocation2 + $0x6cc] ss:$16 sps:$4 sm:$0xff]  }
 0x114   :  { %1813 = vmatpush1.bf16.msra.mxu0 %v6423_v7  ;;  %v6563_v7 = vld [vmem:[#allocation4 + $0x1a0] ss:$16 sps:$4 sm:$0xff]  }
 0x115   :  { %1961 = vmatpush1.bf16.msra.mxu1 %v6426_v8  ;;  %1814 = vmatprep.subr.bf16.mxu0 %v6431_v9  ;;  %v6479_v9 = vld [vmem:[#allocation2 + $0x6c8] ss:$16 sps:$4 sm:$0xff]  }
 0x116   :  { %1962 = vmatprep.subr.bf16.mxu1 %v6434_v10 }
 0x118   :  { %1815 = vmatpush1.bf16.msra.mxu0 %v6429_v11  ;;  %v6484_v11 = vld [vmem:[#allocation2 + $0x6ec] ss:$16 sps:$4 sm:$0xff]  }
 0x119   :  { %1963 = vmatpush1.bf16.msra.mxu1 %v6432_v12  ;;  %2699 = vmatprep.subr.bf16.mxu0 %v6487_v14  ;;  %v6482_v14 = vld [vmem:[#allocation2 + $0x6e8] ss:$16 sps:$4 sm:$0xff]  }
 0x11a   :  { %1964 = vmatprep.subr.bf16.mxu1 %v6439_v13 }
 0x11b   :  { %1817 = vmatmul.mubr.bf16.vlgmr.msra.gmra.mrb[0].mxu0 %v7421_v18 }
 0x11c   :  { %2700 = vmatpush1.bf16.msra.mxu0 %v6485_v17  ;;  %v6488_v17 = vld [vmem:[#allocation4 + $0x8] ss:$16 sps:$4 sm:$0xff]  }
 0x11d   :  { %1965 = vmatpush1.bf16.msra.mxu1 %v6437_v15  ;;  %2701 = vmatprep.subr.bf16.mxu0 %v6493_v20  ;;  %v6490_v15 = vld [vmem:[#allocation4 + $0xc] ss:$16 sps:$4 sm:$0xff]   ;;  %v7097_v20 = vld [vmem:[%s7557_s0 + $0x18] ss:$0 sps:$4 sm:$0xff]  }
 0x11e   :  { %1966 = vmatprep.subr.bf16.mxu1 %v6442_v19  ;;  %v6494_v19 = vld [vmem:[#allocation4 + $0x28] ss:$16 sps:$4 sm:$0xff]  }
 0x120   :  { %2702 = vmatpush1.bf16.msra.mxu0 %v6491_v22  ;;  %v6500_v22 = vld [vmem:[#allocation4 + $0x48] ss:$16 sps:$4 sm:$0xff]  }
 0x121   :  { %1967 = vmatpush1.bf16.msra.mxu1 %v6440_v21  ;;  %2703 = vmatprep.subr.bf16.mxu0 %v6499_v24  ;;  %v6502_v21 = vld [vmem:[#allocation4 + $0x4c] ss:$16 sps:$4 sm:$0xff]   ;;  %v6506_v24 = vld [vmem:[#allocation4 + $0x68] ss:$16 sps:$4 sm:$0xff]  }
 0x122   :  { %1968 = vmatprep.subr.bf16.mxu1 %v6445_v23  ;;  %v6508_v23 = vld [vmem:[#allocation4 + $0x6c] ss:$16 sps:$4 sm:$0xff]  }
 0x124   :  { %2704 = vmatpush1.bf16.msra.mxu0 %v6497_v26  ;;  %v6512_v26 = vld [vmem:[#allocation4 + $0x88] ss:$16 sps:$4 sm:$0xff]  }
 0x125   :  { %1969 = vmatpush1.bf16.msra.mxu1 %v6443_v25  ;;  %2705 = vmatprep.subr.bf16.mxu0 %v6505_v27  ;;  %v6514_v25 = vld [vmem:[#allocation4 + $0x8c] ss:$16 sps:$4 sm:$0xff]   ;;  %v6518_v27 = vld [vmem:[#allocation4 + $0xa8] ss:$16 sps:$4 sm:$0xff]  }
 0x126   :  { %1970 = vmatprep.subr.bf16.mxu1 %v6448_v16  ;;  %v6520_v16 = vld [vmem:[#allocation4 + $0xac] ss:$16 sps:$4 sm:$0xff]  }
 0x128   :  { %2706 = vmatpush1.bf16.msra.mxu0 %v6503_v29  ;;  %v6524_v29 = vld [vmem:[#allocation4 + $0xc8] ss:$16 sps:$4 sm:$0xff]  }
 0x129   :  { %1971 = vmatpush1.bf16.msra.mxu1 %v6446_v28  ;;  %2707 = vmatprep.subr.bf16.mxu0 %v6511_v31  ;;  %v6526_v28 = vld [vmem:[#allocation4 + $0xcc] ss:$16 sps:$4 sm:$0xff]  }
 0x12a   :  { %1972 = vmatprep.subr.bf16.mxu1 %v6451_v30  ;;  %v6571_v30 = vld [vmem:[#allocation4 + $0x1c4] ss:$16 sps:$4 sm:$0xff]   ;;  %v6532_v31 = vld [vmem:[#allocation4 + $0xec] ss:$16 sps:$4 sm:$0xff]  }
 0x12c   :  { %2708 = vmatpush1.bf16.msra.mxu0 %v6509_v33  ;;  %v6530_v33 = vld [vmem:[#allocation4 + $0xe8] ss:$16 sps:$4 sm:$0xff]  }
 0x12d   :  { %1973 = vmatpush1.bf16.msra.mxu1 %v6449_v32  ;;  %2709 = vmatprep.subr.bf16.mxu0 %v6517_v35  ;;  %v6569_v32 = vld [vmem:[#allocation4 + $0x1c0] ss:$16 sps:$4 sm:$0xff]   ;;  %v6538_v35 = vld [vmem:[#allocation4 + $0x10c] ss:$16 sps:$4 sm:$0xff]  }
 0x12e   :  { %1974 = vmatprep.subr.bf16.mxu1 %v6454_v34  ;;  %v6577_v34 = vld [vmem:[#allocation4 + $0x1e4] ss:$16 sps:$4 sm:$0xff]  }
 0x130   :  { %2710 = vmatpush1.bf16.msra.mxu0 %v6515_v37  ;;  %v6583_v37 = vld [vmem:[#allocation4 + $0x204] ss:$16 sps:$4 sm:$0xff]  }
 0x131   :  { %1975 = vmatpush1.bf16.msra.mxu1 %v6452_v36  ;;  %2711 = vmatprep.subr.bf16.mxu0 %v6523_v39  ;;  %v6575_v36 = vld [vmem:[#allocation4 + $0x1e0] ss:$16 sps:$4 sm:$0xff]   ;;  %v6544_v39 = vld [vmem:[#allocation4 + $0x12c] ss:$16 sps:$4 sm:$0xff]  }
 0x132   :  { %1976 = vmatprep.subr.bf16.mxu1 %v6457_v38  ;;  %v6536_v38 = vld [vmem:[#allocation4 + $0x108] ss:$16 sps:$4 sm:$0xff]  }
 0x134   :  { %2712 = vmatpush1.bf16.msra.mxu0 %v6521_v41  ;;  %v6550_v41 = vld [vmem:[#allocation4 + $0x14c] ss:$16 sps:$4 sm:$0xff]  }
 0x135   :  { %1977 = vmatpush1.bf16.msra.mxu1 %v6455_v40  ;;  %2713 = vmatprep.subr.bf16.mxu0 %v6529_v43  ;;  %v6542_v40 = vld [vmem:[#allocation4 + $0x128] ss:$16 sps:$4 sm:$0xff]   ;;  %v6556_v43 = vld [vmem:[#allocation4 + $0x16c] ss:$16 sps:$4 sm:$0xff]  }
 0x136   :  { %1978 = vmatprep.subr.bf16.mxu1 %v6460_v42  ;;  %v6548_v42 = vld [vmem:[#allocation4 + $0x148] ss:$16 sps:$4 sm:$0xff]  }
 0x138   :  { %2714 = vmatpush1.bf16.msra.mxu0 %v6527_v45  ;;  %v6562_v45 = vld [vmem:[#allocation4 + $0x18c] ss:$16 sps:$4 sm:$0xff]  }
 0x139   :  { %1979 = vmatpush1.bf16.msra.mxu1 %v6458_v44  ;;  %2715 = vmatprep.subr.bf16.mxu0 %v6535_v47  ;;  %v6554_v44 = vld [vmem:[#allocation4 + $0x168] ss:$16 sps:$4 sm:$0xff]   ;;  %v6568_v47 = vld [vmem:[#allocation4 + $0x1ac] ss:$16 sps:$4 sm:$0xff]  }
 0x13a   :  { %1989 = vmatprep.subr.bf16.mxu1 %v6463_v46  ;;  %v6560_v46 = vld [vmem:[#allocation4 + $0x188] ss:$16 sps:$4 sm:$0xff]  }
 0x13c   :  { %1981 = vmatmul.mubr.bf16.vlgmr.msra.gmra.mrb[4].mxu1 %v7421_v18  ;;  %2716 = vmatpush1.bf16.msra.mxu0 %v6533_v50  ;;  %v6496_v18 = vld [vmem:[#allocation4 + $0x2c] ss:$16 sps:$4 sm:$0xff]   ;;  %v6572_v50 = vld [vmem:[#allocation4 + $0x1c8] ss:$16 sps:$4 sm:$0xff]  }
 0x13d   :  { %1990 = vmatpush1.bf16.msra.mxu1 %v6461_v48  ;;  %2021 = vmatprep.mubr.bf16.mxu1 %v7225_v0  ;;  %v6566_v48 = vld [vmem:[#allocation4 + $0x1a8] ss:$16 sps:$4 sm:$0xff]  }
 0x13e   :  { %1991 = vmatprep.subr.bf16.mxu1 %v6466_v49  ;;  %2717 = vmatprep.subr.bf16.mxu0 %v6541_v51  ;;  %v6574_v49 = vld [vmem:[#allocation4 + $0x1cc] ss:$16 sps:$4 sm:$0xff]  }
 0x13f   :  { %v6580_v51 = vld [vmem:[#allocation4 + $0x1ec] ss:$16 sps:$4 sm:$0xff]  }
 0x140   :  { %2718 = vmatpush1.bf16.msra.mxu0 %v6539_v54  ;;  %v537_v54 = vlaneseq }
 0x141   :  { %1992 = vmatpush1.bf16.msra.mxu1 %v6464_v52  ;;  %2719 = vmatprep.subr.bf16.mxu0 %v6547_v55  ;;  %v6578_v52 = vld [vmem:[#allocation4 + $0x1e8] ss:$16 sps:$4 sm:$0xff]  }
 0x142   :  { %1993 = vmatprep.subr.bf16.mxu1 %v6469_v53  ;;  %v6586_v53 = vld [vmem:[#allocation4 + $0x20c] ss:$16 sps:$4 sm:$0xff]   ;;  %v7434_v55 = vshrl.u32 %v537_v54, 7 }
 0x144   :  { %2720 = vmatpush1.bf16.msra.mxu0 %v6545_v58  ;;  %v7445_v58 = vsub.s32 1, %v7434_v55  ;;  %vm3223_vm2 = vcmp.lt.s32.totalorder %v7434_v55, 2 }
 0x145   :  { %1994 = vmatpush1.bf16.msra.mxu1 %v6467_v56  ;;  %2721 = vmatprep.subr.bf16.mxu0 %v6553_v59  ;;  %v7437_v56 = vsub.s32 0, %v7434_v55 }
 0x146   :  { %1995 = vmatprep.subr.bf16.mxu1 %v6472_v57  ;;  %v7442_v57 = vld [vmem:[%s7560_s3] sm:$0xf] }
 0x147   :  { %v540_v59 = vrot.slane %v7442_v57, %v7437_v56 }
 0x148   :  { %2722 = vmatpush1.bf16.msra.mxu0 %v6551_v62 }
 0x149   :  { %1996 = vmatpush1.bf16.msra.mxu1 %v6470_v60  ;;  %2723 = vmatprep.subr.bf16.mxu0 %v6559_v63  ;;  %v544_v60 = vrot.slane %v7442_v57, %v7445_v58 }
 0x14a   :  { %1997 = vmatprep.subr.bf16.mxu1 %v6475_v61 }
 0x14c   :  { %2724 = vmatpush1.bf16.msra.mxu0 %v6557_v3 }
 0x14d   :  { %1998 = vmatpush1.bf16.msra.mxu1 %v6473_v1  ;;  %2725 = vmatprep.subr.bf16.mxu0 %v6565_v4 }
 0x14e   :  { %1999 = vmatprep.subr.bf16.mxu1 %v6478_v2 }
 0x14f   :  { %v7426_v8 = vpop.f32.mrb[0].mxu1 }
 0x150   :  { %v7428_v10 = vpop.f32.mrb[1].mxu1  ;;  %2726 = vmatpush1.bf16.msra.mxu0 %v6563_v7 }
 0x151   :  { %v1863_v12 = vpop.f32.mrb[2].mxu1  ;;  %2000 = vmatpush1.bf16.msra.mxu1 %v6476_v5  ;;  %2727 = vmatprep.subr.bf16.mxu0 %v6571_v30  ;;  %v6611_v30 = vld [vmem:[#allocation4 + $0x2a0] ss:$16 sps:$4 sm:$0xff]  }
 0x152   :  { %v1864_v13 = vpop.f32.mrb[3].mxu1  ;;  %2001 = vmatprep.subr.bf16.mxu1 %v6481_v6  ;;  %v6584_v12 = vld [vmem:[#allocation4 + $0x208] ss:$16 sps:$4 sm:$0xff]  }
 0x154   :  { %2728 = vmatpush1.bf16.msra.mxu0 %v6569_v32  ;;  %v6619_v32 = vld [vmem:[#allocation4 + $0x2c4] ss:$16 sps:$4 sm:$0xff]  }
 0x155   :  { %2002 = vmatpush1.bf16.msra.mxu1 %v6479_v9  ;;  %2729 = vmatprep.subr.bf16.mxu0 %v6577_v34  ;;  %v6617_v34 = vld [vmem:[#allocation4 + $0x2c0] ss:$16 sps:$4 sm:$0xff]  }
 0x156   :  { %2003 = vmatprep.subr.bf16.mxu1 %v6484_v11  ;;  %v6581_v11 = vld [vmem:[#allocation4 + $0x200] ss:$16 sps:$4 sm:$0xff]  }
 0x158   :  { %2730 = vmatpush1.bf16.msra.mxu0 %v6575_v36  ;;  %v6625_v36 = vld [vmem:[#allocation4 + $0x2e4] ss:$16 sps:$4 sm:$0xff]  }
 0x159   :  { %2004 = vmatpush1.bf16.msra.mxu1 %v6482_v14  ;;  %2740 = vmatprep.subr.bf16.mxu0 %v6583_v37  ;;  %v6589_v14 = vld [vmem:[#allocation4 + $0x224] ss:$16 sps:$4 sm:$0xff]   ;;  %v6628_v37 = vld [vmem:[#allocation4 + $0x2ec] ss:$16 sps:$4 sm:$0xff]  }
 0x15a   :  { %2781 = vmatprep.subr.bf16.mxu1 %v6490_v15  ;;  %v6592_v15 = vld [vmem:[#allocation4 + $0x22c] ss:$16 sps:$4 sm:$0xff]  }
 0x15c   :  { %2022 = vmatmul.mubr.bf16.vlgmr.msra.gmra.mrb[4].mxu1 %v7097_v20  ;;  %v6596_v20 = vld [vmem:[#allocation4 + $0x248] ss:$16 sps:$4 sm:$0xff]  }
 0x15d   :  { %2782 = vmatpush1.bf16.msra.mxu1 %v6488_v17  ;;  %v6587_v17 = vld [vmem:[#allocation4 + $0x220] ss:$16 sps:$4 sm:$0xff]  }
 0x15e   :  { %2783 = vmatprep.subr.bf16.mxu1 %v6496_v18  ;;  %v6590_v18 = vld [vmem:[#allocation4 + $0x228] ss:$16 sps:$4 sm:$0xff]  }
 0x161   :  { %2784 = vmatpush1.bf16.msra.mxu1 %v6494_v19  ;;  %v6593_v19 = vld [vmem:[#allocation4 + $0x240] ss:$16 sps:$4 sm:$0xff]  }
 0x162   :  { %2785 = vmatprep.subr.bf16.mxu1 %v6502_v21  ;;  %v6601_v21 = vld [vmem:[#allocation4 + $0x264] ss:$16 sps:$4 sm:$0xff]  }
 0x165   :  { %2786 = vmatpush1.bf16.msra.mxu1 %v6500_v22  ;;  %v6604_v22 = vld [vmem:[#allocation4 + $0x26c] ss:$16 sps:$4 sm:$0xff]  }
 0x166   :  { %2787 = vmatprep.subr.bf16.mxu1 %v6508_v23  ;;  %v6599_v23 = vld [vmem:[#allocation4 + $0x260] ss:$16 sps:$4 sm:$0xff]  }
 0x169   :  { %2788 = vmatpush1.bf16.msra.mxu1 %v6506_v24  ;;  %v6602_v24 = vld [vmem:[#allocation4 + $0x268] ss:$16 sps:$4 sm:$0xff]  }
 0x16a   :  { %2789 = vmatprep.subr.bf16.mxu1 %v6514_v25  ;;  %v6607_v25 = vld [vmem:[#allocation4 + $0x284] ss:$16 sps:$4 sm:$0xff]  }
 0x16d   :  { %2790 = vmatpush1.bf16.msra.mxu1 %v6512_v26  ;;  %v6610_v26 = vld [vmem:[#allocation4 + $0x28c] ss:$16 sps:$4 sm:$0xff]  }
 0x16e   :  { %2791 = vmatprep.subr.bf16.mxu1 %v6520_v16  ;;  %v6605_v16 = vld [vmem:[#allocation4 + $0x280] ss:$16 sps:$4 sm:$0xff]  }
 0x171   :  { %2792 = vmatpush1.bf16.msra.mxu1 %v6518_v27  ;;  %v6608_v27 = vld [vmem:[#allocation4 + $0x288] ss:$16 sps:$4 sm:$0xff]  }
 0x172   :  { %2793 = vmatprep.subr.bf16.mxu1 %v6526_v28  ;;  %v6613_v28 = vld [vmem:[#allocation4 + $0x2a4] ss:$16 sps:$4 sm:$0xff]  }
 0x175   :  { %2794 = vmatpush1.bf16.msra.mxu1 %v6524_v29  ;;  %v6616_v29 = vld [vmem:[#allocation4 + $0x2ac] ss:$16 sps:$4 sm:$0xff]  }
 0x176   :  { %2795 = vmatprep.subr.bf16.mxu1 %v6532_v31  ;;  %v6614_v31 = vld [vmem:[#allocation4 + $0x2a8] ss:$16 sps:$4 sm:$0xff]  }
 0x179   :  { %2796 = vmatpush1.bf16.msra.mxu1 %v6530_v33  ;;  %v6622_v33 = vld [vmem:[#allocation4 + $0x2cc] ss:$16 sps:$4 sm:$0xff]  }
 0x17a   :  { %2797 = vmatprep.subr.bf16.mxu1 %v6538_v35  ;;  %v6620_v35 = vld [vmem:[#allocation4 + $0x2c8] ss:$16 sps:$4 sm:$0xff]  }
 0x17d   :  { %2798 = vmatpush1.bf16.msra.mxu1 %v6536_v38  ;;  %v6623_v38 = vld [vmem:[#allocation4 + $0x2e0] ss:$16 sps:$4 sm:$0xff]  }
 0x17e   :  { %2799 = vmatprep.subr.bf16.mxu1 %v6544_v39  ;;  %v6626_v39 = vld [vmem:[#allocation4 + $0x2e8] ss:$16 sps:$4 sm:$0xff]  }
 0x181   :  { %2800 = vmatpush1.bf16.msra.mxu1 %v6542_v40  ;;  %v6631_v40 = vld [vmem:[#allocation4 + $0x304] ss:$16 sps:$4 sm:$0xff]  }
 0x182   :  { %2801 = vmatprep.subr.bf16.mxu1 %v6550_v41  ;;  %v6634_v41 = vld [vmem:[#allocation4 + $0x30c] ss:$16 sps:$4 sm:$0xff]  }
 0x185   :  { %2802 = vmatpush1.bf16.msra.mxu1 %v6548_v42  ;;  %v6629_v42 = vld [vmem:[#allocation4 + $0x300] ss:$16 sps:$4 sm:$0xff]  }
 0x186   :  { %2803 = vmatprep.subr.bf16.mxu1 %v6556_v43  ;;  %v6632_v43 = vld [vmem:[#allocation4 + $0x308] ss:$16 sps:$4 sm:$0xff]  }
 0x189   :  { %2804 = vmatpush1.bf16.msra.mxu1 %v6554_v44  ;;  %v6637_v44 = vld [vmem:[#allocation4 + $0x324] ss:$16 sps:$4 sm:$0xff]  }
 0x18a   :  { %2805 = vmatprep.subr.bf16.mxu1 %v6562_v45  ;;  %v6640_v45 = vld [vmem:[#allocation4 + $0x32c] ss:$16 sps:$4 sm:$0xff]  }
 0x18d   :  { %2806 = vmatpush1.bf16.msra.mxu1 %v6560_v46  ;;  %v6635_v46 = vld [vmem:[#allocation4 + $0x320] ss:$16 sps:$4 sm:$0xff]  }
 0x18e   :  { %2807 = vmatprep.subr.bf16.mxu1 %v6568_v47  ;;  %v6638_v47 = vld [vmem:[#allocation4 + $0x328] ss:$16 sps:$4 sm:$0xff]  }
 0x191   :  { %2808 = vmatpush1.bf16.msra.mxu1 %v6566_v48  ;;  %v6643_v48 = vld [vmem:[#allocation4 + $0x344] ss:$16 sps:$4 sm:$0xff]  }
 0x192   :  { %2809 = vmatprep.subr.bf16.mxu1 %v6574_v49  ;;  %v6646_v49 = vld [vmem:[#allocation4 + $0x34c] ss:$16 sps:$4 sm:$0xff]  }
 0x195   :  { %2810 = vmatpush1.bf16.msra.mxu1 %v6572_v50  ;;  %v6641_v50 = vld [vmem:[#allocation4 + $0x340] ss:$16 sps:$4 sm:$0xff]  }
 0x196   :  { %2811 = vmatprep.subr.bf16.mxu1 %v6580_v51  ;;  %v6644_v51 = vld [vmem:[#allocation4 + $0x348] ss:$16 sps:$4 sm:$0xff]  }
 0x199   :  { %2812 = vmatpush1.bf16.msra.mxu1 %v6578_v52  ;;  %v6649_v52 = vld [vmem:[#allocation4 + $0x364] ss:$16 sps:$4 sm:$0xff]  }
 0x19a   :  { %2822 = vmatprep.subr.bf16.mxu1 %v6586_v53  ;;  %v6652_v53 = vld [vmem:[#allocation4 + $0x36c] ss:$16 sps:$4 sm:$0xff]  }
 0x1ee   :  { %v1818_v61 = vpop.f32.mrb[0].mxu0 }
 0x1ef   :  { %v6074_v62 = vadd.f32 %v1818_v61, %v540_v59  ;;  %v1820_v63 = vpop.f32.mrb[1].mxu0  ;;  %v6647_v59 = vld [vmem:[#allocation4 + $0x360] ss:$16 sps:$4 sm:$0xff]   ;;  %v6655_v61 = vld [vmem:[#allocation4 + $0x384] ss:$16 sps:$4 sm:$0xff]  }
 0x1f0   :  { %v6076_v1 = vadd.f32 %v1820_v63, %v544_v60  ;;  %v1822_v2 = vpop.f32.mrb[2].mxu0  ;;  %v6650_v60 = vld [vmem:[#allocation4 + $0x368] ss:$16 sps:$4 sm:$0xff]   ;;  %v6653_v63 = vld [vmem:[#allocation4 + $0x380] ss:$16 sps:$4 sm:$0xff]  }
 0x1f1   :  { %v6075_v3 = vadd.f32 %v6074_v62, %v7426_v8  ;;  %v1823_v4 = vpop.f32.mrb[3].mxu0  ;;  %v6595_v8 = vld [vmem:[#allocation4 + $0x244] ss:$16 sps:$4 sm:$0xff]   ;;  %v6658_v62 = vld [vmem:[#allocation4 + $0x38c] ss:$16 sps:$4 sm:$0xff]  }
 0x1f2   :  { %v6077_v5 = vadd.f32 %v6076_v1, %v7428_v10  ;;  %v6598_v10 = vld [vmem:[#allocation4 + $0x24c] ss:$16 sps:$4 sm:$0xff]   ;;  %v6656_v1 = vld [vmem:[#allocation4 + $0x388] ss:$16 sps:$4 sm:$0xff]   ;;  %v6661_v2 = vld [vmem:[#allocation4 + $0x3a4] ss:$16 sps:$4 sm:$0xff]  }
 0x1f3   :  { %v2030_v6 = vmax.f32 %v6075_v3, 0.0  ;;  %v6664_v3 = vld [vmem:[#allocation4 + $0x3ac] ss:$16 sps:$4 sm:$0xff]   ;;  %v7454_v4 = vsub.s32 2, %v7434_v55 }
 0x1f4   :  { %v2031_v7 = vmax.f32 %v6077_v5, 0.0  ;;  %v7457_v5 = vsub.s32 3, %v7434_v55 }
 0x1f5   :  { %v2034_v13 = vpack.c.bf16 %v2030_v6, %v2030_v6  ;;  %v6659_v6 = vld [vmem:[#allocation4 + $0x3a0] ss:$16 sps:$4 sm:$0xff]  }
 0x1f6   :  { %v2035_v9 = vpack.c.bf16 %v2031_v7, %v2031_v7  ;;  %v6662_v7 = vld [vmem:[#allocation4 + $0x3a8] ss:$16 sps:$4 sm:$0xff]  }
 0x1f8   :  { %2731 = vmatprep.mubr.bf16.mxu0 %v2035_v9  ;;  %2813 = vmatprep.mubr.bf16.mxu1 %v2035_v9  ;;  %v548_v9 = vrot.slane %v7442_v57, %v7454_v4 }
 0x1f9   :  { %2732 = vmatmul.mubr.bf16.vlgmr.msra.gmra.mrb[4].mxu0 %v2034_v13  ;;  %2814 = vmatmul.mubr.bf16.vlgmr.msra.gmra.mrb[8].mxu1 %v2034_v13  ;;  %v552_v13 = vrot.slane %v7442_v57, %v7457_v5 }
 0x1fa   :  { %2741 = vmatpush1.bf16.msra.mxu0 %v6581_v11  ;;  %2823 = vmatpush1.bf16.msra.mxu1 %v6584_v12  ;;  %v6667_v11 = vld [vmem:[#allocation4 + $0x3c4] ss:$16 sps:$4 sm:$0xff]   ;;  %v6670_v12 = vld [vmem:[#allocation4 + $0x3cc] ss:$16 sps:$4 sm:$0xff]  }
 0x1fb   :  { %2742 = vmatprep.subr.bf16.mxu0 %v6589_v14  ;;  %2824 = vmatprep.subr.bf16.mxu1 %v6592_v15  ;;  %v6665_v15 = vld [vmem:[#allocation4 + $0x3c0] ss:$16 sps:$4 sm:$0xff]  }
 0x1fe   :  { %2743 = vmatpush1.bf16.msra.mxu0 %v6587_v17  ;;  %2825 = vmatpush1.bf16.msra.mxu1 %v6590_v18  ;;  %v6668_v17 = vld [vmem:[#allocation4 + $0x3c8] ss:$16 sps:$4 sm:$0xff]  }
 0x1ff   :  { %2744 = vmatprep.subr.bf16.mxu0 %v6595_v8  ;;  %2826 = vmatprep.subr.bf16.mxu1 %v6598_v10  ;;  %v6673_v10 = vld [vmem:[#allocation4 + $0x3e4] ss:$16 sps:$4 sm:$0xff]  }
 0x202   :  { %2745 = vmatpush1.bf16.msra.mxu0 %v6593_v19  ;;  %2827 = vmatpush1.bf16.msra.mxu1 %v6596_v20  ;;  %v6676_v19 = vld [vmem:[#allocation4 + $0x3ec] ss:$16 sps:$4 sm:$0xff]  }
 0x203   :  { %2746 = vmatprep.subr.bf16.mxu0 %v6601_v21  ;;  %2828 = vmatprep.subr.bf16.mxu1 %v6604_v22 }
 0x206   :  { %2747 = vmatpush1.bf16.msra.mxu0 %v6599_v23  ;;  %2829 = vmatpush1.bf16.msra.mxu1 %v6602_v24  ;;  %v6671_v24 = vld [vmem:[#allocation4 + $0x3e0] ss:$16 sps:$4 sm:$0xff]  }
 0x207   :  { %2748 = vmatprep.subr.bf16.mxu0 %v6607_v25  ;;  %2830 = vmatprep.subr.bf16.mxu1 %v6610_v26  ;;  %v6674_v25 = vld [vmem:[#allocation4 + $0x3e8] ss:$16 sps:$4 sm:$0xff]  }
 0x20a   :  { %2749 = vmatpush1.bf16.msra.mxu0 %v6605_v16  ;;  %2831 = vmatpush1.bf16.msra.mxu1 %v6608_v27  ;;  %v6677_v16 = vld [vmem:[#allocation6 + $0x40] sm:$0xff]  }
 0x20b   :  { %2750 = vmatprep.subr.bf16.mxu0 %v6613_v28  ;;  %2832 = vmatprep.subr.bf16.mxu1 %v6616_v29  ;;  %v6678_v27 = vld [vmem:[#allocation6 + $0xc0] sm:$0xff]  }
 0x20c   :  { %v6679_v28 = vld [vmem:[#allocation6] sm:$0xff]  }
 0x20d   :  { %v6680_v29 = vld [vmem:[#allocation6 + $0x80] sm:$0xff]  }
 0x20e   :  { %2751 = vmatpush1.bf16.msra.mxu0 %v6611_v30  ;;  %2833 = vmatpush1.bf16.msra.mxu1 %v6614_v31  ;;  %v6681_v31 = vld [vmem:[#allocation6 + $0x48] sm:$0xff]  }
 0x20f   :  { %2752 = vmatprep.subr.bf16.mxu0 %v6619_v32  ;;  %2834 = vmatprep.subr.bf16.mxu1 %v6622_v33  ;;  %v6682_v32 = vld [vmem:[#allocation6 + $0xc8] sm:$0xff]  }
 0x210   :  { %v6683_v33 = vld [vmem:[#allocation6 + $0x8] sm:$0xff]  }
 0x212   :  { %2753 = vmatpush1.bf16.msra.mxu0 %v6617_v34  ;;  %2835 = vmatpush1.bf16.msra.mxu1 %v6620_v35  ;;  %v6684_v34 = vld [vmem:[#allocation6 + $0x88] sm:$0xff]   ;;  %v6685_v35 = vld [vmem:[#allocation6 + $0x50] sm:$0xff]  }
 0x213   :  { %2754 = vmatprep.subr.bf16.mxu0 %v6625_v36  ;;  %2836 = vmatprep.subr.bf16.mxu1 %v6628_v37  ;;  %v6686_v36 = vld [vmem:[#allocation6 + $0xd0] sm:$0xff]  }
 0x214   :  { %v6687_v37 = vld [vmem:[#allocation6 + $0x10] sm:$0xff]  }
 0x216   :  { %2755 = vmatpush1.bf16.msra.mxu0 %v6623_v38  ;;  %2837 = vmatpush1.bf16.msra.mxu1 %v6626_v39  ;;  %v6688_v38 = vld [vmem:[#allocation6 + $0x90] sm:$0xff]   ;;  %v6689_v39 = vld [vmem:[#allocation6 + $0x58] sm:$0xff]  }
 0x217   :  { %2756 = vmatprep.subr.bf16.mxu0 %v6631_v40  ;;  %2838 = vmatprep.subr.bf16.mxu1 %v6634_v41  ;;  %v6690_v40 = vld [vmem:[#allocation6 + $0xd8] sm:$0xff]  }
 0x218   :  { %v6691_v41 = vld [vmem:[#allocation6 + $0x18] sm:$0xff]  }
 0x21a   :  { %2757 = vmatpush1.bf16.msra.mxu0 %v6629_v42  ;;  %2839 = vmatpush1.bf16.msra.mxu1 %v6632_v43  ;;  %v6692_v42 = vld [vmem:[#allocation6 + $0x98] sm:$0xff]   ;;  %v6693_v43 = vld [vmem:[#allocation6 + $0x60] sm:$0xff]  }
 0x21b   :  { %2758 = vmatprep.subr.bf16.mxu0 %v6637_v44  ;;  %2840 = vmatprep.subr.bf16.mxu1 %v6640_v45  ;;  %v6694_v44 = vld [vmem:[#allocation6 + $0xe0] sm:$0xff]  }
 0x21c   :  { %v6695_v45 = vld [vmem:[#allocation6 + $0x20] sm:$0xff]  }
 0x21e   :  { %2759 = vmatpush1.bf16.msra.mxu0 %v6635_v46  ;;  %2841 = vmatpush1.bf16.msra.mxu1 %v6638_v47  ;;  %v6696_v46 = vld [vmem:[#allocation6 + $0xa0] sm:$0xff]   ;;  %v6697_v47 = vld [vmem:[#allocation6 + $0x68] sm:$0xff]  }
 0x21f   :  { %2760 = vmatprep.subr.bf16.mxu0 %v6643_v48  ;;  %2842 = vmatprep.subr.bf16.mxu1 %v6646_v49  ;;  %v6698_v48 = vld [vmem:[#allocation6 + $0xe8] sm:$0xff]  }
 0x220   :  { %v6699_v49 = vld [vmem:[#allocation6 + $0x28] sm:$0xff]  }
 0x222   :  { %2761 = vmatpush1.bf16.msra.mxu0 %v6641_v50  ;;  %2843 = vmatpush1.bf16.msra.mxu1 %v6644_v51  ;;  %v6700_v50 = vld [vmem:[#allocation6 + $0xa8] sm:$0xff]   ;;  %v6701_v51 = vld [vmem:[#allocation6 + $0x70] sm:$0xff]  }
 0x223   :  { %2762 = vmatprep.subr.bf16.mxu0 %v6649_v52  ;;  %2844 = vmatprep.subr.bf16.mxu1 %v6652_v53  ;;  %v6702_v52 = vld [vmem:[#allocation6 + $0xf0] sm:$0xff]  }
 0x224   :  { %v6703_v53 = vld [vmem:[#allocation6 + $0x30] sm:$0xff]  }
 0x226   :  { %2763 = vmatpush1.bf16.msra.mxu0 %v6647_v59  ;;  %2845 = vmatpush1.bf16.msra.mxu1 %v6650_v60  ;;  %v6704_v59 = vld [vmem:[#allocation6 + $0xb0] sm:$0xff]   ;;  %v6705_v60 = vld [vmem:[#allocation6 + $0x78] sm:$0xff]  }
 0x227   :  { %2764 = vmatprep.subr.bf16.mxu0 %v6655_v61  ;;  %2846 = vmatprep.subr.bf16.mxu1 %v6658_v62  ;;  %v6706_v61 = vld [vmem:[#allocation6 + $0xf8] sm:$0xff]  }
 0x228   :  { %v6707_v62 = vld [vmem:[#allocation6 + $0x38] sm:$0xff]  }
 0x22a   :  { %2765 = vmatpush1.bf16.msra.mxu0 %v6653_v63  ;;  %2847 = vmatpush1.bf16.msra.mxu1 %v6656_v1  ;;  %v6708_v63 = vld [vmem:[#allocation6 + $0xb8] sm:$0xff]   ;;  %v470_v1 = vld [vmem:[%s7562_s5] sm:$0xf] }
 0x22b   :  { %2766 = vmatprep.subr.bf16.mxu0 %v6661_v2  ;;  %2848 = vmatprep.subr.bf16.mxu1 %v6664_v3  ;;  %v2042_v2 = vrot.slane %v470_v1, %v7437_v56  ;;  %v2050_v3 = vrot.slane %v470_v1, %v7454_v4 }
 0x22e   :  { %2767 = vmatpush1.bf16.msra.mxu0 %v6659_v6  ;;  %2849 = vmatpush1.bf16.msra.mxu1 %v6662_v7  ;;  %v2046_v6 = vrot.slane %v470_v1, %v7445_v58  ;;  %v2054_v7 = vrot.slane %v470_v1, %v7457_v5 }
 0x22f   :  { %v2023_v14 = vpop.f32.mrb[4].mxu1  ;;  %2768 = vmatprep.subr.bf16.mxu0 %v6667_v11  ;;  %2850 = vmatprep.subr.bf16.mxu1 %v6670_v12 }
 0x230   :  { %v6078_v18 = vadd.f32 %v2023_v14, %v548_v9  ;;  %v2025_v8 = vpop.f32.mrb[5].mxu1 }
 0x231   :  { %v6079_v20 = vadd.f32 %v2025_v8, %v552_v13  ;;  %v2027_v21 = vpop.f32.mrb[6].mxu1 }
 0x232   :  { %v2028_v22 = vpop.f32.mrb[7].mxu1  ;;  %2769 = vmatpush1.bf16.msra.mxu0 %v6665_v15  ;;  %2851 = vmatpush1.bf16.msra.mxu1 %v6668_v17  ;;  %v2032_v57 = vmax.f32 %v6078_v18, 0.0 }
 0x233   :  { %v2033_v23 = vmax.f32 %v6079_v20, 0.0  ;;  %2770 = vmatprep.subr.bf16.mxu0 %v6673_v10  ;;  %2852 = vmatprep.subr.bf16.mxu1 %v6676_v19 }
 0x234   :  { %v2036_v30 = vpack.c.bf16 %v2032_v57, %v2032_v57 }
 0x235   :  { %v2037_v26 = vpack.c.bf16 %v2033_v23, %v2033_v23 }
 0x236   :  { %2771 = vmatpush1.bf16.msra.mxu0 %v6671_v24  ;;  %2853 = vmatpush1.bf16.msra.mxu1 %v6674_v25 }
 0x237   :  { %2772 = vmatprep.mubr.bf16.mxu0 %v2037_v26  ;;  %2854 = vmatprep.mubr.bf16.mxu1 %v2037_v26 }
 0x238   :  { %5986 = vmatprep.subr.bf16.mxu0 %v6677_v16  ;;  %6008 = vmatprep.subr.bf16.mxu1 %v6678_v27 }
 0x239   :  { %2773 = vmatmul.mubr.bf16.vlgmr.msra.gmra.mrb[4].mxu0 %v2036_v30  ;;  %2855 = vmatmul.mubr.bf16.vlgmr.msra.gmra.mrb[8].mxu1 %v2036_v30 }
 0x23a   :  { %5987 = vmatpush3.bf16.msra.mxu0 %v6679_v28  ;;  %6009 = vmatpush3.bf16.msra.mxu1 %v6680_v29  ;;  %v5695_v29 = vld [vmem:[%s7564_s7] ss:$0 sm:$0xff] }
 0x23b   :  { %5988 = vmatprep.subr.bf16.mxu0 %v6681_v31  ;;  %6010 = vmatprep.subr.bf16.mxu1 %v6682_v32 }
 0x23e   :  { %5989 = vmatpush3.bf16.msra.mxu0 %v6683_v33  ;;  %6011 = vmatpush3.bf16.msra.mxu1 %v6684_v34 }
 0x23f   :  { %5990 = vmatprep.subr.bf16.mxu0 %v6685_v35  ;;  %6012 = vmatprep.subr.bf16.mxu1 %v6686_v36 }
 0x242   :  { %5991 = vmatpush3.bf16.msra.mxu0 %v6687_v37  ;;  %6013 = vmatpush3.bf16.msra.mxu1 %v6688_v38 }
 0x243   :  { %5992 = vmatprep.subr.bf16.mxu0 %v6689_v39  ;;  %6014 = vmatprep.subr.bf16.mxu1 %v6690_v40 }
 0x246   :  { %5993 = vmatpush3.bf16.msra.mxu0 %v6691_v41  ;;  %6015 = vmatpush3.bf16.msra.mxu1 %v6692_v42  ;;  %v6711_v42 = vld [vmem:[#allocation7 + $0x4] ss:$16 sps:$4 sm:$0xff]  }
 0x247   :  { %5994 = vmatprep.subr.bf16.mxu0 %v6693_v43  ;;  %6016 = vmatprep.subr.bf16.mxu1 %v6694_v44  ;;  %v6712_v43 = vld [vmem:[#allocation7 + $0x8] ss:$16 sps:$4 sm:$0xff]   ;;  %v6714_v44 = vld [vmem:[#allocation7 + $0xc] ss:$16 sps:$4 sm:$0xff]  }
 0x24a   :  { %5995 = vmatpush3.bf16.msra.mxu0 %v6695_v45  ;;  %6017 = vmatpush3.bf16.msra.mxu1 %v6696_v46  ;;  %v6717_v45 = vld [vmem:[#allocation7 + $0x24] ss:$16 sps:$4 sm:$0xff]   ;;  %v6720_v46 = vld [vmem:[#allocation7 + $0x2c] ss:$16 sps:$4 sm:$0xff]  }
 0x24b   :  { %5996 = vmatprep.subr.bf16.mxu0 %v6697_v47  ;;  %6018 = vmatprep.subr.bf16.mxu1 %v6698_v48  ;;  %v6715_v47 = vld [vmem:[#allocation7 + $0x20] ss:$16 sps:$4 sm:$0xff]   ;;  %v6718_v48 = vld [vmem:[#allocation7 + $0x28] ss:$16 sps:$4 sm:$0xff]  }
 0x24e   :  { %5997 = vmatpush3.bf16.msra.mxu0 %v6699_v49  ;;  %6019 = vmatpush3.bf16.msra.mxu1 %v6700_v50  ;;  %v6723_v49 = vld [vmem:[#allocation7 + $0x44] ss:$16 sps:$4 sm:$0xff]   ;;  %v6726_v50 = vld [vmem:[#allocation7 + $0x4c] ss:$16 sps:$4 sm:$0xff]  }
 0x24f   :  { %5998 = vmatprep.subr.bf16.mxu0 %v6701_v51  ;;  %6020 = vmatprep.subr.bf16.mxu1 %v6702_v52  ;;  %v6721_v51 = vld [vmem:[#allocation7 + $0x40] ss:$16 sps:$4 sm:$0xff]   ;;  %v6724_v52 = vld [vmem:[#allocation7 + $0x48] ss:$16 sps:$4 sm:$0xff]  }
 0x252   :  { %5999 = vmatpush3.bf16.msra.mxu0 %v6703_v53  ;;  %6021 = vmatpush3.bf16.msra.mxu1 %v6704_v59  ;;  %v6729_v53 = vld [vmem:[#allocation7 + $0x64] ss:$16 sps:$4 sm:$0xff]   ;;  %v6732_v59 = vld [vmem:[#allocation7 + $0x6c] ss:$16 sps:$4 sm:$0xff]  }
 0x253   :  { %6000 = vmatprep.subr.bf16.mxu0 %v6705_v60  ;;  %6022 = vmatprep.subr.bf16.mxu1 %v6706_v61 }
 0x256   :  { %6001 = vmatpush3.bf16.msra.mxu0 %v6707_v62  ;;  %6023 = vmatpush3.bf16.msra.mxu1 %v6708_v63  ;;  %v6727_v62 = vld [vmem:[#allocation7 + $0x60] ss:$16 sps:$4 sm:$0xff]   ;;  %v6730_v63 = vld [vmem:[#allocation7 + $0x68] ss:$16 sps:$4 sm:$0xff]  }
 0x257   :  { %3710 = vmatprep.subr.bf16.mxu0 %v6711_v42  ;;  %3751 = vmatprep.subr.bf16.mxu1 %v6714_v44  ;;  %v3166_v44 = vld [vmem:[%s7558_s1] sm:$0xff] }
 0x30c   :  { %v2774_v9 = vpop.f32.mrb[4].mxu0  ;;  %v2856_v11 = vpop.f32.mrb[8].mxu1 }
 0x30d   :  { %v6080_v12 = vadd.f32 %v2774_v9, %v2042_v2  ;;  %v6082_v13 = vadd.f32 %v2856_v11, %v2050_v3  ;;  %v2776_v14 = vpop.f32.mrb[5].mxu0  ;;  %v2858_v15 = vpop.f32.mrb[9].mxu1 }
 0x30e   :  { %v6081_v17 = vadd.f32 %v2776_v14, %v2046_v6  ;;  %v6083_v18 = vadd.f32 %v2858_v15, %v2054_v7  ;;  %v2778_v8 = vpop.f32.mrb[6].mxu0  ;;  %v2860_v10 = vpop.f32.mrb[10].mxu1 }
 0x30f   :  { %v2863_v19 = vmax.f32 %v6080_v12, 0.0  ;;  %v2865_v20 = vmax.f32 %v6082_v13, 0.0  ;;  %v2779_v21 = vpop.f32.mrb[7].mxu0  ;;  %v2861_v22 = vpop.f32.mrb[11].mxu1 }
 0x310   :  { %v2864_v23 = vmax.f32 %v6081_v17, 0.0  ;;  %v2866_v24 = vmax.f32 %v6083_v18, 0.0 }
 0x311   :  { %v2867_v26 = vpack.c.bf16 %v2863_v19, %v2863_v19  ;;  %v2869_v16 = vpack.c.bf16 %v2865_v20, %v2865_v20 }
 0x312   :  { %v2868_v25 = vpack.c.bf16 %v2864_v23, %v2864_v23  ;;  %v2870_v57 = vpack.c.bf16 %v2866_v24, %v2866_v24 }
 0x314   :  { %3101 = vmatprep.mubr.bf16.mxu0 %v2868_v25  ;;  %3141 = vmatprep.mubr.bf16.mxu1 %v2870_v57 }
 0x315   :  { %3102 = vmatmul.mubr.bf16.vlgmr.msra.gmra.mrb[8].mxu0 %v2867_v26  ;;  %3142 = vmatmul.mubr.bf16.vlgmr.msra.gmra.mrb[12].mxu1 %v2869_v16 }
 0x316   :  { %3742 = vmatprep.mubr.bf16.mxu0 %v7225_v0  ;;  %3783 = vmatprep.mubr.bf16.mxu1 %v7225_v0  ;;  %v6709_v0 = vld [vmem:[#allocation7] ss:$16 sps:$4 sm:$0xff]  }
 0x317   :  { %3711 = vmatpush1.bf16.msra.mxu0 %v6709_v0  ;;  %3752 = vmatpush1.bf16.msra.mxu1 %v6712_v43 }
 0x318   :  { %3712 = vmatprep.subr.bf16.mxu0 %v6717_v45  ;;  %3753 = vmatprep.subr.bf16.mxu1 %v6720_v46 }
 0x31b   :  { %3713 = vmatpush1.bf16.msra.mxu0 %v6715_v47  ;;  %3754 = vmatpush1.bf16.msra.mxu1 %v6718_v48 }
 0x31c   :  { %3714 = vmatprep.subr.bf16.mxu0 %v6723_v49  ;;  %3755 = vmatprep.subr.bf16.mxu1 %v6726_v50 }
 0x31f   :  { %3715 = vmatpush1.bf16.msra.mxu0 %v6721_v51  ;;  %3756 = vmatpush1.bf16.msra.mxu1 %v6724_v52 }
 0x320   :  { %3716 = vmatprep.subr.bf16.mxu0 %v6729_v53  ;;  %3757 = vmatprep.subr.bf16.mxu1 %v6732_v59 }
 0x323   :  { %3717 = vmatpush1.bf16.msra.mxu0 %v6727_v62  ;;  %3758 = vmatpush1.bf16.msra.mxu1 %v6730_v63 }
 0x3e8   :  { %v6002_v27 = vpop.f32.mrb[8].mxu0  ;;  %v6024_v28 = vpop.f32.mrb[12].mxu1 }
 0x3e9   :  { %v6003_v30 = vpop.f32.mrb[9].mxu0  ;;  %v6025_v31 = vpop.f32.mrb[13].mxu1 }
 0x3ea   :  { %v6004_v32 = vadd.f32 %v6003_v30, %v6002_v27  ;;  %v6026_v33 = vadd.f32 %v6025_v31, %v6024_v28  ;;  %v6005_v34 = vpop.f32.mrb[10].mxu0  ;;  %v6027_v35 = vpop.f32.mrb[14].mxu1 }
 0x3eb   :  { %v6006_v36 = vpop.f32.mrb[11].mxu0  ;;  %v6028_v37 = vpop.f32.mrb[15].mxu1 }
 0x3ec   :  { %v3104_v38 = vadd.f32 %v6004_v32, %v5695_v29 }
 0x3ee   :  { %v3144_v39 = vadd.f32 %v6026_v33, %v3104_v38 }
 0x3f0   :  { %v3149_v40 = vmin.f32 %v3144_v39, 20.0  ;;  %vm3162_vm1 = vcmp.gt.f32.partialorder %v3144_v39, 20.0 }
 0x3f2   :  { %v3150_v41 = vmul.f32 1.442695, %v3149_v40 }
 0x3f4   :  { %7077 = vpow2.f32 %v3150_v41 }
 0x3fe   :  { %v7078_v60 = vpop.eup %7077 }
 0x3ff   :  { %v3152_v61 = vadd.f32 1.0, %v7078_v60 }
 0x401   :  { %v5728_v1 = vadd.f32 -1.0, %v3152_v61  ;;  %7079 = vlog2.f32 %v3152_v61 }
 0x403   :  { %vm3154_vm0 = vcmp.eq.f32.partialorder %v5728_v1, 0.0 }
 0x404   :  { %v3155_v2 = vsel %vm3154_vm0, 1.0, %v5728_v1 }
 0x405   :  { %7081 = vrcp.f32 %v3155_v2 }
 0x40b   :  { %v7080_v3 = vpop.eup %7079 }
 0x40c   :  { %v3157_v7 = vmul.f32 0.6931472, %v7080_v3 }
 0x40f   :  { %v7082_v6 = vpop.eup %7081 }
 0x410   :  { %v3159_v9 = vmul.f32 %v7082_v6, %v7078_v60 }
 0x412   :  { %v3160_v11 = vmul.f32 %v3159_v9, %v3157_v7  ;;  %v3222_v7 = vand.u32 127, %v537_v54  ;;  %v6739_v54 = vld [vmem:[#allocation7 + $0xa0] ss:$16 sps:$4 sm:$0xff]  }
 0x414   :  { %v3161_v12 = vsel %vm3154_vm0, %v7078_v60, %v3160_v11  ;;  %vm3224_vm3 = vcmp.lt.s32.totalorder %v3222_v7, 50  ;;  %v6799_v7 = vld [vmem:[#allocation9 + $0x188] ss:$28 sps:$4 sm:$0xff]  }
 0x415   :  { %v3163_v13 = vsel %vm3162_vm1, %v3144_v39, %v3161_v12  ;;  %vm3225_vm4 = vmand %vm3223_vm2, %vm3224_vm3 }
 0x416   :  { %v3164_v14 = vmax.f32 %v3163_v13, 1e-30 }
 0x418   :  { %3165 = vst [vmem:[%s7571_s14] sm:$0xff] %v3164_v14  ;;  %v3169_v15 = vadd.f32 1.0, %v3164_v14 }
 0x41a   :  { %v5729_v17 = vadd.f32 -1.0, %v3169_v15 }
 0x41c   :  { %v3171_v18 = vadd.f32 60.458332, %v5729_v17  ;;  %v3186_v8 = vadd.f32 36.0, %v5729_v17  ;;  %v3203_v35 = vadd.f32 7.0, %v5729_v17  ;;  %v3205_v50 = vadd.f32 0.5, %v5729_v17 }
 0x41e   :  { %v3172_v10 = vmul.f32 %v5729_v17, %v3171_v18  ;;  %v3187_v19 = vmul.f32 %v5729_v17, %v3186_v8  ;;  %v3204_v39 = vadd.f32 0.5, %v3203_v35  ;;  %v6735_v8 = vld [vmem:[#allocation7 + $0x84] ss:$16 sps:$4 sm:$0xff]   ;;  %v6757_v35 = vld [vmem:[#allocation9] ss:$28 sps:$4 sm:$0xff]  }
 0x41f   :  { %3718 = vmatprep.subr.bf16.mxu0 %v6735_v8  ;;  %v6814_v8 = vld [vmem:[#allocation9 + $0x200] ss:$28 sps:$4 sm:$0xff]  }
 0x420   :  { %v3173_v20 = vadd.f32 1599.0425, %v3172_v10  ;;  %v3188_v21 = vadd.f32 546.0, %v3187_v19  ;;  %7083 = vlog2.f32 %v3204_v39  ;;  %v6738_v10 = vld [vmem:[#allocation7 + $0x8c] ss:$16 sps:$4 sm:$0xff]  }
 0x421   :  { %v6733_v19 = vld [vmem:[#allocation7 + $0x80] ss:$16 sps:$4 sm:$0xff]   ;;  %3759 = vmatprep.subr.bf16.mxu1 %v6738_v10 }
 0x422   :  { %v3174_v22 = vmul.f32 %v5729_v17, %v3173_v20  ;;  %v3189_v23 = vmul.f32 %v5729_v17, %v3188_v21  ;;  %v6736_v20 = vld [vmem:[#allocation7 + $0x88] ss:$16 sps:$4 sm:$0xff]   ;;  %3719 = vmatpush1.bf16.msra.mxu0 %v6733_v19  ;;  %v6741_v21 = vld [vmem:[#allocation7 + $0xa4] ss:$16 sps:$4 sm:$0xff]  }
 0x423   :  { %3760 = vmatpush1.bf16.msra.mxu1 %v6736_v20  ;;  %3720 = vmatprep.subr.bf16.mxu0 %v6741_v21  ;;  %v6819_v10 = vld [vmem:[#allocation9 + $0x234] ss:$28 sps:$4 sm:$0xff]   ;;  %v6822_v19 = vld [vmem:[#allocation9 + $0x23c] ss:$28 sps:$4 sm:$0xff]   ;;  %v6825_v21 = vld [vmem:[#allocation9 + $0x26c] ss:$28 sps:$4 sm:$0xff]  }
 0x424   :  { %v3175_v24 = vadd.f32 24165.51, %v3174_v22  ;;  %v3190_v25 = vadd.f32 4536.0, %v3189_v23  ;;  %v6742_v22 = vld [vmem:[#allocation7 + $0xa8] ss:$16 sps:$4 sm:$0xff]  }
 0x425   :  { %v6744_v23 = vld [vmem:[#allocation7 + $0xac] ss:$16 sps:$4 sm:$0xff]  }
 0x426   :  { %v3176_v57 = vmul.f32 %v5729_v17, %v3175_v24  ;;  %v3191_v26 = vmul.f32 %v5729_v17, %v3190_v25  ;;  %v6747_v24 = vld [vmem:[#allocation7 + $0xc4] ss:$16 sps:$4 sm:$0xff]   ;;  %v6750_v25 = vld [vmem:[#allocation7 + $0xcc] ss:$16 sps:$4 sm:$0xff]   ;;  %3761 = vmatprep.subr.bf16.mxu1 %v6744_v23  ;;  %3721 = vmatpush1.bf16.msra.mxu0 %v6739_v54 }
 0x427   :  { %3762 = vmatpush1.bf16.msra.mxu1 %v6742_v22  ;;  %3722 = vmatprep.subr.bf16.mxu0 %v6747_v24  ;;  %v6817_v20 = vld [vmem:[#allocation9 + $0x230] ss:$28 sps:$4 sm:$0xff]   ;;  %v6820_v54 = vld [vmem:[#allocation9 + $0x238] ss:$28 sps:$4 sm:$0xff]   ;;  %v6823_v23 = vld [vmem:[#allocation9 + $0x268] ss:$28 sps:$4 sm:$0xff]  }
 0x428   :  { %v3177_v16 = vadd.f32 228235.22, %v3176_v57  ;;  %v3192_v27 = vadd.f32 22449.0, %v3191_v26  ;;  %v6745_v57 = vld [vmem:[#allocation7 + $0xc0] ss:$16 sps:$4 sm:$0xff]   ;;  %3763 = vmatprep.subr.bf16.mxu1 %v6750_v25 }
 0x429   :  { %v6748_v26 = vld [vmem:[#allocation7 + $0xc8] ss:$16 sps:$4 sm:$0xff]   ;;  %v6828_v22 = vld [vmem:[#allocation9 + $0x274] ss:$28 sps:$4 sm:$0xff]   ;;  %v6831_v25 = vld [vmem:[#allocation9 + $0x2a4] ss:$28 sps:$4 sm:$0xff]  }
 0x42a   :  { %v3178_v28 = vmul.f32 %v5729_v17, %v3177_v16  ;;  %v3193_v29 = vmul.f32 %v5729_v17, %v3192_v27  ;;  %v7084_v45 = vpop.eup %7083  ;;  %v6753_v16 = vld [vmem:[#allocation7 + $0xe4] ss:$16 sps:$4 sm:$0xff]   ;;  %v6756_v27 = vld [vmem:[#allocation7 + $0xec] ss:$16 sps:$4 sm:$0xff]   ;;  %3723 = vmatpush1.bf16.msra.mxu0 %v6745_v57 }
 0x42b   :  { %v3207_v49 = vmul.f32 0.6931472, %v7084_v45  ;;  %3764 = vmatpush1.bf16.msra.mxu1 %v6748_v26  ;;  %3724 = vmatprep.subr.bf16.mxu0 %v6753_v16  ;;  %v6777_v45 = vld [vmem:[#allocation9 + $0xac] ss:$28 sps:$4 sm:$0xff]   ;;  %v6829_v26 = vld [vmem:[#allocation9 + $0x2a0] ss:$28 sps:$4 sm:$0xff]  }
 0x42c   :  { %v3179_v30 = vadd.f32 1379496.3, %v3178_v28  ;;  %v3194_v31 = vadd.f32 67284.0, %v3193_v29  ;;  %v6751_v28 = vld [vmem:[#allocation7 + $0xe0] ss:$16 sps:$4 sm:$0xff]   ;;  %3765 = vmatprep.subr.bf16.mxu1 %v6756_v27 }
 0x42d   :  { %v3208_v51 = vmul.f32 %v3207_v49, %v3205_v50  ;;  %v6754_v29 = vld [vmem:[#allocation7 + $0xe8] ss:$16 sps:$4 sm:$0xff]   ;;  %v6783_v49 = vld [vmem:[#allocation9 + $0xe4] ss:$28 sps:$4 sm:$0xff]   ;;  %v6826_v24 = vld [vmem:[#allocation9 + $0x270] ss:$28 sps:$4 sm:$0xff]  }
 0x42e   :  { %v3195_v32 = vmul.f32 %v5729_v17, %v3194_v31  ;;  %v3180_v33 = vmul.f32 %v5729_v17, %v3179_v30  ;;  %3725 = vmatpush1.bf16.msra.mxu0 %v6751_v28  ;;  %v6759_v30 = vld [vmem:[#allocation9 + $0x4] ss:$28 sps:$4 sm:$0xff]   ;;  %v6762_v31 = vld [vmem:[#allocation9 + $0xc] ss:$28 sps:$4 sm:$0xff]   ;;  %v6837_v27 = vld [vmem:[#allocation9 + $0x2dc] ss:$28 sps:$4 sm:$0xff]  }
 0x42f   :  { %v3209_v52 = vadd.f32 0.9189385, %v3208_v51  ;;  %3766 = vmatpush1.bf16.msra.mxu1 %v6754_v29  ;;  %4988 = vmatprep.subr.bf16.mxu0 %v6759_v30  ;;  %v6786_v50 = vld [vmem:[#allocation9 + $0xec] ss:$28 sps:$4 sm:$0xff]   ;;  %v6781_v51 = vld [vmem:[#allocation9 + $0xe0] ss:$28 sps:$4 sm:$0xff]  }
 0x430   :  { %v3196_v34 = vadd.f32 118124.0, %v3195_v32  ;;  %v3181_v37 = vadd.f32 5210869.0, %v3180_v33  ;;  %5070 = vmatprep.subr.bf16.mxu1 %v6762_v31  ;;  %v6834_v57 = vld [vmem:[#allocation9 + $0x2ac] ss:$28 sps:$4 sm:$0xff]  }
 0x431   :  { %v3210_v61 = vsub.f32 %v3209_v52, %v3204_v39  ;;  %v6768_v39 = vld [vmem:[#allocation9 + $0x44] ss:$28 sps:$4 sm:$0xff]   ;;  %v6835_v29 = vld [vmem:[#allocation9 + $0x2d8] ss:$28 sps:$4 sm:$0xff]  }
 0x432   :  { %v3197_v36 = vmul.f32 %v5729_v17, %v3196_v34  ;;  %v3182_v41 = vmul.f32 %v5729_v17, %v3181_v37  ;;  %v6784_v52 = vld [vmem:[#allocation9 + $0xe8] ss:$28 sps:$4 sm:$0xff]   ;;  %v6838_v30 = vld [vmem:[#allocation9 + $0x2e0] ss:$28 sps:$4 sm:$0xff]   ;;  %v6843_v31 = vld [vmem:[#allocation9 + $0x314] ss:$28 sps:$4 sm:$0xff]  }
 0x433   :  { %v6832_v16 = vld [vmem:[#allocation9 + $0x2a8] ss:$28 sps:$4 sm:$0xff]  }
 0x434   :  { %v3198_v38 = vadd.f32 109584.0, %v3197_v36  ;;  %v3183_v42 = vadd.f32 11246929.0, %v3182_v41  ;;  %v6760_v36 = vld [vmem:[#allocation9 + $0x8] ss:$28 sps:$4 sm:$0xff]  }
 0x435   :  { %v6766_v41 = vld [vmem:[#allocation9 + $0x40] ss:$28 sps:$4 sm:$0xff]  }
 0x436   :  { %v3199_v40 = vmul.f32 %v5729_v17, %v3198_v38  ;;  %v3184_v43 = vmul.f32 %v5729_v17, %v3183_v42  ;;  %v6765_v38 = vld [vmem:[#allocation9 + $0x3c] ss:$28 sps:$4 sm:$0xff]   ;;  %v6840_v28 = vld [vmem:[#allocation9 + $0x2e4] ss:$28 sps:$4 sm:$0xff]  }
 0x437   :  { %v6774_v42 = vld [vmem:[#allocation9 + $0x7c] ss:$28 sps:$4 sm:$0xff]  }
 0x438   :  { %v3200_v0 = vadd.f32 40320.0, %v3199_v40  ;;  %v3185_v46 = vadd.f32 10619610.0, %v3184_v43  ;;  %v6763_v40 = vld [vmem:[#allocation9 + $0x38] ss:$28 sps:$4 sm:$0xff]  }
 0x439   :  { %v6769_v43 = vld [vmem:[#allocation9 + $0x70] ss:$28 sps:$4 sm:$0xff]  }
 0x43a   :  { %7085 = vrcp.f32 %v3200_v0  ;;  %v6771_v0 = vld [vmem:[#allocation9 + $0x74] ss:$28 sps:$4 sm:$0xff]  }
 0x43b   :  { %7087 = vlog2.f32 %v3166_v44  ;;  %v6772_v44 = vld [vmem:[#allocation9 + $0x78] ss:$28 sps:$4 sm:$0xff]  }
 0x444   :  { %v7086_v47 = vpop.eup %7085 }
 0x445   :  { %v3202_v48 = vmul.f32 %v7086_v47, %v3185_v46  ;;  %v7088_v53 = vpop.eup %7087  ;;  %v6780_v46 = vld [vmem:[#allocation9 + $0xb4] ss:$28 sps:$4 sm:$0xff]   ;;  %v6775_v47 = vld [vmem:[#allocation9 + $0xa8] ss:$28 sps:$4 sm:$0xff]  }
 0x446   :  { %v3168_v60 = vmul.f32 0.6931472, %v7088_v53  ;;  %v6789_v53 = vld [vmem:[#allocation9 + $0x11c] ss:$28 sps:$4 sm:$0xff]  }
 0x447   :  { %7089 = vlog2.f32 %v3202_v48  ;;  %v6778_v48 = vld [vmem:[#allocation9 + $0xb0] ss:$28 sps:$4 sm:$0xff]  }
 0x448   :  { %7091 = vrcp.f32 %v3164_v14 }
 0x451   :  { %v7090_v59 = vpop.eup %7089 }
 0x452   :  { %v3212_v62 = vmul.f32 0.6931472, %v7090_v59  ;;  %v7092_v2 = vpop.eup %7091  ;;  %v6792_v59 = vld [vmem:[#allocation9 + $0x124] ss:$28 sps:$4 sm:$0xff]  }
 0x454   :  { %v3213_v63 = vadd.f32 %v3212_v62, %v3210_v61  ;;  %v6790_v61 = vld [vmem:[#allocation9 + $0x120] ss:$28 sps:$4 sm:$0xff]   ;;  %v6795_v62 = vld [vmem:[#allocation9 + $0x154] ss:$28 sps:$4 sm:$0xff]  }
 0x456   :  { %v3214_v1 = vadd.f32 %v3213_v63, %v3168_v60  ;;  %v6787_v60 = vld [vmem:[#allocation9 + $0x118] ss:$28 sps:$4 sm:$0xff]  }
 0x457   :  { %v6798_v63 = vld [vmem:[#allocation9 + $0x15c] ss:$28 sps:$4 sm:$0xff]  }
 0x458   :  { %v3216_v3 = vmul.f32 %v7092_v2, %v3214_v1  ;;  %v6793_v1 = vld [vmem:[#allocation9 + $0x150] ss:$28 sps:$4 sm:$0xff]   ;;  %v6796_v2 = vld [vmem:[#allocation9 + $0x158] ss:$28 sps:$4 sm:$0xff]  }
 0x45a   :  { %v3217_v6 = vmul.f32 1.442695, %v3216_v3  ;;  %v6801_v3 = vld [vmem:[#allocation9 + $0x18c] ss:$28 sps:$4 sm:$0xff]  }
 0x45c   :  { %7093 = vpow2.f32 %v3217_v6  ;;  %v6804_v6 = vld [vmem:[#allocation9 + $0x194] ss:$28 sps:$4 sm:$0xff]  }
 0x466   :  { %v7094_v9 = vpop.eup %7093 }
 0x467   :  { %v3226_v11 = vsel %vm3225_vm4, %v7094_v9, 0.0  ;;  %v6802_v9 = vld [vmem:[#allocation9 + $0x190] ss:$28 sps:$4 sm:$0xff]  }
 0x468   :  { %v3227_v12 = vrot.slane %v3226_v11, 4 }
 0x46a   :  { %v3228_v13 = vadd.f32 %v3227_v12, %v3226_v11  ;;  %v6810_v12 = vld [vmem:[#allocation9 + $0x1cc] ss:$28 sps:$4 sm:$0xff]  }
 0x46c   :  { %v3229_v14 = vrot.slane %v3228_v13, 2 }
 0x46e   :  { %v3230_v15 = vadd.f32 %v3229_v14, %v3228_v13  ;;  %v6805_v13 = vld [vmem:[#allocation9 + $0x1c0] ss:$28 sps:$4 sm:$0xff]   ;;  %v6808_v14 = vld [vmem:[#allocation9 + $0x1c8] ss:$28 sps:$4 sm:$0xff]  }
 0x470   :  { %v3231_v17 = vrot.slane %v3230_v15, 1 }
 0x472   :  { %v3232_v18 = vadd.f32 %v3231_v17, %v3230_v15  ;;  %v6813_v15 = vld [vmem:[#allocation9 + $0x1fc] ss:$28 sps:$4 sm:$0xff]   ;;  %v6816_v17 = vld [vmem:[#allocation9 + $0x204] ss:$28 sps:$4 sm:$0xff]  }
 0x474   :  { %3233 = vadd.xlane.f32.xlu0 %v3232_v18  ;;  %v6811_v18 = vld [vmem:[#allocation9 + $0x1f8] ss:$28 sps:$4 sm:$0xff]  }
 0x501   :  { %v3234_v32 = vpop.xlane.xlu0 %3233 }
 0x502   :  { %7095 = vrcp.f32 %v3234_v32  ;;  %v6846_v32 = vld [vmem:[#allocation9 + $0x31c] ss:$28 sps:$4 sm:$0xff]  }
 0x50c   :  { %v7096_v33 = vpop.eup %7095 }
 0x50d   :  { %v3236_v34 = vmul.f32 %v7096_v33, %v3226_v11  ;;  %v6807_v11 = vld [vmem:[#allocation9 + $0x1c4] ss:$28 sps:$4 sm:$0xff]   ;;  %v6841_v33 = vld [vmem:[#allocation9 + $0x310] ss:$28 sps:$4 sm:$0xff]  }
 0x50f   :  { %3237 = vst [vmem:[%s7570_s13] sm:$0xff] %v3236_v34  ;;  %v3528_v37 = vpack.c.bf16 %v3236_v34, %v3236_v34  ;;  %v6844_v34 = vld [vmem:[#allocation9 + $0x318] ss:$28 sps:$4 sm:$0xff]  }
 0x511   :  { %3743 = vmatmul.mubr.bf16.vlgmr.msra.gmra.mrb[12].mxu0 %v3528_v37  ;;  %3784 = vmatmul.mubr.bf16.vlgmr.msra.gmra.mrb[16].mxu1 %v3528_v37  ;;  %v6847_v37 = vld [vmem:[#allocation9 + $0x348] ss:$28 sps:$4 sm:$0xff]  }
 0x512   :  { %4989 = vmatpush1.bf16.msra.mxu0 %v6757_v35  ;;  %5071 = vmatpush1.bf16.msra.mxu1 %v6760_v36  ;;  %v6849_v35 = vld [vmem:[#allocation9 + $0x34c] ss:$28 sps:$4 sm:$0xff]   ;;  %v6852_v36 = vld [vmem:[#allocation9 + $0x354] ss:$28 sps:$4 sm:$0xff]  }
 0x513   :  { %4990 = vmatprep.subr.bf16.mxu0 %v6765_v38  ;;  %5072 = vmatprep.subr.bf16.mxu1 %v6768_v39  ;;  %v6850_v38 = vld [vmem:[#allocation9 + $0x350] ss:$28 sps:$4 sm:$0xff]   ;;  %v6855_v39 = vld [vmem:[#allocation9 + $0x384] ss:$28 sps:$4 sm:$0xff]  }
 0x516   :  { %4991 = vmatpush1.bf16.msra.mxu0 %v6763_v40  ;;  %5073 = vmatpush1.bf16.msra.mxu1 %v6766_v41  ;;  %v6858_v40 = vld [vmem:[#allocation9 + $0x38c] ss:$28 sps:$4 sm:$0xff]   ;;  %v7489_v41 = vld [vmem:[%s7566_s9] sm:$0xf] }
 0x517   :  { %4992 = vmatprep.subr.bf16.mxu0 %v6771_v0  ;;  %5074 = vmatprep.subr.bf16.mxu1 %v6774_v42  ;;  %v3533_v0 = vrot.slane %v7489_v41, %v7437_v56  ;;  %v3537_v42 = vrot.slane %v7489_v41, %v7445_v58 }
 0x51a   :  { %4993 = vmatpush1.bf16.msra.mxu0 %v6769_v43  ;;  %5075 = vmatpush1.bf16.msra.mxu1 %v6772_v44  ;;  %v3545_v43 = vrot.slane %v7489_v41, %v7457_v5 }
 0x51b   :  { %4994 = vmatprep.subr.bf16.mxu0 %v6777_v45  ;;  %5076 = vmatprep.subr.bf16.mxu1 %v6780_v46 }
 0x51e   :  { %4995 = vmatpush1.bf16.msra.mxu0 %v6775_v47  ;;  %5077 = vmatpush1.bf16.msra.mxu1 %v6778_v48 }
 0x51f   :  { %4996 = vmatprep.subr.bf16.mxu0 %v6783_v49  ;;  %5078 = vmatprep.subr.bf16.mxu1 %v6786_v50 }
 0x522   :  { %4997 = vmatpush1.bf16.msra.mxu0 %v6781_v51  ;;  %5079 = vmatpush1.bf16.msra.mxu1 %v6784_v52 }
 0x523   :  { %4998 = vmatprep.subr.bf16.mxu0 %v6789_v53  ;;  %5080 = vmatprep.subr.bf16.mxu1 %v6792_v59 }
 0x526   :  { %4999 = vmatpush1.bf16.msra.mxu0 %v6787_v60  ;;  %5081 = vmatpush1.bf16.msra.mxu1 %v6790_v61 }
 0x527   :  { %5000 = vmatprep.subr.bf16.mxu0 %v6795_v62  ;;  %5082 = vmatprep.subr.bf16.mxu1 %v6798_v63 }
 0x52a   :  { %5001 = vmatpush1.bf16.msra.mxu0 %v6793_v1  ;;  %5083 = vmatpush1.bf16.msra.mxu1 %v6796_v2  ;;  %v6853_v1 = vld [vmem:[#allocation9 + $0x380] ss:$28 sps:$4 sm:$0xff]   ;;  %v6856_v2 = vld [vmem:[#allocation9 + $0x388] ss:$28 sps:$4 sm:$0xff]  }
 0x52b   :  { %5002 = vmatprep.subr.bf16.mxu0 %v6801_v3  ;;  %5084 = vmatprep.subr.bf16.mxu1 %v6804_v6  ;;  %v6861_v6 = vld [vmem:[#allocation9 + $0x3bc] ss:$28 sps:$4 sm:$0xff]  }
 0x52e   :  { %5003 = vmatpush1.bf16.msra.mxu0 %v6799_v7  ;;  %5085 = vmatpush1.bf16.msra.mxu1 %v6802_v9  ;;  %v6864_v7 = vld [vmem:[#allocation9 + $0x3c4] ss:$28 sps:$4 sm:$0xff]  }
 0x52f   :  { %5004 = vmatprep.subr.bf16.mxu0 %v6807_v11  ;;  %5086 = vmatprep.subr.bf16.mxu1 %v6810_v12  ;;  %v6859_v11 = vld [vmem:[#allocation9 + $0x3b8] ss:$28 sps:$4 sm:$0xff]   ;;  %v6862_v12 = vld [vmem:[#allocation9 + $0x3c0] ss:$28 sps:$4 sm:$0xff]  }
 0x532   :  { %5005 = vmatpush1.bf16.msra.mxu0 %v6805_v13  ;;  %5087 = vmatpush1.bf16.msra.mxu1 %v6808_v14  ;;  %v6867_v13 = vld [vmem:[#allocation9 + $0x3f4] ss:$28 sps:$4 sm:$0xff]   ;;  %v6870_v14 = vld [vmem:[#allocation9 + $0x3fc] ss:$28 sps:$4 sm:$0xff]  }
 0x533   :  { %5006 = vmatprep.subr.bf16.mxu0 %v6813_v15  ;;  %5088 = vmatprep.subr.bf16.mxu1 %v6816_v17  ;;  %v6865_v15 = vld [vmem:[#allocation9 + $0x3f0] ss:$28 sps:$4 sm:$0xff]   ;;  %v6868_v17 = vld [vmem:[#allocation9 + $0x3f8] ss:$28 sps:$4 sm:$0xff]  }
 0x536   :  { %5007 = vmatpush1.bf16.msra.mxu0 %v6811_v18  ;;  %5089 = vmatpush1.bf16.msra.mxu1 %v6814_v8  ;;  %v6873_v18 = vld [vmem:[#allocation9 + $0x42c] ss:$28 sps:$4 sm:$0xff]   ;;  %v6876_v8 = vld [vmem:[#allocation9 + $0x434] ss:$28 sps:$4 sm:$0xff]  }
 0x537   :  { %5008 = vmatprep.subr.bf16.mxu0 %v6819_v10  ;;  %5090 = vmatprep.subr.bf16.mxu1 %v6822_v19  ;;  %v6871_v10 = vld [vmem:[#allocation9 + $0x428] ss:$28 sps:$4 sm:$0xff]   ;;  %v6874_v19 = vld [vmem:[#allocation9 + $0x430] ss:$28 sps:$4 sm:$0xff]  }
 0x53a   :  { %5009 = vmatpush1.bf16.msra.mxu0 %v6817_v20  ;;  %5091 = vmatpush1.bf16.msra.mxu1 %v6820_v54  ;;  %v6879_v20 = vld [vmem:[#allocation9 + $0x464] ss:$28 sps:$4 sm:$0xff]   ;;  %v6882_v54 = vld [vmem:[#allocation9 + $0x46c] ss:$28 sps:$4 sm:$0xff]  }
 0x53b   :  { %5010 = vmatprep.subr.bf16.mxu0 %v6825_v21  ;;  %5092 = vmatprep.subr.bf16.mxu1 %v6828_v22  ;;  %v6877_v21 = vld [vmem:[#allocation9 + $0x460] ss:$28 sps:$4 sm:$0xff]   ;;  %v6880_v22 = vld [vmem:[#allocation9 + $0x468] ss:$28 sps:$4 sm:$0xff]  }
 0x53e   :  { %5011 = vmatpush1.bf16.msra.mxu0 %v6823_v23  ;;  %5093 = vmatpush1.bf16.msra.mxu1 %v6826_v24  ;;  %v6885_v23 = vld [vmem:[#allocation9 + $0x49c] ss:$28 sps:$4 sm:$0xff]   ;;  %v6888_v24 = vld [vmem:[#allocation9 + $0x4a4] ss:$28 sps:$4 sm:$0xff]  }
 0x53f   :  { %5012 = vmatprep.subr.bf16.mxu0 %v6831_v25  ;;  %5094 = vmatprep.subr.bf16.mxu1 %v6834_v57  ;;  %v6883_v25 = vld [vmem:[#allocation9 + $0x498] ss:$28 sps:$4 sm:$0xff]   ;;  %v6886_v57 = vld [vmem:[#allocation9 + $0x4a0] ss:$28 sps:$4 sm:$0xff]  }
 0x542   :  { %5013 = vmatpush1.bf16.msra.mxu0 %v6829_v26  ;;  %5095 = vmatpush1.bf16.msra.mxu1 %v6832_v16  ;;  %v6891_v26 = vld [vmem:[#allocation9 + $0x4d4] ss:$28 sps:$4 sm:$0xff]   ;;  %v6894_v16 = vld [vmem:[#allocation9 + $0x4dc] ss:$28 sps:$4 sm:$0xff]  }
 0x543   :  { %5014 = vmatprep.subr.bf16.mxu0 %v6837_v27  ;;  %5096 = vmatprep.subr.bf16.mxu1 %v6840_v28  ;;  %v6889_v27 = vld [vmem:[#allocation9 + $0x4d0] ss:$28 sps:$4 sm:$0xff]   ;;  %v6892_v28 = vld [vmem:[#allocation9 + $0x4d8] ss:$28 sps:$4 sm:$0xff]  }
 0x546   :  { %5015 = vmatpush1.bf16.msra.mxu0 %v6835_v29  ;;  %5097 = vmatpush1.bf16.msra.mxu1 %v6838_v30  ;;  %v6897_v29 = vld [vmem:[#allocation9 + $0x50c] ss:$28 sps:$4 sm:$0xff]   ;;  %v6900_v30 = vld [vmem:[#allocation9 + $0x514] ss:$28 sps:$4 sm:$0xff]  }
 0x547   :  { %5016 = vmatprep.subr.bf16.mxu0 %v6843_v31  ;;  %5098 = vmatprep.subr.bf16.mxu1 %v6846_v32  ;;  %v6895_v31 = vld [vmem:[#allocation9 + $0x508] ss:$28 sps:$4 sm:$0xff]   ;;  %v6898_v32 = vld [vmem:[#allocation9 + $0x510] ss:$28 sps:$4 sm:$0xff]  }
 0x54a   :  { %5017 = vmatpush1.bf16.msra.mxu0 %v6841_v33  ;;  %5099 = vmatpush1.bf16.msra.mxu1 %v6844_v34  ;;  %v6903_v33 = vld [vmem:[#allocation9 + $0x544] ss:$28 sps:$4 sm:$0xff]   ;;  %v6906_v34 = vld [vmem:[#allocation9 + $0x54c] ss:$28 sps:$4 sm:$0xff]  }
 0x54b   :  { %5018 = vmatprep.subr.bf16.mxu0 %v6849_v35  ;;  %5100 = vmatprep.subr.bf16.mxu1 %v6852_v36  ;;  %v6901_v35 = vld [vmem:[#allocation9 + $0x540] ss:$28 sps:$4 sm:$0xff]   ;;  %v6904_v36 = vld [vmem:[#allocation9 + $0x548] ss:$28 sps:$4 sm:$0xff]  }
 0x54e   :  { %5019 = vmatpush1.bf16.msra.mxu0 %v6847_v37  ;;  %5101 = vmatpush1.bf16.msra.mxu1 %v6850_v38  ;;  %v6909_v37 = vld [vmem:[#allocation9 + $0x57c] ss:$28 sps:$4 sm:$0xff]   ;;  %v6912_v38 = vld [vmem:[#allocation9 + $0x584] ss:$28 sps:$4 sm:$0xff]  }
 0x54f   :  { %5029 = vmatprep.subr.bf16.mxu0 %v6855_v39  ;;  %5111 = vmatprep.subr.bf16.mxu1 %v6858_v40  ;;  %v6907_v39 = vld [vmem:[#allocation9 + $0x578] ss:$28 sps:$4 sm:$0xff]   ;;  %v6910_v40 = vld [vmem:[#allocation9 + $0x580] ss:$28 sps:$4 sm:$0xff]  }
 0x5e4   :  { %v3744_v44 = vpop.f32.mrb[12].mxu0  ;;  %v7497_v45 = vpop.f32.mrb[16].mxu1 }
 0x5e5   :  { %v3745_v46 = vadd.f32 %v3744_v44, %v3533_v0  ;;  %v3746_v47 = vpop.f32.mrb[13].mxu0  ;;  %v3787_v48 = vpop.f32.mrb[17].mxu1  ;;  %v6915_v0 = vld [vmem:[#allocation9 + $0x5b4] ss:$28 sps:$4 sm:$0xff]  }
 0x5e6   :  { %v3747_v49 = vadd.f32 %v3746_v47, %v3537_v42  ;;  %v3788_v50 = vadd.f32 %v3787_v48, %v3545_v43  ;;  %v3748_v51 = vpop.f32.mrb[14].mxu0  ;;  %v3789_v52 = vpop.f32.mrb[18].mxu1  ;;  %v6918_v42 = vld [vmem:[#allocation9 + $0x5bc] ss:$28 sps:$4 sm:$0xff]   ;;  %v6913_v43 = vld [vmem:[#allocation9 + $0x5b0] ss:$28 sps:$4 sm:$0xff]  }
 0x5e7   :  { %v3792_v53 = vmax.f32 %v3745_v46, 0.0  ;;  %v3749_v59 = vpop.f32.mrb[15].mxu0  ;;  %v3790_v60 = vpop.f32.mrb[19].mxu1  ;;  %v6916_v44 = vld [vmem:[#allocation9 + $0x5b8] ss:$28 sps:$4 sm:$0xff]  }
 0x5e8   :  { %v3793_v61 = vmax.f32 %v3747_v49, 0.0  ;;  %v3795_v62 = vmax.f32 %v3788_v50, 0.0  ;;  %v6921_v46 = vld [vmem:[#allocation9 + $0x5ec] ss:$28 sps:$4 sm:$0xff]   ;;  %v6924_v47 = vld [vmem:[#allocation9 + $0x5f4] ss:$28 sps:$4 sm:$0xff]  }
 0x5e9   :  { %v7501_v3 = vpack.c.bf16 %v3792_v53, %v3792_v53  ;;  %v6919_v48 = vld [vmem:[#allocation9 + $0x5e8] ss:$28 sps:$4 sm:$0xff]   ;;  %v6922_v49 = vld [vmem:[#allocation9 + $0x5f0] ss:$28 sps:$4 sm:$0xff]   ;;  %v6925_v52 = vld [vmem:[#allocation9 + $0x620] ss:$28 sps:$4 sm:$0xff]  }
 0x5ea   :  { %v7499_v63 = vpack.c.bf16 %v3793_v61, %v3793_v61  ;;  %v7505_v9 = vpack.c.bf16 %v3795_v62, %v3795_v62  ;;  %v6927_v50 = vld [vmem:[#allocation9 + $0x624] ss:$28 sps:$4 sm:$0xff]   ;;  %v6930_v51 = vld [vmem:[#allocation9 + $0x62c] ss:$28 sps:$4 sm:$0xff]   ;;  %v6933_v59 = vld [vmem:[#allocation9 + $0x65c] ss:$28 sps:$4 sm:$0xff]  }
 0x5eb   :  { %v6928_v53 = vld [vmem:[#allocation9 + $0x628] ss:$28 sps:$4 sm:$0xff]   ;;  %v6931_v61 = vld [vmem:[#allocation9 + $0x658] ss:$28 sps:$4 sm:$0xff]   ;;  %v6934_v62 = vld [vmem:[#allocation9 + $0x660] ss:$28 sps:$4 sm:$0xff]  }
 0x5ec   :  { %5020 = vmatprep.mubr.bf16.mxu0 %v7499_v63  ;;  %5102 = vmatprep.mubr.bf16.mxu1 %v7499_v63  ;;  %v6936_v60 = vld [vmem:[#allocation9 + $0x664] ss:$28 sps:$4 sm:$0xff]  }
 0x5ed   :  { %5021 = vmatmul.mubr.bf16.vlgmr.msra.gmra.mrb[16].mxu0 %v7501_v3  ;;  %5103 = vmatmul.mubr.bf16.vlgmr.msra.gmra.mrb[20].mxu1 %v7501_v3 }
 0x5ee   :  { %5030 = vmatpush1.bf16.msra.mxu0 %v6853_v1  ;;  %5112 = vmatpush1.bf16.msra.mxu1 %v6856_v2  ;;  %v3541_v1 = vrot.slane %v7489_v41, %v7454_v4  ;;  %v6939_v2 = vld [vmem:[#allocation9 + $0x694] ss:$28 sps:$4 sm:$0xff]  }
 0x5ef   :  { %5061 = vmatprep.mubr.bf16.mxu0 %v7505_v9  ;;  %5143 = vmatprep.mubr.bf16.mxu1 %v7505_v9  ;;  %v6951_v41 = vld [vmem:[#allocation9 + $0x14] ss:$28 sps:$4 sm:$0xff]  }
 0x5f0   :  { %5031 = vmatprep.subr.bf16.mxu0 %v6861_v6  ;;  %5113 = vmatprep.subr.bf16.mxu1 %v6864_v7  ;;  %v6942_v6 = vld [vmem:[#allocation9 + $0x69c] ss:$28 sps:$4 sm:$0xff]   ;;  %v6937_v7 = vld [vmem:[#allocation9 + $0x690] ss:$28 sps:$4 sm:$0xff]  }
 0x5f2   :  { %5032 = vmatpush1.bf16.msra.mxu0 %v6859_v11  ;;  %5114 = vmatpush1.bf16.msra.mxu1 %v6862_v12  ;;  %v6940_v11 = vld [vmem:[#allocation9 + $0x698] ss:$28 sps:$4 sm:$0xff]   ;;  %v3786_v12 = vadd.f32 %v7497_v45, %v3541_v1  ;;  %v7007_v1 = vld [vmem:[#allocation9 + $0x600] ss:$28 sps:$4 sm:$0xff]  }
 0x5f3   :  { %5033 = vmatprep.subr.bf16.mxu0 %v6867_v13  ;;  %5115 = vmatprep.subr.bf16.mxu1 %v6870_v14  ;;  %v6945_v13 = vld [vmem:[#allocation9 + $0x6cc] ss:$28 sps:$4 sm:$0xff]   ;;  %v6948_v14 = vld [vmem:[#allocation9 + $0x6d4] ss:$28 sps:$4 sm:$0xff]  }
 0x5f4   :  { %v6953_v45 = vld [vmem:[#allocation9 + $0x18] ss:$28 sps:$4 sm:$0xff]  }
 0x5f6   :  { %5034 = vmatpush1.bf16.msra.mxu0 %v6865_v15  ;;  %5116 = vmatpush1.bf16.msra.mxu1 %v6868_v17  ;;  %v6943_v15 = vld [vmem:[#allocation9 + $0x6c8] ss:$28 sps:$4 sm:$0xff]   ;;  %v6946_v17 = vld [vmem:[#allocation9 + $0x6d0] ss:$28 sps:$4 sm:$0xff]  }
 0x5f7   :  { %5035 = vmatprep.subr.bf16.mxu0 %v6873_v18  ;;  %5117 = vmatprep.subr.bf16.mxu1 %v6876_v8  ;;  %v3794_v18 = vmax.f32 %v3786_v12, 0.0  ;;  %v6952_v8 = vld [vmem:[#allocation9 + $0x1d8] ss:$28 sps:$4 sm:$0xff]   ;;  %v7009_v12 = vld [vmem:[#allocation9 + $0x2b0] ss:$28 sps:$4 sm:$0xff]  }
 0x5fa   :  { %5036 = vmatpush1.bf16.msra.mxu0 %v6871_v10  ;;  %5118 = vmatpush1.bf16.msra.mxu1 %v6874_v19  ;;  %v6949_v10 = vld [vmem:[#allocation9 + $0x10] ss:$28 sps:$4 sm:$0xff]   ;;  %v7514_v19 = vpack.c.bf16 %v3794_v18, %v3794_v18 }
 0x5fb   :  { %5037 = vmatprep.subr.bf16.mxu0 %v6879_v20  ;;  %5119 = vmatprep.subr.bf16.mxu1 %v6882_v54  ;;  %v6956_v20 = vld [vmem:[#allocation9 + $0x4c] ss:$28 sps:$4 sm:$0xff]  }
 0x5fc   :  { %v6957_v54 = vld [vmem:[#allocation9 + $0x210] ss:$28 sps:$4 sm:$0xff]  }
 0x5fd   :  { %v7018_v18 = vld [vmem:[#allocation9 + $0x4b0] ss:$28 sps:$4 sm:$0xff]  }
 0x5fe   :  { %5038 = vmatpush1.bf16.msra.mxu0 %v6877_v21  ;;  %5120 = vmatpush1.bf16.msra.mxu1 %v6880_v22  ;;  %v6954_v21 = vld [vmem:[#allocation9 + $0x48] ss:$28 sps:$4 sm:$0xff]   ;;  %v6958_v22 = vld [vmem:[#allocation9 + $0x50] ss:$28 sps:$4 sm:$0xff]  }
 0x5ff   :  { %5039 = vmatprep.subr.bf16.mxu0 %v6885_v23  ;;  %5121 = vmatprep.subr.bf16.mxu1 %v6888_v24  ;;  %v6961_v23 = vld [vmem:[#allocation9 + $0x84] ss:$28 sps:$4 sm:$0xff]  }
 0x600   :  { %v6962_v24 = vld [vmem:[#allocation9 + $0x248] ss:$28 sps:$4 sm:$0xff]  }
 0x602   :  { %5040 = vmatpush1.bf16.msra.mxu0 %v6883_v25  ;;  %5122 = vmatpush1.bf16.msra.mxu1 %v6886_v57  ;;  %v6959_v25 = vld [vmem:[#allocation9 + $0x80] ss:$28 sps:$4 sm:$0xff]   ;;  %v6963_v57 = vld [vmem:[#allocation9 + $0x88] ss:$28 sps:$4 sm:$0xff]  }
 0x603   :  { %5041 = vmatprep.subr.bf16.mxu0 %v6891_v26  ;;  %5123 = vmatprep.subr.bf16.mxu1 %v6894_v16  ;;  %v6966_v26 = vld [vmem:[#allocation9 + $0xbc] ss:$28 sps:$4 sm:$0xff]  }
 0x604   :  { %v6967_v16 = vld [vmem:[#allocation9 + $0x280] ss:$28 sps:$4 sm:$0xff]  }
 0x606   :  { %5042 = vmatpush1.bf16.msra.mxu0 %v6889_v27  ;;  %5124 = vmatpush1.bf16.msra.mxu1 %v6892_v28  ;;  %v6964_v27 = vld [vmem:[#allocation9 + $0xb8] ss:$28 sps:$4 sm:$0xff]   ;;  %v6968_v28 = vld [vmem:[#allocation9 + $0xc0] ss:$28 sps:$4 sm:$0xff]  }
 0x607   :  { %5043 = vmatprep.subr.bf16.mxu0 %v6897_v29  ;;  %5125 = vmatprep.subr.bf16.mxu1 %v6900_v30  ;;  %v6971_v29 = vld [vmem:[#allocation9 + $0xf4] ss:$28 sps:$4 sm:$0xff]  }
 0x608   :  { %v6969_v30 = vld [vmem:[#allocation9 + $0xf0] ss:$28 sps:$4 sm:$0xff]  }
 0x60a   :  { %5044 = vmatpush1.bf16.msra.mxu0 %v6895_v31  ;;  %5126 = vmatpush1.bf16.msra.mxu1 %v6898_v32  ;;  %v6973_v31 = vld [vmem:[#allocation9 + $0xf8] ss:$28 sps:$4 sm:$0xff]   ;;  %v6976_v32 = vld [vmem:[#allocation9 + $0x12c] ss:$28 sps:$4 sm:$0xff]  }
 0x60b   :  { %5045 = vmatprep.subr.bf16.mxu0 %v6903_v33  ;;  %5127 = vmatprep.subr.bf16.mxu1 %v6906_v34  ;;  %v6977_v33 = vld [vmem:[#allocation9 + $0x2f0] ss:$28 sps:$4 sm:$0xff]   ;;  %v6974_v34 = vld [vmem:[#allocation9 + $0x128] ss:$28 sps:$4 sm:$0xff]  }
 0x60e   :  { %5046 = vmatpush1.bf16.msra.mxu0 %v6901_v35  ;;  %5128 = vmatpush1.bf16.msra.mxu1 %v6904_v36  ;;  %v6978_v35 = vld [vmem:[#allocation9 + $0x130] ss:$28 sps:$4 sm:$0xff]   ;;  %v6981_v36 = vld [vmem:[#allocation9 + $0x164] ss:$28 sps:$4 sm:$0xff]  }
 0x60f   :  { %5047 = vmatprep.subr.bf16.mxu0 %v6909_v37  ;;  %5129 = vmatprep.subr.bf16.mxu1 %v6912_v38  ;;  %v6982_v37 = vld [vmem:[#allocation9 + $0x328] ss:$28 sps:$4 sm:$0xff]   ;;  %v6979_v38 = vld [vmem:[#allocation9 + $0x160] ss:$28 sps:$4 sm:$0xff]  }
 0x612   :  { %5048 = vmatpush1.bf16.msra.mxu0 %v6907_v39  ;;  %5130 = vmatpush1.bf16.msra.mxu1 %v6910_v40  ;;  %v6983_v39 = vld [vmem:[#allocation9 + $0x168] ss:$28 sps:$4 sm:$0xff]   ;;  %v6986_v40 = vld [vmem:[#allocation9 + $0x19c] ss:$28 sps:$4 sm:$0xff]  }
 0x613   :  { %5049 = vmatprep.subr.bf16.mxu0 %v6915_v0  ;;  %5131 = vmatprep.subr.bf16.mxu1 %v6918_v42  ;;  %v6987_v0 = vld [vmem:[#allocation9 + $0x360] ss:$28 sps:$4 sm:$0xff]   ;;  %v6984_v42 = vld [vmem:[#allocation9 + $0x198] ss:$28 sps:$4 sm:$0xff]  }
 0x616   :  { %5050 = vmatpush1.bf16.msra.mxu0 %v6913_v43  ;;  %5132 = vmatpush1.bf16.msra.mxu1 %v6916_v44  ;;  %v6988_v43 = vld [vmem:[#allocation9 + $0x1a0] ss:$28 sps:$4 sm:$0xff]   ;;  %v6991_v44 = vld [vmem:[#allocation9 + $0x1d4] ss:$28 sps:$4 sm:$0xff]  }
 0x617   :  { %5051 = vmatprep.subr.bf16.mxu0 %v6921_v46  ;;  %5133 = vmatprep.subr.bf16.mxu1 %v6924_v47  ;;  %v6992_v46 = vld [vmem:[#allocation9 + $0x558] ss:$28 sps:$4 sm:$0xff]   ;;  %v6989_v47 = vld [vmem:[#allocation9 + $0x1d0] ss:$28 sps:$4 sm:$0xff]  }
 0x61a   :  { %5052 = vmatpush1.bf16.msra.mxu0 %v6919_v48  ;;  %5134 = vmatpush1.bf16.msra.mxu1 %v6922_v49  ;;  %v6993_v48 = vld [vmem:[#allocation9 + $0x398] ss:$28 sps:$4 sm:$0xff]   ;;  %v6996_v49 = vld [vmem:[#allocation9 + $0x20c] ss:$28 sps:$4 sm:$0xff]  }
 0x61b   :  { %5053 = vmatprep.subr.bf16.mxu0 %v6927_v50  ;;  %5135 = vmatprep.subr.bf16.mxu1 %v6930_v51  ;;  %v6997_v50 = vld [vmem:[#allocation9 + $0x590] ss:$28 sps:$4 sm:$0xff]   ;;  %v6994_v51 = vld [vmem:[#allocation9 + $0x208] ss:$28 sps:$4 sm:$0xff]  }
 0x61e   :  { %5054 = vmatpush1.bf16.msra.mxu0 %v6925_v52  ;;  %5136 = vmatpush1.bf16.msra.mxu1 %v6928_v53  ;;  %v6998_v52 = vld [vmem:[#allocation9 + $0x3d0] ss:$28 sps:$4 sm:$0xff]   ;;  %v7001_v53 = vld [vmem:[#allocation9 + $0x244] ss:$28 sps:$4 sm:$0xff]  }
 0x61f   :  { %5055 = vmatprep.subr.bf16.mxu0 %v6933_v59  ;;  %5137 = vmatprep.subr.bf16.mxu1 %v6936_v60  ;;  %v7002_v59 = vld [vmem:[#allocation9 + $0x5c8] ss:$28 sps:$4 sm:$0xff]   ;;  %v6999_v60 = vld [vmem:[#allocation9 + $0x240] ss:$28 sps:$4 sm:$0xff]  }
 0x622   :  { %5056 = vmatpush1.bf16.msra.mxu0 %v6931_v61  ;;  %5138 = vmatpush1.bf16.msra.mxu1 %v6934_v62  ;;  %v7003_v61 = vld [vmem:[#allocation9 + $0x408] ss:$28 sps:$4 sm:$0xff]   ;;  %v7006_v62 = vld [vmem:[#allocation9 + $0x27c] ss:$28 sps:$4 sm:$0xff]  }
 0x623   :  { %5057 = vmatprep.subr.bf16.mxu0 %v6939_v2  ;;  %5139 = vmatprep.subr.bf16.mxu1 %v6942_v6  ;;  %v7004_v2 = vld [vmem:[#allocation9 + $0x278] ss:$28 sps:$4 sm:$0xff]   ;;  %v7008_v6 = vld [vmem:[#allocation9 + $0x440] ss:$28 sps:$4 sm:$0xff]  }
 0x626   :  { %5058 = vmatpush1.bf16.msra.mxu0 %v6937_v7  ;;  %5140 = vmatpush1.bf16.msra.mxu1 %v6940_v11  ;;  %v7011_v7 = vld [vmem:[#allocation9 + $0x2b4] ss:$28 sps:$4 sm:$0xff]  }
 0x627   :  { %5059 = vmatprep.subr.bf16.mxu0 %v6945_v13  ;;  %5141 = vmatprep.subr.bf16.mxu1 %v6948_v14  ;;  %v7012_v11 = vld [vmem:[#allocation9 + $0x638] ss:$28 sps:$4 sm:$0xff]   ;;  %v7016_v14 = vld [vmem:[#allocation9 + $0x2ec] ss:$28 sps:$4 sm:$0xff]  }
 0x628   :  { %v7013_v13 = vld [vmem:[#allocation9 + $0x478] ss:$28 sps:$4 sm:$0xff]  }
 0x62a   :  { %5060 = vmatpush1.bf16.msra.mxu0 %v6943_v15  ;;  %5142 = vmatpush1.bf16.msra.mxu1 %v6946_v17  ;;  %v7017_v15 = vld [vmem:[#allocation9 + $0x670] ss:$28 sps:$4 sm:$0xff]   ;;  %v7014_v17 = vld [vmem:[#allocation9 + $0x2e8] ss:$28 sps:$4 sm:$0xff]  }
 0x62b   :  { %5152 = vmatprep.subr.bf16.mxu0 %v6951_v41  ;;  %6030 = vmatprep.subr.bf16.mxu1 %v6952_v8  ;;  %v7021_v41 = vld [vmem:[#allocation9 + $0x324] ss:$28 sps:$4 sm:$0xff]  }
 0x62c   :  { %v7022_v8 = vld [vmem:[#allocation9 + $0x6a8] ss:$28 sps:$4 sm:$0xff]  }
 0x62d   :  { %5062 = vmatmul.mubr.bf16.vlgmr.msra.gmra.mrb[16].mxu0 %v7514_v19  ;;  %5144 = vmatmul.mubr.bf16.vlgmr.msra.gmra.mrb[20].mxu1 %v7514_v19 }
 0x62e   :  { %5153 = vmatpush1.bf16.msra.mxu0 %v6949_v10  ;;  %5184 = vmatprep.mubr.bf16.mxu0 %v7499_v63  ;;  %v7019_v10 = vld [vmem:[#allocation9 + $0x320] ss:$28 sps:$4 sm:$0xff]  }
 0x62f   :  { %6031 = vmatpush3.bf16.msra.mxu1 %v6953_v45  ;;  %5266 = vmatprep.mubr.bf16.mxu1 %v7499_v63  ;;  %v6972_v63 = vld [vmem:[#allocation9 + $0x2b8] ss:$28 sps:$4 sm:$0xff]   ;;  %v7023_v45 = vld [vmem:[#allocation9 + $0x4e8] ss:$28 sps:$4 sm:$0xff]  }
 0x630   :  { %5154 = vmatprep.subr.bf16.mxu0 %v6956_v20  ;;  %6032 = vmatprep.subr.bf16.mxu1 %v6957_v54  ;;  %v7026_v20 = vld [vmem:[#allocation9 + $0x35c] ss:$28 sps:$4 sm:$0xff]  }
 0x631   :  { %v7027_v54 = vld [vmem:[#allocation9 + $0x6e0] ss:$28 sps:$4 sm:$0xff]  }
 0x632   :  { %5155 = vmatpush1.bf16.msra.mxu0 %v6954_v21  ;;  %v7024_v21 = vld [vmem:[#allocation9 + $0x358] ss:$28 sps:$4 sm:$0xff]  }
 0x633   :  { %6033 = vmatpush3.bf16.msra.mxu1 %v6958_v22  ;;  %5156 = vmatprep.subr.bf16.mxu0 %v6961_v23  ;;  %v7028_v22 = vld [vmem:[#allocation9 + $0x520] ss:$28 sps:$4 sm:$0xff]   ;;  %v7031_v23 = vld [vmem:[#allocation9 + $0x394] ss:$28 sps:$4 sm:$0xff]  }
 0x634   :  { %6034 = vmatprep.subr.bf16.mxu1 %v6962_v24  ;;  %v7029_v24 = vld [vmem:[#allocation9 + $0x390] ss:$28 sps:$4 sm:$0xff]  }
 0x636   :  { %5157 = vmatpush1.bf16.msra.mxu0 %v6959_v25  ;;  %v7034_v25 = vld [vmem:[#allocation9 + $0x3cc] ss:$28 sps:$4 sm:$0xff]  }
 0x637   :  { %6035 = vmatpush3.bf16.msra.mxu1 %v6963_v57  ;;  %5158 = vmatprep.subr.bf16.mxu0 %v6966_v26  ;;  %v7032_v57 = vld [vmem:[#allocation9 + $0x3c8] ss:$28 sps:$4 sm:$0xff]  }
 0x638   :  { %6036 = vmatprep.subr.bf16.mxu1 %v6967_v16  ;;  %v7037_v26 = vld [vmem:[#allocation9 + $0x404] ss:$28 sps:$4 sm:$0xff]  }
 0x639   :  { %v7035_v16 = vld [vmem:[#allocation9 + $0x400] ss:$28 sps:$4 sm:$0xff]  }
 0x63a   :  { %5159 = vmatpush1.bf16.msra.mxu0 %v6964_v27  ;;  %v7040_v27 = vld [vmem:[#allocation9 + $0x43c] ss:$28 sps:$4 sm:$0xff]  }
 0x63b   :  { %6037 = vmatpush3.bf16.msra.mxu1 %v6968_v28  ;;  %5160 = vmatprep.subr.bf16.mxu0 %v6971_v29  ;;  %v7038_v28 = vld [vmem:[#allocation9 + $0x438] ss:$28 sps:$4 sm:$0xff]  }
 0x63c   :  { %6038 = vmatprep.subr.bf16.mxu1 %v6972_v63  ;;  %v7043_v29 = vld [vmem:[#allocation9 + $0x474] ss:$28 sps:$4 sm:$0xff]  }
 0x63d   :  { %v7041_v63 = vld [vmem:[#allocation9 + $0x470] ss:$28 sps:$4 sm:$0xff]  }
 0x63e   :  { %5161 = vmatpush1.bf16.msra.mxu0 %v6969_v30  ;;  %v7044_v30 = vld [vmem:[#allocation9 + $0x4a8] ss:$28 sps:$4 sm:$0xff]  }
 0x63f   :  { %6039 = vmatpush3.bf16.msra.mxu1 %v6973_v31  ;;  %5162 = vmatprep.subr.bf16.mxu0 %v6976_v32  ;;  %v7049_v31 = vld [vmem:[#allocation9 + $0x4e4] ss:$28 sps:$4 sm:$0xff]   ;;  %v7052_v32 = vld [vmem:[#allocation9 + $0x51c] ss:$28 sps:$4 sm:$0xff]  }
 0x640   :  { %6040 = vmatprep.subr.bf16.mxu1 %v6977_v33  ;;  %v7050_v33 = vld [vmem:[#allocation9 + $0x518] ss:$28 sps:$4 sm:$0xff]  }
 0x642   :  { %5163 = vmatpush1.bf16.msra.mxu0 %v6974_v34  ;;  %v7055_v34 = vld [vmem:[#allocation9 + $0x554] ss:$28 sps:$4 sm:$0xff]  }
 0x643   :  { %6041 = vmatpush3.bf16.msra.mxu1 %v6978_v35  ;;  %5164 = vmatprep.subr.bf16.mxu0 %v6981_v36  ;;  %v7053_v35 = vld [vmem:[#allocation9 + $0x550] ss:$28 sps:$4 sm:$0xff]  }
 0x644   :  { %6042 = vmatprep.subr.bf16.mxu1 %v6982_v37  ;;  %v7058_v36 = vld [vmem:[#allocation9 + $0x58c] ss:$28 sps:$4 sm:$0xff]  }
 0x645   :  { %v7056_v37 = vld [vmem:[#allocation9 + $0x588] ss:$28 sps:$4 sm:$0xff]  }
 0x646   :  { %5165 = vmatpush1.bf16.msra.mxu0 %v6979_v38  ;;  %v7061_v38 = vld [vmem:[#allocation9 + $0x5c4] ss:$28 sps:$4 sm:$0xff]  }
 0x647   :  { %6043 = vmatpush3.bf16.msra.mxu1 %v6983_v39  ;;  %5166 = vmatprep.subr.bf16.mxu0 %v6986_v40  ;;  %v7059_v39 = vld [vmem:[#allocation9 + $0x5c0] ss:$28 sps:$4 sm:$0xff]  }
 0x648   :  { %6044 = vmatprep.subr.bf16.mxu1 %v6987_v0  ;;  %v7064_v40 = vld [vmem:[#allocation9 + $0x5fc] ss:$28 sps:$4 sm:$0xff]  }
 0x649   :  { %v7062_v0 = vld [vmem:[#allocation9 + $0x5f8] ss:$28 sps:$4 sm:$0xff]  }
 0x64a   :  { %5167 = vmatpush1.bf16.msra.mxu0 %v6984_v42  ;;  %v7067_v42 = vld [vmem:[#allocation9 + $0x634] ss:$28 sps:$4 sm:$0xff]  }
 0x64b   :  { %6045 = vmatpush3.bf16.msra.mxu1 %v6988_v43  ;;  %5168 = vmatprep.subr.bf16.mxu0 %v6991_v44  ;;  %v7065_v43 = vld [vmem:[#allocation9 + $0x630] ss:$28 sps:$4 sm:$0xff]  }
 0x64c   :  { %6052 = vmatprep.subr.bf16.mxu1 %v6992_v46  ;;  %v7070_v44 = vld [vmem:[#allocation9 + $0x66c] ss:$28 sps:$4 sm:$0xff]  }
 0x64d   :  { %v7068_v46 = vld [vmem:[#allocation9 + $0x668] ss:$28 sps:$4 sm:$0xff]  }
 0x64e   :  { %5267 = vmatmul.mubr.bf16.vlgmr.msra.gmra.mrb[24].mxu1 %v7501_v3  ;;  %5169 = vmatpush1.bf16.msra.mxu0 %v6989_v47  ;;  %v7073_v47 = vld [vmem:[#allocation9 + $0x6a4] ss:$28 sps:$4 sm:$0xff]  }
 0x64f   :  { %6053 = vmatpush3.bf16.msra.mxu1 %v6993_v48  ;;  %5306 = vmatprep.mubr.bf16.mxu1 %v7505_v9  ;;  %v7071_v48 = vld [vmem:[#allocation9 + $0x6a0] ss:$28 sps:$4 sm:$0xff]  }
 0x650   :  { %5170 = vmatprep.subr.bf16.mxu0 %v6996_v49  ;;  %6054 = vmatprep.subr.bf16.mxu1 %v6997_v50  ;;  %v7076_v49 = vld [vmem:[#allocation9 + $0x6dc] ss:$28 sps:$4 sm:$0xff]  }
 0x651   :  { %v7074_v50 = vld [vmem:[#allocation9 + $0x6d8] ss:$28 sps:$4 sm:$0xff]  }
 0x652   :  { %5171 = vmatpush1.bf16.msra.mxu0 %v6994_v51  ;;  %v3527_v51 = vld [vmem:[%s7568_s11] sm:$0xff] }
 0x653   :  { %6055 = vmatpush3.bf16.msra.mxu1 %v6998_v52  ;;  %5172 = vmatprep.subr.bf16.mxu0 %v7001_v53  ;;  %v3804_v52 = vrot.slane %v3527_v51, %v7437_v56  ;;  %v3812_v53 = vrot.slane %v3527_v51, %v7454_v4 }
 0x654   :  { %6056 = vmatprep.subr.bf16.mxu1 %v7002_v59  ;;  %v3808_v59 = vrot.slane %v3527_v51, %v7445_v58 }
 0x656   :  { %5173 = vmatpush1.bf16.msra.mxu0 %v6999_v60  ;;  %v3816_v60 = vrot.slane %v3527_v51, %v7457_v5 }
 0x657   :  { %6057 = vmatpush3.bf16.msra.mxu1 %v7003_v61  ;;  %5174 = vmatprep.subr.bf16.mxu0 %v7006_v62 }
 0x658   :  { %6058 = vmatprep.subr.bf16.mxu1 %v7007_v1 }
 0x65a   :  { %5175 = vmatpush1.bf16.msra.mxu0 %v7004_v2 }
 0x65b   :  { %6059 = vmatpush3.bf16.msra.mxu1 %v7008_v6  ;;  %5176 = vmatprep.subr.bf16.mxu0 %v7011_v7 }
 0x65c   :  { %6060 = vmatprep.subr.bf16.mxu1 %v7012_v11 }
 0x65e   :  { %5177 = vmatpush1.bf16.msra.mxu0 %v7009_v12 }
 0x65f   :  { %6061 = vmatpush3.bf16.msra.mxu1 %v7013_v13  ;;  %5178 = vmatprep.subr.bf16.mxu0 %v7016_v14 }
 0x660   :  { %6062 = vmatprep.subr.bf16.mxu1 %v7017_v15 }
 0x662   :  { %5179 = vmatpush1.bf16.msra.mxu0 %v7014_v17 }
 0x663   :  { %6063 = vmatpush3.bf16.msra.mxu1 %v7018_v18  ;;  %5180 = vmatprep.subr.bf16.mxu0 %v7021_v41  ;;  %v3827_v18 = vsub.s32 6, %v7434_v55 }
 0x664   :  { %6064 = vmatprep.subr.bf16.mxu1 %v7022_v8 }
 0x665   :  { %v3828_v41 = vrot.slane %v3527_v51, %v3827_v18 }
 0x666   :  { %5181 = vmatpush1.bf16.msra.mxu0 %v7019_v10 }
 0x667   :  { %6065 = vmatpush3.bf16.msra.mxu1 %v7023_v45  ;;  %5182 = vmatprep.subr.bf16.mxu0 %v7026_v20 }
 0x668   :  { %6066 = vmatprep.subr.bf16.mxu1 %v7027_v54 }
 0x66a   :  { %5183 = vmatpush1.bf16.msra.mxu0 %v7024_v21 }
 0x66b   :  { %6067 = vmatpush3.bf16.msra.mxu1 %v7028_v22  ;;  %5193 = vmatprep.subr.bf16.mxu0 %v7031_v23  ;;  %v3819_v23 = vsub.s32 4, %v7434_v55 }
 0x66d   :  { %5185 = vmatmul.mubr.bf16.vlgmr.msra.gmra.mrb[20].mxu0 %v7501_v3  ;;  %v7046_v3 = vld [vmem:[#allocation9 + $0x4ac] ss:$28 sps:$4 sm:$0xff]  }
 0x66e   :  { %5307 = vmatmul.mubr.bf16.vlgmr.msra.gmra.mrb[28].mxu1 %v7514_v19  ;;  %5194 = vmatpush1.bf16.msra.mxu0 %v7029_v24  ;;  %v3823_v24 = vsub.s32 5, %v7434_v55 }
 0x66f   :  { %5225 = vmatprep.mubr.bf16.mxu0 %v7505_v9  ;;  %5195 = vmatprep.subr.bf16.mxu0 %v7034_v25  ;;  %v7047_v9 = vld [vmem:[#allocation9 + $0x4e0] ss:$28 sps:$4 sm:$0xff]   ;;  %v3820_v25 = vrot.slane %v3527_v51, %v3819_v23 }
 0x672   :  { %5196 = vmatpush1.bf16.msra.mxu0 %v7032_v57  ;;  %v3824_v57 = vrot.slane %v3527_v51, %v3823_v24 }
 0x673   :  { %5197 = vmatprep.subr.bf16.mxu0 %v7037_v26 }
 0x676   :  { %5198 = vmatpush1.bf16.msra.mxu0 %v7035_v16 }
 0x677   :  { %5199 = vmatprep.subr.bf16.mxu0 %v7040_v27 }
 0x67a   :  { %5200 = vmatpush1.bf16.msra.mxu0 %v7038_v28 }
 0x67b   :  { %5201 = vmatprep.subr.bf16.mxu0 %v7043_v29 }
 0x67e   :  { %5202 = vmatpush1.bf16.msra.mxu0 %v7041_v63 }
 0x67f   :  { %5203 = vmatprep.subr.bf16.mxu0 %v7046_v3 }
 0x682   :  { %5204 = vmatpush1.bf16.msra.mxu0 %v7044_v30 }
 0x683   :  { %5205 = vmatprep.subr.bf16.mxu0 %v7049_v31 }
 0x686   :  { %5206 = vmatpush1.bf16.msra.mxu0 %v7047_v9 }
 0x687   :  { %5207 = vmatprep.subr.bf16.mxu0 %v7052_v32 }
 0x68a   :  { %5208 = vmatpush1.bf16.msra.mxu0 %v7050_v33 }
 0x68b   :  { %5209 = vmatprep.subr.bf16.mxu0 %v7055_v34 }
 0x68e   :  { %5210 = vmatpush1.bf16.msra.mxu0 %v7053_v35 }
 0x68f   :  { %5211 = vmatprep.subr.bf16.mxu0 %v7058_v36 }
 0x692   :  { %5212 = vmatpush1.bf16.msra.mxu0 %v7056_v37 }
 0x693   :  { %5213 = vmatprep.subr.bf16.mxu0 %v7061_v38 }
 0x696   :  { %5214 = vmatpush1.bf16.msra.mxu0 %v7059_v39 }
 0x697   :  { %5215 = vmatprep.subr.bf16.mxu0 %v7064_v40 }
 0x69a   :  { %5216 = vmatpush1.bf16.msra.mxu0 %v7062_v0 }
 0x69b   :  { %5217 = vmatprep.subr.bf16.mxu0 %v7067_v42 }
 0x69e   :  { %5218 = vmatpush1.bf16.msra.mxu0 %v7065_v43 }
 0x69f   :  { %5219 = vmatprep.subr.bf16.mxu0 %v7070_v44 }
 0x6a2   :  { %5220 = vmatpush1.bf16.msra.mxu0 %v7068_v46 }
 0x6a3   :  { %5221 = vmatprep.subr.bf16.mxu0 %v7073_v47 }
 0x6a6   :  { %5222 = vmatpush1.bf16.msra.mxu0 %v7071_v48 }
 0x6a7   :  { %5223 = vmatprep.subr.bf16.mxu0 %v7076_v49 }
 0x6aa   :  { %5224 = vmatpush1.bf16.msra.mxu0 %v7074_v50 }
 0x6ad   :  { %5226 = vmatmul.mubr.bf16.vlgmr.msra.gmra.mrb[20].mxu0 %v7514_v19 }
 0x700   :  { %v5063_v61 = vpop.f32.mrb[16].mxu0  ;;  %v5145_v62 = vpop.f32.mrb[20].mxu1 }
 0x701   :  { %v6084_v1 = vadd.f32 %v5063_v61, %v3804_v52  ;;  %v6086_v2 = vadd.f32 %v5145_v62, %v3812_v53  ;;  %v5065_v6 = vpop.f32.mrb[17].mxu0  ;;  %v5147_v7 = vpop.f32.mrb[21].mxu1 }
 0x702   :  { %v6085_v11 = vadd.f32 %v5065_v6, %v3808_v59  ;;  %v6087_v19 = vadd.f32 %v5147_v7, %v3816_v60  ;;  %v5067_v12 = vpop.f32.mrb[18].mxu0  ;;  %v5149_v13 = vpop.f32.mrb[22].mxu1 }
 0x703   :  { %5314 = vst [vmem:[%s7569_s12] sm:$0xff] %v6084_v1  ;;  %5316 = vst [vmem:[%s7569_s12 + $0x10] sm:$0xff] %v6086_v2  ;;  %v5068_v56 = vpop.f32.mrb[19].mxu0  ;;  %v5150_v58 = vpop.f32.mrb[23].mxu1 }
 0x704   :  { %5315 = vst [vmem:[%s7569_s12 + $0x8] sm:$0xff] %v6085_v11  ;;  %5317 = vst [vmem:[%s7569_s12 + $0x18] sm:$0xff] %v6087_v19 }
 0x721   :  { %v6046_v4 = vpop.f32.mrb[24].mxu1 }
 0x722   :  { %v6047_v5 = vpop.f32.mrb[25].mxu1 }
 0x723   :  { %v6048_v14 = vadd.f32 %v6047_v5, %v6046_v4  ;;  %v6049_v15 = vpop.f32.mrb[26].mxu1 }
 0x724   :  { %v6050_v17 = vpop.f32.mrb[27].mxu1 }
 0x725   :  { %v5269_v45 = vadd.f32 %v6048_v14, %v3828_v41 }
 0x741   :  { %v6068_v8 = vpop.f32.mrb[28].mxu1 }
 0x742   :  { %v6069_v10 = vpop.f32.mrb[29].mxu1 }
 0x743   :  { %v6070_v20 = vadd.f32 %v6069_v10, %v6068_v8  ;;  %v6071_v54 = vpop.f32.mrb[30].mxu1 }
 0x744   :  { %v6072_v21 = vpop.f32.mrb[31].mxu1 }
 0x745   :  { %v5309_v22 = vadd.f32 %v6070_v20, %v5269_v45 }
 0x747   :  { %5320 = vst [vmem:[%s7569_s12 + $0x30] sm:$0xff] %v5309_v22 }
 0x780   :  { %v5227_v26 = vpop.f32.mrb[20].mxu0 }
 0x781   :  { %v6088_v16 = vadd.f32 %v5227_v26, %v3820_v25  ;;  %v5229_v27 = vpop.f32.mrb[21].mxu0 }
 0x782   :  { %v6089_v28 = vadd.f32 %v5229_v27, %v3824_v57  ;;  %v5231_v29 = vpop.f32.mrb[22].mxu0 }
 0x783   :  { %5318 = vst [vmem:[%s7569_s12 + $0x20] sm:$0xff] %v6088_v16  ;;  %v5232_v63 = vpop.f32.mrb[23].mxu0 }
 0x784   :  { %5319 = vst [vmem:[%s7569_s12 + $0x28] sm:$0xff] %v6089_v28 }
 0x785   :  { %5333 = vsyncpa [#allocation3], 1 }
 0x786   :  { %5334 = vsyncpa [#allocation5], 1 }
 0x787   :  { %5335 = vsyncpa [#allocation8], 1 }

</bundles_post_ra>
